<compile_context>
chip_gen: v7x
topology: tpu7x:2x2x1
jax: 0.10.0
libtpu: 0.0.40
codegen_flags: <defaults>
</compile_context>

<pallas_src>
import functools

import jax
import jax.numpy as jnp
from jax import lax
from jax.experimental import pallas as pl
from jax.experimental.pallas import tpu as pltpu


# field indices in the flattened per-(head, head_dim) scalar table
_WQ, _BQ, _WK, _BK, _WVF, _BVF, _T, _FB = range(8)
_NUM_FIELDS = 8

_VPU_HEAD_DIM = 8     # head_dim <= this -> VPU/XLU attention (no MXU, no bf16)
_UNROLL_HEADS = 4     # E above this uses fori_loop (bounds live ranges/code size)


# ----------------------------- Pallas kernel ------------------------------ #

def _spatial_attn_kernel(w_ref, x_ref, o_ref, acc_ref, *,
                         num_groups, head_dim, expan_att_chans, n_valid):
    """One (batch, channel-group) step: qkv affine + E heads + fused conv."""
    G, D, E = num_groups, head_dim, expan_att_chans
    Hh = G * E
    Np = x_ref.shape[-1]
    g = pl.program_id(1)
    eps2 = jnp.float32(1e-24)            # F.normalize eps (1e-12), squared

    def off(field, h, d):                # flat offset into the 1D SMEM table
        return (field * Hh + h) * D + d

    x = x_ref[0, 0].astype(jnp.float32)  # (D, Np), lane-dense rows

    # accumulator starts at the fusion bias of this group's output channels
    acc_ref[...] = jnp.concatenate(
        [jnp.full((1, Np), w_ref[off(_FB, g, d)], jnp.float32)
         for d in range(D)], axis=0)

    def head_update(e):
        h = e * G + g                    # head index (matches torch reshape)

        # grouped 1x1 qkv conv for this head: per-(h, d) scalar affine on
        # lane-dense (1, Np) rows.  fus_w is already folded into the V affine.
        q_rows, k_rows, v_rows = [], [], []
        qss = kss = None
        for d in range(D):
            xr = x[d:d + 1, :]
            qr = xr * w_ref[off(_WQ, h, d)] + w_ref[off(_BQ, h, d)]
            kr = xr * w_ref[off(_WK, h, d)] + w_ref[off(_BK, h, d)]
            vr = xr * w_ref[off(_WVF, h, d)] + w_ref[off(_BVF, h, d)]
            q_rows.append(qr); k_rows.append(kr); v_rows.append(vr)
            qss = qr * qr if qss is None else qss + qr * qr
            kss = kr * kr if kss is None else kss + kr * kr

        # L2 norm over head_dim via EUP rsqrt; temperature folded into q scale
        t = w_ref[off(_T, h, 0)]
        qsc = t * lax.rsqrt(jnp.maximum(qss, eps2))          # (1, Np)
        ksc = lax.rsqrt(jnp.maximum(kss, eps2))              # (1, Np)

        # logits built TRANSPOSED (keys on sublanes, queries on lanes) so the
        # softmax denominator and per-dim outputs are lane-dense rows and the
        # normalised attention matrix is never materialised.
        if D <= _VPU_HEAD_DIM:
            # tiny head_dim: VPU outer products; one small XLU transpose turns
            # the normalised-k / scaled-v rows into columns.
            pad = (-2 * D) % 8
            stack = [k_rows[d] * ksc for d in range(D)] + v_rows
            if pad:
                stack.append(jnp.zeros((pad, Np), jnp.float32))
            kvT = jnp.transpose(jnp.concatenate(stack, axis=0))  # (Np, 2D+pad)
            logits_t = kvT[:, 0:1] * (q_rows[0] * qsc)
            for d in range(1, D):
                logits_t = logits_t + kvT[:, d:d + 1] * (q_rows[d] * qsc)
        else:
            # realistic head_dim: both contractions on the MXU in bf16.
            qn = (jnp.concatenate(q_rows, axis=0) * qsc).astype(jnp.bfloat16)
            kn = (jnp.concatenate(k_rows, axis=0) * ksc).astype(jnp.bfloat16)
            logits_t = lax.dot_general(kn, qn, (((0,), (0,)), ((), ())),
                                       preferred_element_type=jnp.float32)

        # softmax over keys (sublane axis).  Row-max skipped: logits are
        # t * cos(q, k) in [-|t|, |t|], so subtracting the scalar bound |t|
        # keeps exp() overflow-safe for learned t without an N^2 reduce.
        p = jnp.exp(logits_t - jnp.abs(t))                   # (Np, Np)
        if n_valid < Np:                                     # mask padded keys
            kid = lax.broadcasted_iota(jnp.int32, (Np, 1), 0)
            p = jnp.where(kid < n_valid, p, 0.0)
        l = jnp.sum(p, axis=0, keepdims=True)                # (1, Np) lane-dense
        rinv = pl.reciprocal(l, approx=True)                 # EUP

        # P @ V with fus_w folded in -> direct fusion-contribution rows.
        if D <= _VPU_HEAD_DIM:
            for d in range(D):
                contrib = jnp.sum(p * kvT[:, D + d:D + d + 1],
                                  axis=0, keepdims=True)     # (1, Np)
                acc_ref[d:d + 1, :] += contrib * rinv
        else:
            vn = jnp.concatenate(v_rows, axis=0).astype(jnp.bfloat16)
            out = lax.dot_general(vn, p.astype(jnp.bfloat16),
                                  (((1,), (0,)), ((), ())),
                                  preferred_element_type=jnp.float32)  # (D, Np)
            acc_ref[...] += out * rinv

    if E <= _UNROLL_HEADS:
        for e in range(E):
            head_update(e)
    else:
        def body(e, carry):
            head_update(e)
            return carry
        lax.fori_loop(0, E, body, 0)

    o_ref[0, 0] = acc_ref[...].astype(o_ref.dtype)


# ------------------------------ host wrapper ------------------------------- #

def _pack_scalar_table(params, C, G, D, E):
    """Flatten all per-(head, head_dim) scalars into one 1D f32 SMEM table."""
    Hh = G * E

    def per_head(w_ce):   # (C, E) -> (Hh, D); row h = e*G + g, col d; c = g*D + d
        return w_ce.reshape(G, D, E).transpose(2, 0, 1).reshape(Hh, D)

    w3 = params["qkv_w"].reshape(C, 3, E)       # [channel, (q|k|v), e]
    b3 = params["qkv_b"].reshape(C, 3, E)
    fw = per_head(params["fus_w"])              # fusion weight, folded into V
    fields = [
        per_head(w3[:, 0]), per_head(b3[:, 0]),             # _WQ, _BQ
        per_head(w3[:, 1]), per_head(b3[:, 1]),             # _WK, _BK
        per_head(w3[:, 2]) * fw, per_head(b3[:, 2]) * fw,   # _WVF, _BVF
        jnp.broadcast_to(params["t"][:, None], (Hh, D)),    # _T
        jnp.broadcast_to(params["fus_b"].reshape(1, G, D),
                         (E, G, D)).reshape(Hh, D),          # _FB
    ]
    return jnp.stack(fields, axis=0).astype(jnp.float32).reshape(-1)


def _vmem_limit_bytes(step_bytes):
    """Generation-aware scoped VMEM: <=~48 MiB on v7x, <=~96 MiB on v5e/v6e."""
    phys = 64 * 1024 * 1024                     # conservative (v7x) fallback
    try:
        phys = int(pltpu.get_tpu_info().vmem_capacity_bytes)
    except Exception:
        pass
    budget = min((phys * 3) // 4, 100 * 1024 * 1024)
    return int(min(max(2 * step_bytes, 32 * 1024 * 1024), budget))


def spatial_attention(x, params, num_chans, expan_att_chans):
    B, C, H, W = x.shape
    E, G = expan_att_chans, num_chans
    D = C // G                                  # head_dim = (E*C)/(G*E)
    N = H * W
    Np = ((N + 127) // 128) * 128               # lane-dense spatial axis

    x_dn = x.reshape(B, G, D, N)
    if Np != N:
        x_dn = jnp.pad(x_dn, ((0, 0), (0, 0), (0, 0), (0, Np - N)))
    wtab = _pack_scalar_table(params, C, G, D, E)

    kernel = functools.partial(
        _spatial_attn_kernel,
        num_groups=G, head_dim=D, expan_att_chans=E, n_valid=N)

    # per-step working set: ~2 live (Np, Np) f32 arrays + double-buffered
    # (D, Np) input/output blocks + the (D, Np) f32 accumulator + slack.
    step_bytes = 2 * Np * Np * 4 + 4 * D * Np * (x.dtype.itemsize + 4) + (1 << 20)

    out = pl.pallas_call(
        kernel,
        out_shape=jax.ShapeDtypeStruct((B, G, D, Np), x.dtype),
        grid_spec=pltpu.PrefetchScalarGridSpec(
            num_scalar_prefetch=1,              # flattened scalar table -> SMEM
            grid=(B, G),
            in_specs=[pl.BlockSpec((1, 1, D, Np), lambda b, g, w: (b, g, 0, 0))],
            out_specs=pl.BlockSpec((1, 1, D, Np), lambda b, g, w: (b, g, 0, 0)),
            scratch_shapes=[pltpu.VMEM((D, Np), jnp.float32)],
        ),
        compiler_params=pltpu.CompilerParams(
            dimension_semantics=("parallel", "parallel"),
            vmem_limit_bytes=_vmem_limit_bytes(step_bytes)),
    )(wtab, x_dn)

    out = out.reshape(B, C, Np)
    if Np != N:
        out = out[:, :, :N]
    return out.reshape(B, C, H, W)


# ------------------------------- reference --------------------------------- #

def init_params(key, embed_dim, num_chans, expan_att_chans):
    E = expan_att_chans
    num_heads = num_chans * E
    k1, k2, k3, k4 = jax.random.split(key, 4)
    return {
        # nn.Parameter(torch.ones(1, num_heads, 1, 1)) — deterministic but
        # non-trivial so per-head indexing is exercised.
        "t": 1.0 + 0.05 * jnp.arange(num_heads, dtype=jnp.float32),
        # group_qkv: Conv2d(C, C*E*3, 1, groups=C) -> weight (C*E*3, 1, 1, 1)
        "qkv_w": 0.5 * jax.random.normal(k1, (embed_dim * E * 3,), jnp.float32),
        "qkv_b": 0.1 * jax.random.normal(k2, (embed_dim * E * 3,), jnp.float32),
        # group_fus: Conv2d(C*E, C, 1, groups=C) -> weight (C, E, 1, 1)
        "fus_w": 0.5 * jax.random.normal(k3, (embed_dim, E), jnp.float32),
        "fus_b": 0.1 * jax.random.normal(k4, (embed_dim,), jnp.float32),
    }


def spatial_attention_ref(x, params, num_chans, expan_att_chans):
    """Pure-JAX mirror of the PyTorch forward (f32, HIGHEST precision)."""
    B, C, H, W = x.shape
    E = expan_att_chans
    num_heads = num_chans * E
    head_dim = (E * C) // num_heads
    N = H * W

    wq = params["qkv_w"].reshape(C, 3 * E)
    bq = params["qkv_b"].reshape(C, 3 * E)
    y = x[:, :, None, :, :] * wq[None, :, :, None, None] + bq[None, :, :, None, None]
    y = jnp.transpose(y, (0, 2, 1, 3, 4))            # (B, 3E, C, H, W)
    q = y[:, :E].reshape(B, num_heads, head_dim, N)
    k = y[:, E:2 * E].reshape(B, num_heads, head_dim, N)
    v = y[:, 2 * E:].reshape(B, num_heads, head_dim, N)

    eps = 1e-12
    qn = q / jnp.maximum(jnp.sqrt(jnp.sum(q * q, axis=-2, keepdims=True)), eps)
    kn = k / jnp.maximum(jnp.sqrt(jnp.sum(k * k, axis=-2, keepdims=True)), eps)

    attn = jnp.einsum("bhdn,bhdm->bhnm", qn, kn,
                      precision=jax.lax.Precision.HIGHEST)
    attn = attn * params["t"][None, :, None, None]
    attn = jax.nn.softmax(attn, axis=-1)
    out = jnp.einsum("bhnm,bhdm->bhdn", attn, v,
                     precision=jax.lax.Precision.HIGHEST)     # (B, heads, D, N)

    xr = out.reshape(B, E, C, H, W)
    xr = jnp.transpose(xr, (0, 2, 1, 3, 4))
    return (jnp.einsum("bcehw,ce->bchw", xr, params["fus_w"],
                       precision=jax.lax.Precision.HIGHEST)
            + params["fus_b"][None, :, None, None])


# --------------------------------- main ------------------------------------ #

if __name__ == "__main__":
    B, C, H, W = 2, 4, 16, 16          # embed_dim = C = 4
    num_chans, expan_att_chans = 2, 2  # num_heads = 4, head_dim = 2

    key = jax.random.PRNGKey(0)
    kx, kp = jax.random.split(key)
    x = jax.random.normal(kx, (B, C, H, W), jnp.float32)
    params = init_params(kp, C, num_chans, expan_att_chans)

    fwd = jax.jit(functools.partial(
        spatial_attention, num_chans=num_chans, expan_att_chans=expan_att_chans))
    out = jax.block_until_ready(fwd(x, params))

    ref = spatial_attention_ref(x, params, num_chans, expan_att_chans)
    assert out.shape == (B, C, H, W), out.shape
    # Toy head_dim=2 takes the all-f32 VPU path; the only approximations are
    # the EUP reciprocal in the softmax denominator and the skipped row-max.
    max_err = float(jnp.max(jnp.abs(out - ref)))
    assert jnp.allclose(out, ref, atol=5e-3, rtol=5e-3), max_err

    print("KERNEL_OK")
</pallas_src>

<mosaic_0001>
module attributes {stable_mosaic.version = 11 : i64} {
  func.func @_spatial_attn_kernel(%arg0: i32, %arg1: i32, %arg2: memref<64xf32, #tpu.memory_space<smem>>, %arg3: memref<1x1x2x256xf32, #tpu.memory_space<vmem>>, %arg4: memref<1x1x2x256xf32, #tpu.memory_space<vmem>>, %arg5: memref<2x256xf32, #tpu.memory_space<vmem>>) attributes {dimension_semantics = [#tpu.dimension_semantics<parallel>, #tpu.dimension_semantics<parallel>], iteration_bounds = array<i64: 2, 2>, scalar_prefetch = 1 : i64, scratch_operands = 1 : i64, tpu.core_type = #tpu.core_type<tc>, window_params = [{transform_indices = @transform_0, window_bounds = array<i64: 1, 1, 2, 256>}, {transform_indices = @transform_1, window_bounds = array<i64: 1, 1, 2, 256>}]} {
    %c0 = arith.constant 0 : index
    %c0_0 = arith.constant 0 : index
    %c0_1 = arith.constant 0 : index
    %c0_2 = arith.constant 0 : index
    %0 = vector.load %arg3[%c0, %c0_0, %c0_1, %c0_2] : memref<1x1x2x256xf32, #tpu.memory_space<vmem>>, vector<1x1x2x256xf32>
    %1 = vector.shape_cast %0 : vector<1x1x2x256xf32> to vector<2x256xf32>
    %c28_i32 = arith.constant 28 : i32
    %2 = arith.addi %c28_i32, %arg1 : i32
    %c2_i32 = arith.constant 2 : i32
    %3 = arith.muli %2, %c2_i32 : i32
    %c0_i32 = arith.constant 0 : i32
    %4 = arith.addi %3, %c0_i32 : i32
    %5 = arith.index_cast %4 : i32 to index
    %6 = memref.load %arg2[%5] : memref<64xf32, #tpu.memory_space<smem>>
    %7 = vector.broadcast %6 : f32 to vector<1x256xf32>
    %c28_i32_3 = arith.constant 28 : i32
    %8 = arith.addi %c28_i32_3, %arg1 : i32
    %c2_i32_4 = arith.constant 2 : i32
    %9 = arith.muli %8, %c2_i32_4 : i32
    %c1_i32 = arith.constant 1 : i32
    %10 = arith.addi %9, %c1_i32 : i32
    %11 = arith.index_cast %10 : i32 to index
    %12 = memref.load %arg2[%11] : memref<64xf32, #tpu.memory_space<smem>>
    %13 = vector.broadcast %12 : f32 to vector<1x256xf32>
    %14 = tpu.concatenate %7, %13 in 0 : vector<1x256xf32>, vector<1x256xf32> -> vector<2x256xf32>
    %c0_5 = arith.constant 0 : index
    %c0_6 = arith.constant 0 : index
    %15 = vector.load %arg5[%c0_5, %c0_6] : memref<2x256xf32, #tpu.memory_space<vmem>>, vector<2x256xf32>
    tpu.vector_store %arg5[%c0_5, %c0_6], %14 {strides = array<i32>} : memref<2x256xf32, #tpu.memory_space<vmem>>, vector<2x256xf32>,
    %c0_i32_7 = arith.constant 0 : i32
    %16 = arith.addi %c0_i32_7, %arg1 : i32
    %17 = vector.extract_strided_slice %1 {offsets = [0, 0], sizes = [1, 256], strides = [1, 1]} : vector<2x256xf32> to vector<1x256xf32>
    %c0_i32_8 = arith.constant 0 : i32
    %18 = arith.addi %c0_i32_8, %16 : i32
    %c2_i32_9 = arith.constant 2 : i32
    %19 = arith.muli %18, %c2_i32_9 : i32
    %c0_i32_10 = arith.constant 0 : i32
    %20 = arith.addi %19, %c0_i32_10 : i32
    %21 = arith.index_cast %20 : i32 to index
    %22 = memref.load %arg2[%21] : memref<64xf32, #tpu.memory_space<smem>>
    %23 = vector.broadcast %22 : f32 to vector<1x256xf32>
    %24 = arith.mulf %17, %23 : vector<1x256xf32>
    %c4_i32 = arith.constant 4 : i32
    %25 = arith.addi %c4_i32, %16 : i32
    %c2_i32_11 = arith.constant 2 : i32
    %26 = arith.muli %25, %c2_i32_11 : i32
    %c0_i32_12 = arith.constant 0 : i32
    %27 = arith.addi %26, %c0_i32_12 : i32
    %28 = arith.index_cast %27 : i32 to index
    %29 = memref.load %arg2[%28] : memref<64xf32, #tpu.memory_space<smem>>
    %30 = vector.broadcast %29 : f32 to vector<1x256xf32>
    %31 = arith.addf %24, %30 : vector<1x256xf32>
    %c8_i32 = arith.constant 8 : i32
    %32 = arith.addi %c8_i32, %16 : i32
    %c2_i32_13 = arith.constant 2 : i32
    %33 = arith.muli %32, %c2_i32_13 : i32
    %c0_i32_14 = arith.constant 0 : i32
    %34 = arith.addi %33, %c0_i32_14 : i32
    %35 = arith.index_cast %34 : i32 to index
    %36 = memref.load %arg2[%35] : memref<64xf32, #tpu.memory_space<smem>>
    %37 = vector.broadcast %36 : f32 to vector<1x256xf32>
    %38 = arith.mulf %17, %37 : vector<1x256xf32>
    %c12_i32 = arith.constant 12 : i32
    %39 = arith.addi %c12_i32, %16 : i32
    %c2_i32_15 = arith.constant 2 : i32
    %40 = arith.muli %39, %c2_i32_15 : i32
    %c0_i32_16 = arith.constant 0 : i32
    %41 = arith.addi %40, %c0_i32_16 : i32
    %42 = arith.index_cast %41 : i32 to index
    %43 = memref.load %arg2[%42] : memref<64xf32, #tpu.memory_space<smem>>
    %44 = vector.broadcast %43 : f32 to vector<1x256xf32>
    %45 = arith.addf %38, %44 : vector<1x256xf32>
    %c16_i32 = arith.constant 16 : i32
    %46 = arith.addi %c16_i32, %16 : i32
    %c2_i32_17 = arith.constant 2 : i32
    %47 = arith.muli %46, %c2_i32_17 : i32
    %c0_i32_18 = arith.constant 0 : i32
    %48 = arith.addi %47, %c0_i32_18 : i32
    %49 = arith.index_cast %48 : i32 to index
    %50 = memref.load %arg2[%49] : memref<64xf32, #tpu.memory_space<smem>>
    %51 = vector.broadcast %50 : f32 to vector<1x256xf32>
    %52 = arith.mulf %17, %51 : vector<1x256xf32>
    %c20_i32 = arith.constant 20 : i32
    %53 = arith.addi %c20_i32, %16 : i32
    %c2_i32_19 = arith.constant 2 : i32
    %54 = arith.muli %53, %c2_i32_19 : i32
    %c0_i32_20 = arith.constant 0 : i32
    %55 = arith.addi %54, %c0_i32_20 : i32
    %56 = arith.index_cast %55 : i32 to index
    %57 = memref.load %arg2[%56] : memref<64xf32, #tpu.memory_space<smem>>
    %58 = vector.broadcast %57 : f32 to vector<1x256xf32>
    %59 = arith.addf %52, %58 : vector<1x256xf32>
    %60 = arith.mulf %31, %31 : vector<1x256xf32>
    %61 = arith.mulf %45, %45 : vector<1x256xf32>
    %62 = vector.extract_strided_slice %1 {offsets = [1, 0], sizes = [1, 256], strides = [1, 1]} : vector<2x256xf32> to vector<1x256xf32>
    %c0_i32_21 = arith.constant 0 : i32
    %63 = arith.addi %c0_i32_21, %16 : i32
    %c2_i32_22 = arith.constant 2 : i32
    %64 = arith.muli %63, %c2_i32_22 : i32
    %c1_i32_23 = arith.constant 1 : i32
    %65 = arith.addi %64, %c1_i32_23 : i32
    %66 = arith.index_cast %65 : i32 to index
    %67 = memref.load %arg2[%66] : memref<64xf32, #tpu.memory_space<smem>>
    %68 = vector.broadcast %67 : f32 to vector<1x256xf32>
    %69 = arith.mulf %62, %68 : vector<1x256xf32>
    %c4_i32_24 = arith.constant 4 : i32
    %70 = arith.addi %c4_i32_24, %16 : i32
    %c2_i32_25 = arith.constant 2 : i32
    %71 = arith.muli %70, %c2_i32_25 : i32
    %c1_i32_26 = arith.constant 1 : i32
    %72 = arith.addi %71, %c1_i32_26 : i32
    %73 = arith.index_cast %72 : i32 to index
    %74 = memref.load %arg2[%73] : memref<64xf32, #tpu.memory_space<smem>>
    %75 = vector.broadcast %74 : f32 to vector<1x256xf32>
    %76 = arith.addf %69, %75 : vector<1x256xf32>
    %c8_i32_27 = arith.constant 8 : i32
    %77 = arith.addi %c8_i32_27, %16 : i32
    %c2_i32_28 = arith.constant 2 : i32
    %78 = arith.muli %77, %c2_i32_28 : i32
    %c1_i32_29 = arith.constant 1 : i32
    %79 = arith.addi %78, %c1_i32_29 : i32
    %80 = arith.index_cast %79 : i32 to index
    %81 = memref.load %arg2[%80] : memref<64xf32, #tpu.memory_space<smem>>
    %82 = vector.broadcast %81 : f32 to vector<1x256xf32>
    %83 = arith.mulf %62, %82 : vector<1x256xf32>
    %c12_i32_30 = arith.constant 12 : i32
    %84 = arith.addi %c12_i32_30, %16 : i32
    %c2_i32_31 = arith.constant 2 : i32
    %85 = arith.muli %84, %c2_i32_31 : i32
    %c1_i32_32 = arith.constant 1 : i32
    %86 = arith.addi %85, %c1_i32_32 : i32
    %87 = arith.index_cast %86 : i32 to index
    %88 = memref.load %arg2[%87] : memref<64xf32, #tpu.memory_space<smem>>
    %89 = vector.broadcast %88 : f32 to vector<1x256xf32>
    %90 = arith.addf %83, %89 : vector<1x256xf32>
    %c16_i32_33 = arith.constant 16 : i32
    %91 = arith.addi %c16_i32_33, %16 : i32
    %c2_i32_34 = arith.constant 2 : i32
    %92 = arith.muli %91, %c2_i32_34 : i32
    %c1_i32_35 = arith.constant 1 : i32
    %93 = arith.addi %92, %c1_i32_35 : i32
    %94 = arith.index_cast %93 : i32 to index
    %95 = memref.load %arg2[%94] : memref<64xf32, #tpu.memory_space<smem>>
    %96 = vector.broadcast %95 : f32 to vector<1x256xf32>
    %97 = arith.mulf %62, %96 : vector<1x256xf32>
    %c20_i32_36 = arith.constant 20 : i32
    %98 = arith.addi %c20_i32_36, %16 : i32
    %c2_i32_37 = arith.constant 2 : i32
    %99 = arith.muli %98, %c2_i32_37 : i32
    %c1_i32_38 = arith.constant 1 : i32
    %100 = arith.addi %99, %c1_i32_38 : i32
    %101 = arith.index_cast %100 : i32 to index
    %102 = memref.load %arg2[%101] : memref<64xf32, #tpu.memory_space<smem>>
    %103 = vector.broadcast %102 : f32 to vector<1x256xf32>
    %104 = arith.addf %97, %103 : vector<1x256xf32>
    %105 = arith.mulf %76, %76 : vector<1x256xf32>
    %106 = arith.addf %60, %105 : vector<1x256xf32>
    %107 = arith.mulf %90, %90 : vector<1x256xf32>
    %108 = arith.addf %61, %107 : vector<1x256xf32>
    %c24_i32 = arith.constant 24 : i32
    %109 = arith.addi %c24_i32, %16 : i32
    %c2_i32_39 = arith.constant 2 : i32
    %110 = arith.muli %109, %c2_i32_39 : i32
    %c0_i32_40 = arith.constant 0 : i32
    %111 = arith.addi %110, %c0_i32_40 : i32
    %112 = arith.index_cast %111 : i32 to index
    %113 = memref.load %arg2[%112] : memref<64xf32, #tpu.memory_space<smem>>
    %cst = arith.constant 1.000000e-24 : f32
    %114 = vector.broadcast %cst : f32 to vector<1x256xf32>
    %115 = arith.maximumf %106, %114 : vector<1x256xf32>
    %116 = math.rsqrt %115 : vector<1x256xf32>
    %117 = vector.broadcast %113 : f32 to vector<1x256xf32>
    %118 = arith.mulf %117, %116 : vector<1x256xf32>
    %cst_41 = arith.constant 1.000000e-24 : f32
    %119 = vector.broadcast %cst_41 : f32 to vector<1x256xf32>
    %120 = arith.maximumf %108, %119 : vector<1x256xf32>
    %121 = math.rsqrt %120 : vector<1x256xf32>
    %122 = arith.mulf %45, %121 : vector<1x256xf32>
    %123 = arith.mulf %90, %121 : vector<1x256xf32>
    %cst_42 = arith.constant 0.000000e+00 : f32
    %124 = vector.broadcast %cst_42 : f32 to vector<4x256xf32>
    %125 = tpu.concatenate %122, %123, %59, %104, %124 in 0 : vector<1x256xf32>, vector<1x256xf32>, vector<1x256xf32>, vector<1x256xf32>, vector<4x256xf32> -> vector<8x256xf32>
    %126 = tpu.transpose %125, [1, 0] : vector<8x256xf32> -> vector<256x8xf32>
    %127 = vector.extract_strided_slice %126 {offsets = [0, 0], sizes = [256, 1], strides = [1, 1]} : vector<256x8xf32> to vector<256x1xf32>
    %128 = arith.mulf %31, %118 : vector<1x256xf32>
    %129 = vector.broadcast %127 : vector<256x1xf32> to vector<256x256xf32>
    %130 = vector.broadcast %128 : vector<1x256xf32> to vector<256x256xf32>
    %131 = arith.mulf %129, %130 : vector<256x256xf32>
    %132 = vector.extract_strided_slice %126 {offsets = [0, 1], sizes = [256, 1], strides = [1, 1]} : vector<256x8xf32> to vector<256x1xf32>
    %133 = arith.mulf %76, %118 : vector<1x256xf32>
    %134 = vector.broadcast %132 : vector<256x1xf32> to vector<256x256xf32>
    %135 = vector.broadcast %133 : vector<1x256xf32> to vector<256x256xf32>
    %136 = arith.mulf %134, %135 : vector<256x256xf32>
    %137 = arith.addf %131, %136 : vector<256x256xf32>
    %138 = math.absf %113 : f32
    %139 = vector.broadcast %138 : f32 to vector<256x256xf32>
    %140 = arith.subf %137, %139 : vector<256x256xf32>
    %141 = math.exp %140 : vector<256x256xf32>
    %cst_43 = arith.constant dense<0.000000e+00> : vector<256xf32>
    %142 = vector.multi_reduction <add>, %141, %cst_43 [0] : vector<256x256xf32> to vector<256xf32>
    %143 = vector.shape_cast %142 : vector<256xf32> to vector<1x256xf32>
    %144 = tpu.reciprocal %143 {approx = true} : vector<1x256xf32> -> vector<1x256xf32>
    %145 = vector.extract_strided_slice %126 {offsets = [0, 2], sizes = [256, 1], strides = [1, 1]} : vector<256x8xf32> to vector<256x1xf32>
    %146 = vector.broadcast %145 : vector<256x1xf32> to vector<256x256xf32>
    %147 = arith.mulf %141, %146 : vector<256x256xf32>
    %cst_44 = arith.constant dense<0.000000e+00> : vector<256xf32>
    %148 = vector.multi_reduction <add>, %147, %cst_44 [0] : vector<256x256xf32> to vector<256xf32>
    %149 = vector.shape_cast %148 : vector<256xf32> to vector<1x256xf32>
    %c0_45 = arith.constant 0 : index
    %c0_46 = arith.constant 0 : index
    %150 = vector.load %arg5[%c0_45, %c0_46] : memref<2x256xf32, #tpu.memory_space<vmem>>, vector<1x256xf32>
    %151 = arith.mulf %149, %144 : vector<1x256xf32>
    %152 = arith.addf %150, %151 : vector<1x256xf32>
    %c0_47 = arith.constant 0 : index
    %c0_48 = arith.constant 0 : index
    %153 = vector.load %arg5[%c0_47, %c0_48] : memref<2x256xf32, #tpu.memory_space<vmem>>, vector<1x256xf32>
    tpu.vector_store %arg5[%c0_47, %c0_48], %152 {strides = array<i32>} : memref<2x256xf32, #tpu.memory_space<vmem>>, vector<1x256xf32>,
    %154 = vector.extract_strided_slice %126 {offsets = [0, 3], sizes = [256, 1], strides = [1, 1]} : vector<256x8xf32> to vector<256x1xf32>
    %155 = vector.broadcast %154 : vector<256x1xf32> to vector<256x256xf32>
    %156 = arith.mulf %141, %155 : vector<256x256xf32>
    %cst_49 = arith.constant dense<0.000000e+00> : vector<256xf32>
    %157 = vector.multi_reduction <add>, %156, %cst_49 [0] : vector<256x256xf32> to vector<256xf32>
    %158 = vector.shape_cast %157 : vector<256xf32> to vector<1x256xf32>
    %c1 = arith.constant 1 : index
    %c0_50 = arith.constant 0 : index
    %159 = vector.load %arg5[%c1, %c0_50] : memref<2x256xf32, #tpu.memory_space<vmem>>, vector<1x256xf32>
    %160 = arith.mulf %158, %144 : vector<1x256xf32>
    %161 = arith.addf %159, %160 : vector<1x256xf32>
    %c1_51 = arith.constant 1 : index
    %c0_52 = arith.constant 0 : index
    %162 = vector.load %arg5[%c1_51, %c0_52] : memref<2x256xf32, #tpu.memory_space<vmem>>, vector<1x256xf32>
    tpu.vector_store %arg5[%c1_51, %c0_52], %161 {strides = array<i32>} : memref<2x256xf32, #tpu.memory_space<vmem>>, vector<1x256xf32>,
    %c2_i32_53 = arith.constant 2 : i32
    %163 = arith.addi %c2_i32_53, %arg1 : i32
    %164 = vector.extract_strided_slice %1 {offsets = [0, 0], sizes = [1, 256], strides = [1, 1]} : vector<2x256xf32> to vector<1x256xf32>
    %c0_i32_54 = arith.constant 0 : i32
    %165 = arith.addi %c0_i32_54, %163 : i32
    %c2_i32_55 = arith.constant 2 : i32
    %166 = arith.muli %165, %c2_i32_55 : i32
    %c0_i32_56 = arith.constant 0 : i32
    %167 = arith.addi %166, %c0_i32_56 : i32
    %168 = arith.index_cast %167 : i32 to index
    %169 = memref.load %arg2[%168] : memref<64xf32, #tpu.memory_space<smem>>
    %170 = vector.broadcast %169 : f32 to vector<1x256xf32>
    %171 = arith.mulf %164, %170 : vector<1x256xf32>
    %c4_i32_57 = arith.constant 4 : i32
    %172 = arith.addi %c4_i32_57, %163 : i32
    %c2_i32_58 = arith.constant 2 : i32
    %173 = arith.muli %172, %c2_i32_58 : i32
    %c0_i32_59 = arith.constant 0 : i32
    %174 = arith.addi %173, %c0_i32_59 : i32
    %175 = arith.index_cast %174 : i32 to index
    %176 = memref.load %arg2[%175] : memref<64xf32, #tpu.memory_space<smem>>
    %177 = vector.broadcast %176 : f32 to vector<1x256xf32>
    %178 = arith.addf %171, %177 : vector<1x256xf32>
    %c8_i32_60 = arith.constant 8 : i32
    %179 = arith.addi %c8_i32_60, %163 : i32
    %c2_i32_61 = arith.constant 2 : i32
    %180 = arith.muli %179, %c2_i32_61 : i32
    %c0_i32_62 = arith.constant 0 : i32
    %181 = arith.addi %180, %c0_i32_62 : i32
    %182 = arith.index_cast %181 : i32 to index
    %183 = memref.load %arg2[%182] : memref<64xf32, #tpu.memory_space<smem>>
    %184 = vector.broadcast %183 : f32 to vector<1x256xf32>
    %185 = arith.mulf %164, %184 : vector<1x256xf32>
    %c12_i32_63 = arith.constant 12 : i32
    %186 = arith.addi %c12_i32_63, %163 : i32
    %c2_i32_64 = arith.constant 2 : i32
    %187 = arith.muli %186, %c2_i32_64 : i32
    %c0_i32_65 = arith.constant 0 : i32
    %188 = arith.addi %187, %c0_i32_65 : i32
    %189 = arith.index_cast %188 : i32 to index
    %190 = memref.load %arg2[%189] : memref<64xf32, #tpu.memory_space<smem>>
    %191 = vector.broadcast %190 : f32 to vector<1x256xf32>
    %192 = arith.addf %185, %191 : vector<1x256xf32>
    %c16_i32_66 = arith.constant 16 : i32
    %193 = arith.addi %c16_i32_66, %163 : i32
    %c2_i32_67 = arith.constant 2 : i32
    %194 = arith.muli %193, %c2_i32_67 : i32
    %c0_i32_68 = arith.constant 0 : i32
    %195 = arith.addi %194, %c0_i32_68 : i32
    %196 = arith.index_cast %195 : i32 to index
    %197 = memref.load %arg2[%196] : memref<64xf32, #tpu.memory_space<smem>>
    %198 = vector.broadcast %197 : f32 to vector<1x256xf32>
    %199 = arith.mulf %164, %198 : vector<1x256xf32>
    %c20_i32_69 = arith.constant 20 : i32
    %200 = arith.addi %c20_i32_69, %163 : i32
    %c2_i32_70 = arith.constant 2 : i32
    %201 = arith.muli %200, %c2_i32_70 : i32
    %c0_i32_71 = arith.constant 0 : i32
    %202 = arith.addi %201, %c0_i32_71 : i32
    %203 = arith.index_cast %202 : i32 to index
    %204 = memref.load %arg2[%203] : memref<64xf32, #tpu.memory_space<smem>>
    %205 = vector.broadcast %204 : f32 to vector<1x256xf32>
    %206 = arith.addf %199, %205 : vector<1x256xf32>
    %207 = arith.mulf %178, %178 : vector<1x256xf32>
    %208 = arith.mulf %192, %192 : vector<1x256xf32>
    %209 = vector.extract_strided_slice %1 {offsets = [1, 0], sizes = [1, 256], strides = [1, 1]} : vector<2x256xf32> to vector<1x256xf32>
    %c0_i32_72 = arith.constant 0 : i32
    %210 = arith.addi %c0_i32_72, %163 : i32
    %c2_i32_73 = arith.constant 2 : i32
    %211 = arith.muli %210, %c2_i32_73 : i32
    %c1_i32_74 = arith.constant 1 : i32
    %212 = arith.addi %211, %c1_i32_74 : i32
    %213 = arith.index_cast %212 : i32 to index
    %214 = memref.load %arg2[%213] : memref<64xf32, #tpu.memory_space<smem>>
    %215 = vector.broadcast %214 : f32 to vector<1x256xf32>
    %216 = arith.mulf %209, %215 : vector<1x256xf32>
    %c4_i32_75 = arith.constant 4 : i32
    %217 = arith.addi %c4_i32_75, %163 : i32
    %c2_i32_76 = arith.constant 2 : i32
    %218 = arith.muli %217, %c2_i32_76 : i32
    %c1_i32_77 = arith.constant 1 : i32
    %219 = arith.addi %218, %c1_i32_77 : i32
    %220 = arith.index_cast %219 : i32 to index
    %221 = memref.load %arg2[%220] : memref<64xf32, #tpu.memory_space<smem>>
    %222 = vector.broadcast %221 : f32 to vector<1x256xf32>
    %223 = arith.addf %216, %222 : vector<1x256xf32>
    %c8_i32_78 = arith.constant 8 : i32
    %224 = arith.addi %c8_i32_78, %163 : i32
    %c2_i32_79 = arith.constant 2 : i32
    %225 = arith.muli %224, %c2_i32_79 : i32
    %c1_i32_80 = arith.constant 1 : i32
    %226 = arith.addi %225, %c1_i32_80 : i32
    %227 = arith.index_cast %226 : i32 to index
    %228 = memref.load %arg2[%227] : memref<64xf32, #tpu.memory_space<smem>>
    %229 = vector.broadcast %228 : f32 to vector<1x256xf32>
    %230 = arith.mulf %209, %229 : vector<1x256xf32>
    %c12_i32_81 = arith.constant 12 : i32
    %231 = arith.addi %c12_i32_81, %163 : i32
    %c2_i32_82 = arith.constant 2 : i32
    %232 = arith.muli %231, %c2_i32_82 : i32
    %c1_i32_83 = arith.constant 1 : i32
    %233 = arith.addi %232, %c1_i32_83 : i32
    %234 = arith.index_cast %233 : i32 to index
    %235 = memref.load %arg2[%234] : memref<64xf32, #tpu.memory_space<smem>>
    %236 = vector.broadcast %235 : f32 to vector<1x256xf32>
    %237 = arith.addf %230, %236 : vector<1x256xf32>
    %c16_i32_84 = arith.constant 16 : i32
    %238 = arith.addi %c16_i32_84, %163 : i32
    %c2_i32_85 = arith.constant 2 : i32
    %239 = arith.muli %238, %c2_i32_85 : i32
    %c1_i32_86 = arith.constant 1 : i32
    %240 = arith.addi %239, %c1_i32_86 : i32
    %241 = arith.index_cast %240 : i32 to index
    %242 = memref.load %arg2[%241] : memref<64xf32, #tpu.memory_space<smem>>
    %243 = vector.broadcast %242 : f32 to vector<1x256xf32>
    %244 = arith.mulf %209, %243 : vector<1x256xf32>
    %c20_i32_87 = arith.constant 20 : i32
    %245 = arith.addi %c20_i32_87, %163 : i32
    %c2_i32_88 = arith.constant 2 : i32
    %246 = arith.muli %245, %c2_i32_88 : i32
    %c1_i32_89 = arith.constant 1 : i32
    %247 = arith.addi %246, %c1_i32_89 : i32
    %248 = arith.index_cast %247 : i32 to index
    %249 = memref.load %arg2[%248] : memref<64xf32, #tpu.memory_space<smem>>
    %250 = vector.broadcast %249 : f32 to vector<1x256xf32>
    %251 = arith.addf %244, %250 : vector<1x256xf32>
    %252 = arith.mulf %223, %223 : vector<1x256xf32>
    %253 = arith.addf %207, %252 : vector<1x256xf32>
    %254 = arith.mulf %237, %237 : vector<1x256xf32>
    %255 = arith.addf %208, %254 : vector<1x256xf32>
    %c24_i32_90 = arith.constant 24 : i32
    %256 = arith.addi %c24_i32_90, %163 : i32
    %c2_i32_91 = arith.constant 2 : i32
    %257 = arith.muli %256, %c2_i32_91 : i32
    %c0_i32_92 = arith.constant 0 : i32
    %258 = arith.addi %257, %c0_i32_92 : i32
    %259 = arith.index_cast %258 : i32 to index
    %260 = memref.load %arg2[%259] : memref<64xf32, #tpu.memory_space<smem>>
    %cst_93 = arith.constant 1.000000e-24 : f32
    %261 = vector.broadcast %cst_93 : f32 to vector<1x256xf32>
    %262 = arith.maximumf %253, %261 : vector<1x256xf32>
    %263 = math.rsqrt %262 : vector<1x256xf32>
    %264 = vector.broadcast %260 : f32 to vector<1x256xf32>
    %265 = arith.mulf %264, %263 : vector<1x256xf32>
    %cst_94 = arith.constant 1.000000e-24 : f32
    %266 = vector.broadcast %cst_94 : f32 to vector<1x256xf32>
    %267 = arith.maximumf %255, %266 : vector<1x256xf32>
    %268 = math.rsqrt %267 : vector<1x256xf32>
    %269 = arith.mulf %192, %268 : vector<1x256xf32>
    %270 = arith.mulf %237, %268 : vector<1x256xf32>
    %cst_95 = arith.constant 0.000000e+00 : f32
    %271 = vector.broadcast %cst_95 : f32 to vector<4x256xf32>
    %272 = tpu.concatenate %269, %270, %206, %251, %271 in 0 : vector<1x256xf32>, vector<1x256xf32>, vector<1x256xf32>, vector<1x256xf32>, vector<4x256xf32> -> vector<8x256xf32>
    %273 = tpu.transpose %272, [1, 0] : vector<8x256xf32> -> vector<256x8xf32>
    %274 = vector.extract_strided_slice %273 {offsets = [0, 0], sizes = [256, 1], strides = [1, 1]} : vector<256x8xf32> to vector<256x1xf32>
    %275 = arith.mulf %178, %265 : vector<1x256xf32>
    %276 = vector.broadcast %274 : vector<256x1xf32> to vector<256x256xf32>
    %277 = vector.broadcast %275 : vector<1x256xf32> to vector<256x256xf32>
    %278 = arith.mulf %276, %277 : vector<256x256xf32>
    %279 = vector.extract_strided_slice %273 {offsets = [0, 1], sizes = [256, 1], strides = [1, 1]} : vector<256x8xf32> to vector<256x1xf32>
    %280 = arith.mulf %223, %265 : vector<1x256xf32>
    %281 = vector.broadcast %279 : vector<256x1xf32> to vector<256x256xf32>
    %282 = vector.broadcast %280 : vector<1x256xf32> to vector<256x256xf32>
    %283 = arith.mulf %281, %282 : vector<256x256xf32>
    %284 = arith.addf %278, %283 : vector<256x256xf32>
    %285 = math.absf %260 : f32
    %286 = vector.broadcast %285 : f32 to vector<256x256xf32>
    %287 = arith.subf %284, %286 : vector<256x256xf32>
    %288 = math.exp %287 : vector<256x256xf32>
    %cst_96 = arith.constant dense<0.000000e+00> : vector<256xf32>
    %289 = vector.multi_reduction <add>, %288, %cst_96 [0] : vector<256x256xf32> to vector<256xf32>
    %290 = vector.shape_cast %289 : vector<256xf32> to vector<1x256xf32>
    %291 = tpu.reciprocal %290 {approx = true} : vector<1x256xf32> -> vector<1x256xf32>
    %292 = vector.extract_strided_slice %273 {offsets = [0, 2], sizes = [256, 1], strides = [1, 1]} : vector<256x8xf32> to vector<256x1xf32>
    %293 = vector.broadcast %292 : vector<256x1xf32> to vector<256x256xf32>
    %294 = arith.mulf %288, %293 : vector<256x256xf32>
    %cst_97 = arith.constant dense<0.000000e+00> : vector<256xf32>
    %295 = vector.multi_reduction <add>, %294, %cst_97 [0] : vector<256x256xf32> to vector<256xf32>
    %296 = vector.shape_cast %295 : vector<256xf32> to vector<1x256xf32>
    %c0_98 = arith.constant 0 : index
    %c0_99 = arith.constant 0 : index
    %297 = vector.load %arg5[%c0_98, %c0_99] : memref<2x256xf32, #tpu.memory_space<vmem>>, vector<1x256xf32>
    %298 = arith.mulf %296, %291 : vector<1x256xf32>
    %299 = arith.addf %297, %298 : vector<1x256xf32>
    %c0_100 = arith.constant 0 : index
    %c0_101 = arith.constant 0 : index
    %300 = vector.load %arg5[%c0_100, %c0_101] : memref<2x256xf32, #tpu.memory_space<vmem>>, vector<1x256xf32>
    tpu.vector_store %arg5[%c0_100, %c0_101], %299 {strides = array<i32>} : memref<2x256xf32, #tpu.memory_space<vmem>>, vector<1x256xf32>,
    %301 = vector.extract_strided_slice %273 {offsets = [0, 3], sizes = [256, 1], strides = [1, 1]} : vector<256x8xf32> to vector<256x1xf32>
    %302 = vector.broadcast %301 : vector<256x1xf32> to vector<256x256xf32>
    %303 = arith.mulf %288, %302 : vector<256x256xf32>
    %cst_102 = arith.constant dense<0.000000e+00> : vector<256xf32>
    %304 = vector.multi_reduction <add>, %303, %cst_102 [0] : vector<256x256xf32> to vector<256xf32>
    %305 = vector.shape_cast %304 : vector<256xf32> to vector<1x256xf32>
    %c1_103 = arith.constant 1 : index
    %c0_104 = arith.constant 0 : index
    %306 = vector.load %arg5[%c1_103, %c0_104] : memref<2x256xf32, #tpu.memory_space<vmem>>, vector<1x256xf32>
    %307 = arith.mulf %305, %291 : vector<1x256xf32>
    %308 = arith.addf %306, %307 : vector<1x256xf32>
    %c1_105 = arith.constant 1 : index
    %c0_106 = arith.constant 0 : index
    %309 = vector.load %arg5[%c1_105, %c0_106] : memref<2x256xf32, #tpu.memory_space<vmem>>, vector<1x256xf32>
    tpu.vector_store %arg5[%c1_105, %c0_106], %308 {strides = array<i32>} : memref<2x256xf32, #tpu.memory_space<vmem>>, vector<1x256xf32>,
    %c0_107 = arith.constant 0 : index
    %c0_108 = arith.constant 0 : index
    %310 = vector.load %arg5[%c0_107, %c0_108] : memref<2x256xf32, #tpu.memory_space<vmem>>, vector<2x256xf32>
    %c0_109 = arith.constant 0 : index
    %c0_110 = arith.constant 0 : index
    %c0_111 = arith.constant 0 : index
    %c0_112 = arith.constant 0 : index
    %311 = vector.load %arg4[%c0_109, %c0_110, %c0_111, %c0_112] : memref<1x1x2x256xf32, #tpu.memory_space<vmem>>, vector<1x1x2x256xf32>
    %312 = vector.shape_cast %311 : vector<1x1x2x256xf32> to vector<2x256xf32>
    %313 = vector.shape_cast %310 : vector<2x256xf32> to vector<1x1x2x256xf32>
    tpu.vector_store %arg4[%c0_109, %c0_110, %c0_111, %c0_112], %313 {strides = array<i32>} : memref<1x1x2x256xf32, #tpu.memory_space<vmem>>, vector<1x1x2x256xf32>,
    return
  }
  func.func @transform_0(%arg0: i32, %arg1: i32, %arg2: memref<64xf32, #tpu.memory_space<smem>>) -> (i32, i32, i32, i32) {
    %c0_i32 = arith.constant 0 : i32
    %c0_i32_0 = arith.constant 0 : i32
    %c0_i32_1 = arith.constant 0 : i32
    return %arg0, %arg1, %c0_i32, %c0_i32_0 : i32, i32, i32, i32
  }
  func.func @transform_1(%arg0: i32, %arg1: i32, %arg2: memref<64xf32, #tpu.memory_space<smem>>) -> (i32, i32, i32, i32) {
    %c0_i32 = arith.constant 0 : i32
    %c0_i32_0 = arith.constant 0 : i32
    %c0_i32_1 = arith.constant 0 : i32
    return %arg0, %arg1, %c0_i32, %c0_i32_0 : i32, i32, i32, i32
  }
}

</mosaic_0001>

<bundles_post_ra>
// kernel: spatial_attention.1
= control target key start
LH: loop header
LB: loop body
LE: loop exit
PB: predicated region body
PF: predicated region fallthrough
CT: control target
= control target key end

     0   :  { %s6613_s0 = inlined_call_operand.vmem [shape: f32[64], index: 0, kind: input, shape index: {}]   ;;  %s6614_s1 = inlined_call_operand.vmem [shape: f32[2,2,2,256], index: 1, kind: input, shape index: {}]   ;;  %s6615_s2 = inlined_call_operand.vmem [shape: f32[2,2,2,256], index: 2, kind: output, shape index: {}]  }
   0x1   :  { %s7_s11 = sshll.u32 %s6613_s0, 4  ;;  %s8_s11 = int_to_ptr.vmem [resolvable:$true] %s7_s11 }
   0x2   :  { %s3819_s12 = scalar_lea.vmem %s8_s11, 16  ;;  %p3824_p1 = scmp.lt.s32.totalorder %s8_s11, %s8_s11 }
   0x3   :  { %p3820_p0 = scmp.ne.s32.totalorder %s8_s11, %s3819_s12  ;;  %p3825_p2 = scmp.lt.s32.totalorder %s3819_s12, %s3819_s12 }
   0x5   :  { %p3826_p3 = por %p3825_p2, %p3824_p1 }
   0x7   :  { %p3827_p4 = pnand %p3826_p3, %p3820_p0 }
   0x9   :  { %3830 = shalt.err (!%p3827_p4)  }
   0xa   :  { %s3873_s13 = smov [#allocation4]  }
   0xb   :  { %10 = dma.vmem_to_smem %s8_s11, 16, %s3873_s13, [#allocation3] }
   0xc   :  { %3851 = dma.done.wait [#allocation3], 16 }
   0xd   :  { %3852 = vsyncadd [#allocation3], 4294967280 }
   0xe   :  { %12 = sfence }
   0xf   :  { %s3897_s14 = smov 0   ;;  %s3899_s15 = smov 0  }
  0x10   :  { %s3901_s16 = smov 0   ;;  %s3903_s0 = smov 0  }
  0x11   :  { %s3905_s17 = smov 0  }
  0x12 LB: > { %s27_s18 = sadd.s32 1, %s3863_s16  ;;  %s30_s19 = sadd.s32 1, %s3867_s0  ;;  %s3871_s17 = sphi %s3905_s17, %s18_s17   ;;  %s3867_s0 = sphi %s3903_s0, %s7639_s0   ;;  %s3863_s16 = sphi %s3901_s16, %s7638_s16   ;;  %s3859_s15 = sphi %s3899_s15, %s7637_s15   ;;  %s3855_s14 = sphi %s3897_s14, %s7636_s14  }
  0x13   : > { %p28_p5 = scmp.ge.s32.totalorder %s27_s18, 2  ;;  %p3427_p6 = scmp.ge.s32.totalorder %s3871_s17, 1 }
  0x14   : > { %p114_p7 = scmp.lt.s32.totalorder %s3871_s17, 5 }
  0x15   : > { %s7641_s18 = smov (%p28_p5, %s27_s18), 0  ;;  %s7643_s19 = smov (!%p28_p5, %s30_s19), %s3867_s0 }
  0x16   : > { %p115_p8 = pnand %p3427_p6, %p114_p7  ;;  %p32_p9 = scmp.ge.s32.totalorder %s7643_s19, 2 }
  0x18   : > { %s7645_s19 = smov (%p32_p9, %s7643_s19), 0  ;;  %118 = sbr.rel (%p115_p8) target bundleno = 1051 (0x41b), region = 24 }
  0x1f   : > { %p142_p10 = scmp.lt.s32.totalorder %s3859_s15, 1  ;;  %p144_p11 = scmp.lt.s32.totalorder %s3855_s14, 1  ;;  %vm168_vm0 = vcmask 1040384   ;;  %v6616_v28 = vlaneseq  ;;  %vm308_vm1 = vcmask 1041408   ;;  %vm311_vm2 = vcmask 1042432  }
  0x20   : > { %s3927_s20 = sshll.u32 %s3855_s14, 1  ;;  %vm314_vm3 = vcmask 1043456  }
  0x21   : > { %s7647_s15 = smov (!%p142_p10, %s3859_s15), 1  ;;  %s7649_s14 = smov (!%p144_p11, %s3855_s14), 1  ;;  %v3957_v33 = vshrl.u32 %v6616_v28, 7 }
  0x22   : > { %s3429_s21 = sshll.u32 %s7647_s15, 2  ;;  %s3457_s22 = sadd.s32 56, %s3927_s20 }
  0x23   : > { %s3428_s23 = sshll.u32 %s7649_s14, 1  ;;  %s163_s24 = sld [smem:[#allocation4 + %s3457_s22]]  ;;  %6957 = vst [vmem:[#allocation6_spill] sm:$0xff] %v3957_v33  ;;  %v3962_v39 = vsub.s32 0, %v3957_v33  ;;  %v3965_v42 = vsub.s32 1, %v3957_v33  ;;  %v3975_v58 = vsub.s32 2, %v3957_v33 }
  0x24   : > { %s3930_s25 = sadd.s32 %s3429_s21, %s3428_s23  ;;  %s165_s26 = sadd.s32 1, %s3457_s22  ;;  %v3979_v61 = vsub.s32 3, %v3957_v33 }
  0x25   : > { %s166_s27 = sld [smem:[#allocation4 + %s165_s26]]  ;;  %s3430_s28 = sshll.u32 %s3930_s25, 1  ;;  %6958 = vst [vmem:[#allocation7_spill] sm:$0xff] %v3962_v39  ;;  %6959 = vst [vmem:[#allocation8_spill] sm:$0xff] %v3965_v42 }
  0x26   : > { %s3461_s29 = sadd.s32 16, %s3927_s20  ;;  %s3463_s30 = sadd.s32 24, %s3927_s20  ;;  %6960 = vst [vmem:[#allocation9_spill] sm:$0xff] %v3975_v58  ;;  %6961 = vst [vmem:[#allocation10_spill] sm:$0xff] %v3979_v61 }
  0x27   : > { %s192_s3 = sld [smem:[#allocation4 + %s3461_s29]]  ;;  %s3940_s7 = scalar_lea.vmem %s6614_s1, %s3430_s28 }
  0x28   : > { %s197_s4 = sld [smem:[#allocation4 + %s3463_s30]]  ;;  %s220_s8 = sadd.s32 1, %s3461_s29  ;;  %v3944_v4 = vld [vmem:[%s3940_s7] sm:$0xf] }
  0x29   : > { %v164_v0 = vstv %s163_s24  ;;  %s224_s9 = sadd.s32 1, %s3463_s30  ;;  %s221_s10 = sld [smem:[#allocation4 + %s220_s8]] }
  0x2a   : > { %s225_s11 = sld [smem:[#allocation4 + %s224_s9]]  ;;  %s3475_s12 = sadd.s32 20, %s3927_s20 }
  0x2b   : > { %v167_v1 = vstv %s166_s27  ;;  %s3477_s13 = sadd.s32 28, %s3927_s20  ;;  %s1769_s14 = sld [smem:[#allocation4 + %s3475_s12]] }
  0x2c   : > { %v169_v2 = vsel %vm168_vm0, %v164_v0, %v167_v1  ;;  %s1774_s15 = sld [smem:[#allocation4 + %s3477_s13]]  ;;  %s1797_s21 = sadd.s32 1, %s3475_s12 }
  0x2d   : > { %v171_v3 = vcombine.low %v169_v2, %v169_v2  ;;  %v193_v5 = vstv %s192_s3  ;;  %s1801_s22 = sadd.s32 1, %s3477_s13  ;;  %s1798_s23 = sld [smem:[#allocation4 + %s1797_s21]] }
  0x2e   : > { %v194_v6 = vmul.f32 %v193_v5, %v3944_v4  ;;  %v198_v7 = vstv %s197_s4  ;;  %s1802_s24 = sld [smem:[#allocation4 + %s1801_s22]]  ;;  %s3465_s26 = sadd.s32 32, %s3927_s20 }
  0x2f   : > { %3435 = vst.sshfl [vmem:[#allocation2] sm:$0x33 pattern:$0x76325410] %v171_v3  ;;  %v222_v8 = vstv %s221_s10  ;;  %s228_s27 = sadd.s32 1, %s3465_s26  ;;  %s3467_s29 = sadd.s32 40, %s3927_s20 }
  0x30   : > { %v226_v9 = vstv %s225_s11  ;;  %v199_v10 = vadd.f32 %v198_v7, %v194_v6  ;;  %v223_v11 = vmul.f32 %v222_v8, %v3944_v4  ;;  %s202_s30 = sld [smem:[#allocation4 + %s3465_s26]]  ;;  %s232_s4 = sadd.s32 1, %s3467_s29 }
  0x31   : > { %v1770_v13 = vstv %s1769_s14  ;;  %s229_s3 = sld [smem:[#allocation4 + %s228_s27]]  ;;  %s3479_s5 = sadd.s32 36, %s3927_s20 }
  0x32   : > { %v227_v12 = vadd.f32 %v226_v9, %v223_v11  ;;  %v211_v14 = vmul.f32 %v199_v10, %v199_v10  ;;  %v1771_v16 = vmul.f32 %v1770_v13, %v3944_v4  ;;  %v1775_v17 = vstv %s1774_s15  ;;  %s207_s6 = sld [smem:[#allocation4 + %s3467_s29]]  ;;  %s1805_s9 = sadd.s32 1, %s3479_s5 }
  0x33   : > { %v1799_v19 = vstv %s1798_s23  ;;  %s233_s8 = sld [smem:[#allocation4 + %s232_s4]]  ;;  %s3481_s10 = sadd.s32 44, %s3927_s20 }
  0x34   : > { %v242_v15 = vmul.f32 %v227_v12, %v227_v12  ;;  %v1803_v20 = vstv %s1802_s24  ;;  %v1776_v22 = vadd.f32 %v1775_v17, %v1771_v16  ;;  %v1800_v23 = vmul.f32 %v1799_v19, %v3944_v4  ;;  %s1779_s11 = sld [smem:[#allocation4 + %s3479_s5]]  ;;  %s1809_s13 = sadd.s32 1, %s3481_s10 }
  0x35   : > { %s1806_s12 = sld [smem:[#allocation4 + %s1805_s9]]  ;;  %s212_s21 = sadd.s32 1, %s3927_s20 }
  0x36   : > { %v3443_v18 = vrot.slane %v242_v15, 9  ;;  %v1804_v25 = vadd.f32 %v1803_v20, %v1800_v23  ;;  %v1788_v26 = vmul.f32 %v1776_v22, %v1776_v22  ;;  %v203_v30 = vstv %s202_s30  ;;  %s1784_s14 = sld [smem:[#allocation4 + %s3481_s10]]  ;;  %s3459_s22 = sadd.s32 8, %s3927_s20 }
  0x37   : > { %v230_v31 = vstv %s229_s3  ;;  %v204_v34 = vmul.f32 %v203_v30, %v3944_v4  ;;  %s1810_s15 = sld [smem:[#allocation4 + %s1809_s13]]  ;;  %s216_s24 = sadd.s32 1, %s3459_s22 }
  0x38   : > { %v247_v21 = vadd.f32 %v3443_v18, %v211_v14  ;;  %v1819_v27 = vmul.f32 %v1804_v25, %v1804_v25  ;;  %v208_v36 = vstv %s207_s6  ;;  %v231_v37 = vmul.f32 %v230_v31, %v3944_v4  ;;  %s213_s23 = sld [smem:[#allocation4 + %s212_s21]]  ;;  %s3469_s30 = sadd.s32 48, %s3927_s20 }
  0x39   : > { %v234_v38 = vstv %s233_s8  ;;  %v209_v41 = vadd.f32 %v208_v36, %v204_v34  ;;  %s182_s26 = sld [smem:[#allocation4 + %s3927_s20]]  ;;  %s3471_s5 = sadd.s32 4, %s3927_s20 }
  0x3a   : > { %v255_v24 = vmax.f32 %v247_v21, 1e-24  ;;  %v3452_v29 = vrot.slane %v1819_v27, 9  ;;  %v235_v43 = vadd.f32 %v234_v38, %v231_v37  ;;  %v1780_v46 = vstv %s1779_s11  ;;  %s217_s27 = sld [smem:[#allocation4 + %s216_s24]]  ;;  %s1789_s6 = sadd.s32 1, %s3471_s5 }
  0x3b   : > { %v1807_v47 = vstv %s1806_s12  ;;  %v288_v50 = vrot.slane %v209_v41, %v3962_v39  ;;  %v1781_v51 = vmul.f32 %v1780_v46, %v3944_v4  ;;  %s187_s29 = sld [smem:[#allocation4 + %s3459_s22]]  ;;  %s3473_s8 = sadd.s32 12, %s3927_s20 }
  0x3c   : > { %3546 = vrsqrt.f32 %v255_v24  ;;  %v1824_v32 = vadd.f32 %v3452_v29, %v1788_v26  ;;  %v299_v53 = vrot.slane %v235_v43, %v3965_v42  ;;  %v1785_v54 = vstv %s1784_s14  ;;  %s4327_s3 = sld [smem:[#allocation4 + %s3469_s30]]  ;;  %s1793_s10 = sadd.s32 1, %s3473_s8 }
  0x3d   : > { %v1808_v55 = vmul.f32 %v1807_v47, %v3944_v4  ;;  %v1811_v56 = vstv %s1810_s15  ;;  %v1786_v62 = vadd.f32 %v1785_v54, %v1781_v51  ;;  %v303_v27 = vrot.slane %v235_v43, %v3979_v61  ;;  %s5158_s9 = sld [smem:[#allocation4 + %s1789_s6]]  ;;  %s159_s22 = scalar_lea.vmem %s6615_s2, %s3430_s28 }
  0x3e   : > { %v1832_v35 = vmax.f32 %v1824_v32, 1e-24  ;;  %s5182_s11 = sld [smem:[#allocation4 + %s3471_s5]] }
  0x3f   : > { %v1812_v0 = vadd.f32 %v1811_v56, %v1808_v55  ;;  %v1869_v8 = vrot.slane %v1786_v62, %v3975_v58  ;;  %v1865_v9 = vrot.slane %v1786_v62, %v3962_v39  ;;  %s5184_s12 = sld [smem:[#allocation4 + %s1793_s10]] }
  0x40   : > { %3548 = vrsqrt.f32 %v1832_v35  ;;  %s5200_s13 = sld [smem:[#allocation4 + %s3473_s8]] }
  0x41   : > { %v1880_v11 = vrot.slane %v1812_v0, %v3979_v61  ;;  %v1876_v13 = vrot.slane %v1812_v0, %v3965_v42 }
  0x42   : > { %s904_s4 = sand.u32 2147483647, %s4327_s3 }
  0x46   : > { %v3547_v40 = vpop.eup %3546 }
  0x47   : > { %v257_v44 = vmul.f32 %v3547_v40, %v199_v10  ;;  %v259_v45 = vrot.slane %v3547_v40, 7 }
  0x49   : > { %v261_v48 = vmul.f32 %v259_v45, %v227_v12  ;;  %v266_v49 = vrot.slane %v257_v44, %v3962_v39  ;;  %v270_v23 = vrot.slane %v257_v44, %v3975_v58 }
  0x4a   : > { %v3549_v59 = vpop.eup %3548 }
  0x4b   : > { %v277_v52 = vrot.slane %v261_v48, %v3965_v42  ;;  %v1834_v1 = vmul.f32 %v3549_v59, %v1776_v22  ;;  %v1836_v2 = vrot.slane %v3549_v59, 7  ;;  %v6617_v22 = vmov 0  }
  0x4c   : > { %v281_v24 = vrot.slane %v261_v48, %v3979_v61 }
  0x4d   : > { %v306_v57 = vsel %vm168_vm0, %v266_v49, %v277_v52  ;;  %v1838_v5 = vmul.f32 %v1836_v2, %v1804_v25  ;;  %v1847_v6 = vrot.slane %v1834_v1, %v3975_v58  ;;  %v1843_v7 = vrot.slane %v1834_v1, %v3962_v39 }
  0x4e   : > { %v309_v60 = vsel %vm308_vm1, %v306_v57, %v288_v50  ;;  %v292_v25 = vrot.slane %v209_v41, %v3975_v58  ;;  %v307_v26 = vsel %vm168_vm0, %v270_v23, %v281_v24  ;;  %v7014_v58 = vmov 1  }
  0x4f   : > { %v312_v63 = vsel %vm311_vm2, %v309_v60, %v299_v53  ;;  %v1858_v10 = vrot.slane %v1838_v5, %v3979_v61  ;;  %v1854_v12 = vrot.slane %v1838_v5, %v3965_v42  ;;  %v6618_v53 = vmov 1  }
  0x50   : > { %v315_v3 = vsel %vm314_vm3, %v312_v63, 0.0  ;;  %v310_v29 = vsel %vm308_vm1, %v307_v26, %v292_v25 }
  0x51   : > { %317 = vxpose.xlu0.b32.start.end [1/1] (short) %v315_v3, 128  ;;  %v1884_v14 = vsel %vm168_vm0, %v1847_v6, %v1858_v10  ;;  %v1883_v15 = vsel %vm168_vm0, %v1843_v7, %v1854_v12  ;;  %v313_v30 = vsel %vm311_vm2, %v310_v29, %v303_v27 }
  0x52   : > { %v1886_v16 = vsel %vm308_vm1, %v1884_v14, %v1869_v8  ;;  %v1885_v17 = vsel %vm308_vm1, %v1883_v15, %v1865_v9  ;;  %v316_v31 = vsel %vm314_vm3, %v313_v30, 0.0 }
  0x53   : > { %v1888_v18 = vsel %vm311_vm2, %v1886_v16, %v1880_v11  ;;  %v1887_v19 = vsel %vm311_vm2, %v1885_v17, %v1876_v13 }
  0x54   : > { %v1890_v20 = vsel %vm314_vm3, %v1888_v18, 0.0  ;;  %v1889_v21 = vsel %vm314_vm3, %v1887_v19, 0.0 }
  0x55   : > { %1923 = vxpose.xlu1.b32.start.end [1/1] (short) %v1890_v20, 128 }
  0x73   : > { %3532 = vset.pattern.permute.xlu1 %v6617_v22 }
  0x8e   : > { %349 = vxpose.xlu0.b32.start.end [1/1] (short) %v316_v31, 128 }
  0xcb   : > { %1891 = vxpose.xlu0.b32.start.end [1/1] (short) %v1889_v21, 128 }
  0xd1   : > { %v4008_v32 = vpop.trf.xlu0 }
  0xd2   : > { %384 = vperm.xlu1 %3532, %v4008_v32  }
  0xd5   : > { %v4011_v34 = vpop.trf.xlu0  ;;  %v4062_v59 = vpop.trf.xlu1 }
  0xd6   : > { %6962 = vst [vmem:[#allocation11_spill] sm:$0xff] %v4011_v34  ;;  %389 = vperm.xlu1 %3532, %v4011_v34   ;;  %6972 = vst [vmem:[#allocation21_spill] sm:$0xff] %v4062_v59 }
  0xd9   : > { %v4014_v35 = vpop.trf.xlu0  ;;  %v4068_v62 = vpop.trf.xlu1 }
  0xda   : > { %6974 = vst [vmem:[#allocation23_spill] sm:$0xff] %v4068_v62 }
  0xdd   : > { %v4016_v36 = vpop.trf.xlu0  ;;  %v4076_v1 = vpop.trf.xlu1 }
  0xde   : > { %6977 = vst [vmem:[#allocation26_spill] sm:$0xff] %v4076_v1 }
  0xe1   : > { %v4018_v37 = vpop.trf.xlu0  ;;  %v4082_v3 = vpop.trf.xlu1 }
  0xe2   : > { %6963 = vst [vmem:[#allocation12_spill] sm:$0xff] %v4018_v37  ;;  %6979 = vst [vmem:[#allocation28_spill] sm:$0xff] %v4082_v3 }
  0xe5   : > { %v4020_v38 = vpop.trf.xlu0  ;;  %v4089_v7 = vpop.trf.xlu1 }
  0xe6   : > { %6982 = vst [vmem:[#allocation31_spill] sm:$0xff] %v4089_v7 }
  0xe9   : > { %v4022_v40 = vpop.trf.xlu0  ;;  %v4095_v9 = vpop.trf.xlu1 }
  0xea   : > { %6964 = vst [vmem:[#allocation13_spill] sm:$0xff] %v4022_v40  ;;  %6984 = vst [vmem:[#allocation33_spill] sm:$0xff] %v4095_v9 }
  0xed   : > { %v4024_v41 = vpop.trf.xlu0  ;;  %v4102_v12 = vpop.trf.xlu1 }
  0xee   : > { %6987 = vst [vmem:[#allocation36_spill] sm:$0xff] %v4102_v12 }
  0xf1   : > { %v4026_v43 = vpop.trf.xlu0  ;;  %v4108_v14 = vpop.trf.xlu1 }
  0xf2   : > { %6965 = vst [vmem:[#allocation14_spill] sm:$0xff] %v4026_v43  ;;  %6989 = vst [vmem:[#allocation38_spill] sm:$0xff] %v4108_v14 }
  0xf4   : > { %3531 = vset.pattern.permute.xlu0 %v6617_v22 }
  0xf5   : > { %v4029_v44 = vpop.trf.xlu0  ;;  %v4116_v17 = vpop.trf.xlu1 }
  0xf6   : > { %6992 = vst [vmem:[#allocation41_spill] sm:$0xff] %v4116_v17 }
  0xf9   : > { %v4031_v45 = vpop.trf.xlu0  ;;  %v4123_v19 = vpop.trf.xlu1 }
  0xfa   : > { %6966 = vst [vmem:[#allocation15_spill] sm:$0xff] %v4031_v45  ;;  %6994 = vst [vmem:[#allocation43_spill] sm:$0xff] %v4123_v19 }
  0xfd   : > { %v4033_v46 = vpop.trf.xlu0  ;;  %v4131_v23 = vpop.trf.xlu1 }
  0xfe   : > { %6997 = vst [vmem:[#allocation46_spill] sm:$0xff] %v4131_v23 }
 0x101   : > { %v4035_v47 = vpop.trf.xlu0  ;;  %v4137_v25 = vpop.trf.xlu1 }
 0x102   : > { %6967 = vst [vmem:[#allocation16_spill] sm:$0xff] %v4035_v47  ;;  %6999 = vst [vmem:[#allocation48_spill] sm:$0xff] %v4137_v25 }
 0x105   : > { %v4037_v48 = vpop.trf.xlu0  ;;  %v4145_v29 = vpop.trf.xlu1 }
 0x106   : > { %7002 = vst [vmem:[#allocation51_spill] sm:$0xff] %v4145_v29 }
 0x109   : > { %v4039_v49 = vpop.trf.xlu0  ;;  %v4152_v31 = vpop.trf.xlu1 }
 0x10a   : > { %6968 = vst [vmem:[#allocation17_spill] sm:$0xff] %v4039_v49  ;;  %7004 = vst [vmem:[#allocation53_spill] sm:$0xff] %v4152_v31 }
 0x10d   : > { %v4041_v50 = vpop.trf.xlu0 }
 0x111   : > { %v4043_v51 = vpop.trf.xlu0 }
 0x112   : > { %6969 = vst [vmem:[#allocation18_spill] sm:$0xff] %v4043_v51  ;;  %464 = vperm.xlu1 %3532, %v4043_v51  }
 0x115   : > { %v4046_v52 = vpop.trf.xlu0 }
 0x116   : > { %3533 = vset.pattern.permute.xlu1 %v6618_v53  ;;  %v4160_v53 = vpop.trf.xlu1 }
 0x117   : > { %630 = vperm.xlu1 %3533, %v4008_v32   ;;  %7007 = vst [vmem:[#allocation56_spill] sm:$0xff] %v4160_v53 }
 0x119   : > { %v4050_v54 = vpop.trf.xlu0 }
 0x11a   : > { %6970 = vst [vmem:[#allocation19_spill] sm:$0xff] %v4050_v54 }
 0x11b   : > { %634 = vperm.xlu1 %3533, %v4011_v34  }
 0x11d   : > { %v4053_v55 = vpop.trf.xlu0 }
 0x11f   : > { %3534 = vset.pattern.permute.xlu1 %v6617_v22 }
 0x120   : > { %394 = vperm.xlu1 %3534, %v4014_v35  }
 0x121   : > { %v4057_v56 = vpop.trf.xlu0 }
 0x122   : > { %6971 = vst [vmem:[#allocation20_spill] sm:$0xff] %v4057_v56 }
 0x124   : > { %474 = vperm.xlu1 %3534, %v4050_v54  }
 0x125   : > { %v4060_v57 = vpop.trf.xlu0 }
 0x128   : > { %399 = vperm.xlu1 %3534, %v4016_v36  }
 0x129   : > { %v4065_v60 = vpop.trf.xlu0 }
 0x12a   : > { %6973 = vst [vmem:[#allocation22_spill] sm:$0xff] %v4065_v60 }
 0x12c   : > { %479 = vperm.xlu1 %3534, %v4053_v55  }
 0x12d   : > { %v4070_v63 = vpop.trf.xlu0 }
 0x12e   : > { %6975 = vst [vmem:[#allocation24_spill] sm:$0xff] %v4070_v63 }
 0x130   : > { %469 = vperm.xlu0 %3531, %v4046_v52   ;;  %404 = vperm.xlu1 %3534, %v4018_v37  }
 0x131   : > { %v4074_v0 = vpop.trf.xlu0 }
 0x132   : > { %6976 = vst [vmem:[#allocation25_spill] sm:$0xff] %v4074_v0 }
 0x134   : > { %484 = vperm.xlu1 %3534, %v4057_v56  }
 0x135   : > { %v4079_v2 = vpop.trf.xlu0 }
 0x136   : > { %6978 = vst [vmem:[#allocation27_spill] sm:$0xff] %v4079_v2 }
 0x138   : > { %409 = vperm.xlu1 %3534, %v4020_v38  }
 0x139   : > { %v4084_v5 = vpop.trf.xlu0 }
 0x13a   : > { %6980 = vst [vmem:[#allocation29_spill] sm:$0xff] %v4084_v5 }
 0x13c   : > { %489 = vperm.xlu1 %3534, %v4060_v57  }
 0x13d   : > { %v4087_v6 = vpop.trf.xlu0 }
 0x13e   : > { %6981 = vst [vmem:[#allocation30_spill] sm:$0xff] %v4087_v6 }
 0x140   : > { %414 = vperm.xlu1 %3534, %v4022_v40  }
 0x141   : > { %v4092_v8 = vpop.trf.xlu0 }
 0x142   : > { %6983 = vst [vmem:[#allocation32_spill] sm:$0xff] %v4092_v8 }
 0x144   : > { %494 = vperm.xlu1 %3534, %v4065_v60  }
 0x145   : > { %v4097_v10 = vpop.trf.xlu0 }
 0x146   : > { %6985 = vst [vmem:[#allocation34_spill] sm:$0xff] %v4097_v10 }
 0x148   : > { %419 = vperm.xlu1 %3534, %v4024_v41  }
 0x149   : > { %v4100_v11 = vpop.trf.xlu0 }
 0x14a   : > { %6986 = vst [vmem:[#allocation35_spill] sm:$0xff] %v4100_v11 }
 0x14c   : > { %499 = vperm.xlu1 %3534, %v4070_v63  }
 0x14d   : > { %v4105_v13 = vpop.trf.xlu0 }
 0x14e   : > { %6988 = vst [vmem:[#allocation37_spill] sm:$0xff] %v4105_v13 }
 0x150   : > { %424 = vperm.xlu1 %3534, %v4026_v43  }
 0x151   : > { %v4110_v15 = vpop.trf.xlu0 }
 0x152   : > { %6990 = vst [vmem:[#allocation39_spill] sm:$0xff] %v4110_v15  ;;  %1958 = vperm.xlu0 %3531, %v4110_v15  }
 0x154   : > { %504 = vperm.xlu1 %3534, %v4074_v0  }
 0x155   : > { %v4114_v16 = vpop.trf.xlu0 }
 0x156   : > { %6991 = vst [vmem:[#allocation40_spill] sm:$0xff] %v4114_v16 }
 0x158   : > { %429 = vperm.xlu1 %3534, %v4029_v44  }
 0x159   : > { %v4119_v18 = vpop.trf.xlu0 }
 0x15a   : > { %6993 = vst [vmem:[#allocation42_spill] sm:$0xff] %v4119_v18  ;;  %1968 = vperm.xlu0 %3531, %v4119_v18   ;;  %v4166_v18 = vpop.trf.xlu1 }
 0x15b   : > { %7009 = vst [vmem:[#allocation58_spill] sm:$0xff] %v4166_v18 }
 0x15c   : > { %509 = vperm.xlu1 %3534, %v4079_v2  }
 0x15d   : > { %v4125_v20 = vpop.trf.xlu0 }
 0x15e   : > { %6995 = vst [vmem:[#allocation44_spill] sm:$0xff] %v4125_v20 }
 0x160   : > { %434 = vperm.xlu1 %3534, %v4031_v45  }
 0x161   : > { %v4128_v21 = vpop.trf.xlu0 }
 0x162   : > { %6996 = vst [vmem:[#allocation45_spill] sm:$0xff] %v4128_v21  ;;  %1978 = vperm.xlu0 %3531, %v4128_v21   ;;  %v4174_v21 = vpop.permute.xlu1 %384 }
 0x163   : > { %7012 = vst [vmem:[#allocation61_spill] sm:$0xff] %v4174_v21 }
 0x164   : > { %514 = vperm.xlu1 %3534, %v4084_v5  }
 0x165   : > { %v4134_v24 = vpop.trf.xlu0 }
 0x166   : > { %6998 = vst [vmem:[#allocation47_spill] sm:$0xff] %v4134_v24  ;;  %v4181_v16 = vpop.permute.xlu1 %389 }
 0x168   : > { %439 = vperm.xlu1 %3534, %v4033_v46  }
 0x169   : > { %v4139_v26 = vpop.trf.xlu0 }
 0x16a   : > { %7000 = vst [vmem:[#allocation49_spill] sm:$0xff] %v4139_v26  ;;  %1988 = vperm.xlu0 %3531, %v4139_v26  }
 0x16c   : > { %519 = vperm.xlu1 %3534, %v4087_v6  }
 0x16d   : > { %v4143_v27 = vpop.trf.xlu0 }
 0x16e   : > { %7001 = vst [vmem:[#allocation50_spill] sm:$0xff] %v4143_v27 }
 0x170   : > { %444 = vperm.xlu1 %3534, %v4035_v47  }
 0x171   : > { %v4148_v30 = vpop.trf.xlu0 }
 0x172   : > { %7003 = vst [vmem:[#allocation52_spill] sm:$0xff] %v4148_v30  ;;  %1998 = vperm.xlu0 %3531, %v4148_v30  }
 0x174   : > { %524 = vperm.xlu1 %3534, %v4092_v8  }
 0x175   : > { %v4154_v28 = vpop.trf.xlu0 }
 0x176   : > { %7005 = vst [vmem:[#allocation54_spill] sm:$0xff] %v4154_v28 }
 0x178   : > { %449 = vperm.xlu1 %3534, %v4037_v48  }
 0x179   : > { %v4157_v22 = vpop.trf.xlu0 }
 0x17a   : > { %7006 = vst [vmem:[#allocation55_spill] sm:$0xff] %v4157_v22  ;;  %2008 = vperm.xlu0 %3531, %v4157_v22  }
 0x17c   : > { %529 = vperm.xlu1 %3534, %v4097_v10  }
 0x17d   : > { %v4163_v33 = vpop.trf.xlu0 }
 0x17e   : > { %7008 = vst [vmem:[#allocation57_spill] sm:$0xff] %v4163_v33 }
 0x180   : > { %454 = vperm.xlu1 %3534, %v4039_v49  }
 0x181   : > { %v4168_v30 = vpop.trf.xlu0 }
 0x182   : > { %7010 = vst [vmem:[#allocation59_spill] sm:$0xff] %v4168_v30  ;;  %2018 = vperm.xlu0 %3531, %v4168_v30  }
 0x184   : > { %534 = vperm.xlu1 %3534, %v4100_v11  }
 0x185   : > { %v4172_v26 = vpop.trf.xlu0 }
 0x186   : > { %7011 = vst [vmem:[#allocation60_spill] sm:$0xff] %v4172_v26 }
 0x188   : > { %459 = vperm.xlu1 %3534, %v4041_v50  }
 0x189   : > { %v4177_v22 = vpop.trf.xlu0 }
 0x18a   : > { %7013 = vst [vmem:[#allocation62_spill] sm:$0xff] %v4177_v22  ;;  %2028 = vperm.xlu0 %3531, %v4177_v22  }
 0x18c   : > { %539 = vperm.xlu1 %3534, %v4105_v13  }
 0x18e   : > { %2038 = vperm.xlu0 %3531, %v4062_v59  }
 0x190   : > { %3535 = vset.pattern.permute.xlu1 %v7014_v58 }
 0x191   : > { %v4185_v30 = vpop.permute.xlu1 %464  ;;  %638 = vperm.xlu1 %3535, %v4014_v35  }
 0x192   : > { %2048 = vperm.xlu0 %3531, %v4076_v1  }
 0x195   : > { %642 = vperm.xlu1 %3535, %v4016_v36  }
 0x196   : > { %v4190_v21 = vpop.permute.xlu1 %630  ;;  %2058 = vperm.xlu0 %3531, %v4089_v7  }
 0x199   : > { %646 = vperm.xlu1 %3535, %v4018_v37  }
 0x19a   : > { %v4194_v22 = vpop.permute.xlu1 %634  ;;  %2068 = vperm.xlu0 %3531, %v4102_v12  }
 0x19d   : > { %650 = vperm.xlu1 %3535, %v4020_v38  }
 0x19e   : > { %2078 = vperm.xlu0 %3531, %v4116_v17  }
 0x19f   : > { %v4199_v59 = vpop.permute.xlu1 %394 }
 0x1a1   : > { %654 = vperm.xlu1 %3535, %v4022_v40  }
 0x1a2   : > { %2088 = vperm.xlu0 %3531, %v4131_v23  }
 0x1a3   : > { %v4203_v1 = vpop.permute.xlu1 %474 }
 0x1a4   : > { %7015 = vst [vmem:[#allocation63_spill] sm:$0xff] %v4203_v1 }
 0x1a5   : > { %658 = vperm.xlu1 %3535, %v4024_v41  }
 0x1a6   : > { %2098 = vperm.xlu0 %3531, %v4145_v29  }
 0x1a7   : > { %v4207_v7 = vpop.permute.xlu1 %399 }
 0x1a9   : > { %662 = vperm.xlu1 %3535, %v4026_v43  }
 0x1aa   : > { %2108 = vperm.xlu0 %3531, %v4160_v53  }
 0x1ab   : > { %v4211_v12 = vpop.permute.xlu1 %479 }
 0x1ac   : > { %7016 = vst [vmem:[#allocation64_spill] sm:$0xff] %v4211_v12 }
 0x1ad   : > { %666 = vperm.xlu1 %3535, %v4029_v44  }
 0x1ae   : > { %3539 = vset.pattern.permute.xlu0 %v7014_v58 }
 0x1af   : > { %v4215_v17 = vpop.permute.xlu1 %404  ;;  %674 = vperm.xlu0 %3539, %v4033_v46  }
 0x1b1   : > { %670 = vperm.xlu1 %3535, %v4031_v45  }
 0x1b3   : > { %v4219_v23 = vpop.permute.xlu1 %484  ;;  %686 = vperm.xlu0 %3539, %v4039_v49  }
 0x1b4   : > { %7017 = vst [vmem:[#allocation65_spill] sm:$0xff] %v4219_v23 }
 0x1b5   : > { %678 = vperm.xlu1 %3535, %v4035_v47  }
 0x1b7   : > { %v4223_v29 = vpop.permute.xlu1 %409  ;;  %694 = vperm.xlu0 %3539, %v4043_v51  }
 0x1b9   : > { %682 = vperm.xlu1 %3535, %v4037_v48  }
 0x1bb   : > { %v4227_v53 = vpop.permute.xlu1 %489  ;;  %702 = vperm.xlu0 %3539, %v4050_v54  }
 0x1bc   : > { %7018 = vst [vmem:[#allocation66_spill] sm:$0xff] %v4227_v53 }
 0x1bd   : > { %690 = vperm.xlu1 %3535, %v4041_v50  }
 0x1bf   : > { %v4231_v58 = vpop.permute.xlu1 %414  ;;  %710 = vperm.xlu0 %3539, %v4057_v56  }
 0x1c1   : > { %698 = vperm.xlu1 %3535, %v4046_v52  }
 0x1c3   : > { %v4235_v23 = vpop.permute.xlu1 %494  ;;  %718 = vperm.xlu0 %3539, %v4065_v60  }
 0x1c4   : > { %7019 = vst [vmem:[#allocation67_spill] sm:$0xff] %v4235_v23 }
 0x1c5   : > { %706 = vperm.xlu1 %3535, %v4053_v55  }
 0x1c7   : > { %v4239_v12 = vpop.permute.xlu1 %419  ;;  %726 = vperm.xlu0 %3539, %v4074_v0  }
 0x1c8   : > { %7020 = vst [vmem:[#allocation68_spill] sm:$0xff] %v4239_v12  ;;  %v4254_v12 = vpop.trf.xlu0 }
 0x1c9   : > { %714 = vperm.xlu1 %3535, %v4060_v57   ;;  %7024 = vst [vmem:[#allocation72_spill] sm:$0xff] %v4254_v12 }
 0x1cb   : > { %v4243_v53 = vpop.permute.xlu1 %499  ;;  %734 = vperm.xlu0 %3539, %v4084_v5  }
 0x1cc   : > { %7021 = vst [vmem:[#allocation69_spill] sm:$0xff] %v4243_v53 }
 0x1cd   : > { %722 = vperm.xlu1 %3535, %v4070_v63   ;;  %v4261_v63 = vpop.permute.xlu0 %469 }
 0x1ce   : > { %7025 = vst [vmem:[#allocation73_spill] sm:$0xff] %v4261_v63 }
 0x1cf   : > { %v4247_v1 = vpop.permute.xlu1 %424  ;;  %742 = vperm.xlu0 %3539, %v4092_v8  }
 0x1d0   : > { %7022 = vst [vmem:[#allocation70_spill] sm:$0xff] %v4247_v1 }
 0x1d1   : > { %730 = vperm.xlu1 %3535, %v4079_v2  }
 0x1d3   : > { %v4251_v23 = vpop.permute.xlu1 %504  ;;  %750 = vperm.xlu0 %3539, %v4100_v11  }
 0x1d4   : > { %7023 = vst [vmem:[#allocation71_spill] sm:$0xff] %v4251_v23 }
 0x1d5   : > { %738 = vperm.xlu1 %3535, %v4087_v6   ;;  %v4272_v6 = vpop.permute.xlu0 %1958 }
 0x1d6   : > { %7027 = vst [vmem:[#allocation75_spill] sm:$0xff] %v4272_v6  ;;  %v183_v6 = vstv %s182_s26 }
 0x1d7   : > { %v4257_v53 = vpop.permute.xlu1 %429  ;;  %2204 = vperm.xlu0 %3539, %v4110_v15   ;;  %v6677_v15 = vmov 2  }
 0x1d9   : > { %746 = vperm.xlu1 %3535, %v4097_v10   ;;  %v188_v10 = vstv %s187_s29 }
 0x1db   : > { %v4263_v1 = vpop.permute.xlu1 %509  ;;  %2216 = vperm.xlu0 %3539, %v4125_v20   ;;  %v4280_v20 = vpop.permute.xlu0 %1968 }
 0x1dc   : > { %7026 = vst [vmem:[#allocation74_spill] sm:$0xff] %v4263_v1  ;;  %7029 = vst [vmem:[#allocation77_spill] sm:$0xff] %v4280_v20 }
 0x1dd   : > { %754 = vperm.xlu1 %3535, %v4105_v13  }
 0x1df   : > { %v4269_v23 = vpop.permute.xlu1 %434  ;;  %2224 = vperm.xlu0 %3539, %v4134_v24   ;;  %v214_v24 = vstv %s213_s23 }
 0x1e1   : > { %3536 = vset.pattern.permute.xlu1 %v6677_v15  ;;  %v215_v15 = vmul.f32 %v214_v24, %v3944_v4 }
 0x1e2   : > { %1179 = vperm.xlu1 %3536, %v4011_v34   ;;  %v218_v34 = vstv %s217_s27 }
 0x1e3   : > { %v4277_v1 = vpop.permute.xlu1 %514  ;;  %2232 = vperm.xlu0 %3539, %v4143_v27   ;;  %v219_v20 = vadd.f32 %v218_v34, %v215_v15  ;;  %v184_v27 = vmul.f32 %v183_v6, %v3944_v4 }
 0x1e4   : > { %7028 = vst [vmem:[#allocation76_spill] sm:$0xff] %v4277_v1  ;;  %v4291_v1 = vpop.permute.xlu0 %1978 }
 0x1e5   : > { %7031 = vst [vmem:[#allocation79_spill] sm:$0xff] %v4291_v1 }
 0x1e6   : > { %1183 = vperm.xlu1 %3536, %v4014_v35  }
 0x1e7   : > { %v4283_v63 = vpop.permute.xlu1 %439  ;;  %2240 = vperm.xlu0 %3539, %v4154_v28   ;;  %v189_v28 = vadd.f32 %v188_v10, %v184_v27 }
 0x1e9   : > { %v4298_v24 = vpop.permute.xlu0 %1988  ;;  %v210_v4 = vmul.f32 %v189_v28, %v189_v28 }
 0x1ea   : > { %1191 = vperm.xlu1 %3536, %v4018_v37   ;;  %7032 = vst [vmem:[#allocation80_spill] sm:$0xff] %v4298_v24  ;;  %v236_v37 = vmul.f32 %v219_v20, %v219_v20 }
 0x1eb   : > { %v4288_v13 = vpop.permute.xlu1 %519  ;;  %2248 = vperm.xlu0 %3539, %v4163_v33  }
 0x1ec   : > { %7030 = vst [vmem:[#allocation78_spill] sm:$0xff] %v4288_v13  ;;  %v3442_v34 = vrot.slane %v236_v37, 9 }
 0x1ee   : > { %1199 = vperm.xlu1 %3536, %v4022_v40   ;;  %v241_v24 = vadd.f32 %v3442_v34, %v210_v4 }
 0x1ef   : > { %v4295_v2 = vpop.permute.xlu1 %444  ;;  %2256 = vperm.xlu0 %3539, %v4172_v26  }
 0x1f0   : > { %v251_v1 = vmax.f32 %v241_v24, 1e-24 }
 0x1f1   : > { %v4308_v15 = vpop.permute.xlu0 %1998 }
 0x1f2   : > { %1207 = vperm.xlu1 %3536, %v4026_v43   ;;  %7034 = vst [vmem:[#allocation82_spill] sm:$0xff] %v4308_v15  ;;  %3550 = vrsqrt.f32 %v251_v1 }
 0x1f3   : > { %v4301_v13 = vpop.permute.xlu1 %524  ;;  %2264 = vperm.xlu0 %3539, %v4254_v12  }
 0x1f4   : > { %7033 = vst [vmem:[#allocation81_spill] sm:$0xff] %v4301_v13 }
 0x1f6   : > { %1215 = vperm.xlu1 %3536, %v4031_v45  }
 0x1f7   : > { %v4305_v6 = vpop.permute.xlu1 %449  ;;  %2272 = vperm.xlu0 %3539, %v4068_v62  }
 0x1f9   : > { %v4314_v27 = vpop.permute.xlu0 %2008 }
 0x1fa   : > { %1223 = vperm.xlu1 %3536, %v4035_v47   ;;  %7036 = vst [vmem:[#allocation84_spill] sm:$0xff] %v4314_v27 }
 0x1fb   : > { %v4311_v10 = vpop.permute.xlu1 %529  ;;  %2280 = vperm.xlu0 %3539, %v4082_v3  }
 0x1fc   : > { %7035 = vst [vmem:[#allocation83_spill] sm:$0xff] %v4311_v10  ;;  %v3551_v15 = vpop.eup %3550 }
 0x1fe   : > { %1231 = vperm.xlu1 %3536, %v4039_v49  }
 0x1ff   : > { %v4317_v37 = vpop.permute.xlu1 %454  ;;  %2288 = vperm.xlu0 %3539, %v4095_v9   ;;  %v7056_v9 = vld [vmem:[#allocation68_spill] sm:$0xff] }
 0x201   : > { %v4325_v4 = vpop.permute.xlu0 %2018 }
 0x202   : > { %1239 = vperm.xlu1 %3536, %v4043_v51   ;;  %7038 = vst [vmem:[#allocation86_spill] sm:$0xff] %v4325_v4  ;;  %v253_v51 = vstv %s4327_s3 }
 0x203   : > { %v4322_v34 = vpop.permute.xlu1 %534  ;;  %2296 = vperm.xlu0 %3539, %v4108_v14   ;;  %v254_v49 = vmul.f32 %v3551_v15, %v253_v51  ;;  %v7044_v51 = vmov 2  }
 0x204   : > { %7037 = vst [vmem:[#allocation85_spill] sm:$0xff] %v4322_v34 }
 0x205   : > { %v626_v47 = vrot.slane %v254_v49, 7 }
 0x206   : > { %1247 = vperm.xlu1 %3536, %v4050_v54  }
 0x207   : > { %v4330_v24 = vpop.permute.xlu1 %459  ;;  %2304 = vperm.xlu0 %3539, %v4123_v19  }
 0x209   : > { %v4333_v27 = vpop.permute.xlu0 %2028 }
 0x20a   : > { %7039 = vst [vmem:[#allocation87_spill] sm:$0xff] %v4333_v27  ;;  %1255 = vperm.xlu1 %3536, %v4057_v56   ;;  %v628_v56 = vmul.f32 %v626_v47, %v219_v20  ;;  %v7046_v20 = vld [vmem:[#allocation9_spill] sm:$0xff] }
 0x20b   : > { %v4336_v1 = vpop.permute.xlu1 %539  ;;  %2312 = vperm.xlu0 %3539, %v4137_v25  }
 0x20c   : > { %7040 = vst [vmem:[#allocation88_spill] sm:$0xff] %v4336_v1 }
 0x20d   : > { %v4340_v4 = vpop.permute.xlu0 %2038 }
 0x20e   : > { %7041 = vst [vmem:[#allocation89_spill] sm:$0xff] %v4340_v4  ;;  %1263 = vperm.xlu1 %3536, %v4065_v60   ;;  %v381_v4 = vmul.f32 %v254_v49, %v189_v28 }
 0x20f   : > { %2320 = vperm.xlu0 %3539, %v4152_v31   ;;  %v4413_v31 = vstv %s904_s4 }
 0x210   : > { %v4344_v54 = vpop.permute.xlu1 %638  ;;  %v546_v47 = vrot.slane %v381_v4, %v3962_v39 }
 0x211   : > { %v4346_v45 = vpop.permute.xlu0 %2048 }
 0x212   : > { %7042 = vst [vmem:[#allocation90_spill] sm:$0xff] %v4346_v45  ;;  %1271 = vperm.xlu1 %3536, %v4074_v0   ;;  %v761_v45 = vrot.slane %v628_v56, %v3965_v42  ;;  %v765_v0 = vrot.slane %v628_v56, %v3979_v61  ;;  %v4379_v56 = vrot.slane %v546_v47, %v3962_v39 }
 0x213   : > { %2328 = vperm.xlu0 %3539, %v4166_v18  }
 0x214   : > { %v4350_v27 = vpop.permute.xlu1 %642  ;;  %v4370_v28 = vrot.slane %v761_v45, %v3965_v42  ;;  %v573_v1 = vmul.f32 %v4379_v56, %v4231_v58 }
 0x215   : > { %v4352_v25 = vpop.permute.xlu0 %2058 }
 0x216   : > { %7043 = vst [vmem:[#allocation91_spill] sm:$0xff] %v4352_v25  ;;  %1279 = vperm.xlu1 %3536, %v4084_v5   ;;  %v550_v25 = vrot.slane %v381_v4, %v7046_v20  ;;  %v778_v4 = vmul.f32 %v4370_v28, %v4194_v22  ;;  %v776_v47 = vmul.f32 %v4370_v28, %v4190_v21  ;;  %v6729_v20 = vmov 3  }
 0x217   : > { %3541 = vset.pattern.permute.xlu0 %v7044_v51  ;;  %v4375_v51 = vrot.slane %v765_v0, %v3965_v42  ;;  %v563_v0 = vmul.f32 %v4379_v56, %v4181_v16 }
 0x218   : > { %v4356_v15 = vpop.permute.xlu1 %646  ;;  %1175 = vperm.xlu0 %3541, %v4008_v32  }
 0x219   : > { %v4360_v60 = vpop.permute.xlu0 %2068  ;;  %v779_v45 = vmul.f32 %v4375_v51, %v4194_v22  ;;  %v7049_v22 = vld [vmem:[#allocation61_spill] sm:$0xff] }
 0x21a   : > { %7045 = vst [vmem:[#allocation92_spill] sm:$0xff] %v4360_v60  ;;  %1287 = vperm.xlu1 %3536, %v4092_v8   ;;  %v4384_v60 = vrot.slane %v550_v25, %v3962_v39  ;;  %v777_v25 = vmul.f32 %v4375_v51, %v4190_v21  ;;  %v561_v39 = vmul.f32 %v4379_v56, %v7049_v22 }
 0x21c   : > { %v4366_v5 = vpop.permute.xlu1 %650  ;;  %1187 = vperm.xlu0 %3541, %v4016_v36   ;;  %v564_v42 = vmul.f32 %v4384_v60, %v4181_v16  ;;  %v562_v8 = vmul.f32 %v4384_v60, %v7049_v22  ;;  %v840_v16 = vadd.f32 %v776_v47, %v561_v39  ;;  %v4533_v13 = vmul.f32 %v4384_v60, %v4257_v53 }
 0x21d   : > { %v4372_v49 = vpop.permute.xlu0 %2078  ;;  %v786_v34 = vmul.f32 %v4370_v28, %v4366_v5 }
 0x21e   : > { %7047 = vst [vmem:[#allocation93_spill] sm:$0xff] %v4372_v49  ;;  %1295 = vperm.xlu1 %3536, %v4100_v11   ;;  %v842_v11 = vadd.f32 %v778_v4, %v563_v0 }
 0x220   : > { %v4388_v61 = vpop.permute.xlu1 %654  ;;  %1195 = vperm.xlu0 %3541, %v4020_v38   ;;  %v908_v19 = vsub.f32 %v842_v11, %v4413_v31 }
 0x221   : > { %v4395_v49 = vpop.permute.xlu0 %2088  ;;  %v788_v62 = vmul.f32 %v4370_v28, %v4388_v61 }
 0x222   : > { %7048 = vst [vmem:[#allocation94_spill] sm:$0xff] %v4395_v49  ;;  %3537 = vset.pattern.permute.xlu1 %v6729_v20  ;;  %v843_v49 = vadd.f32 %v779_v45, %v564_v42  ;;  %v841_v20 = vadd.f32 %v777_v25, %v562_v8  ;;  %v906_v42 = vsub.f32 %v840_v16, %v4413_v31  ;;  %v974_v0 = vmul.f32 1.442695, %v908_v19 }
 0x223   : > { %1468 = vperm.xlu1 %3537, %v4008_v32  }
 0x224   : > { %v4408_v18 = vpop.permute.xlu1 %658  ;;  %1203 = vperm.xlu0 %3541, %v4024_v41   ;;  %v909_v32 = vsub.f32 %v843_v49, %v4413_v31  ;;  %v907_v39 = vsub.f32 %v841_v20, %v4413_v31  ;;  %3552 = vpow2.f32 %v974_v0  ;;  %v4463_v0 = vmul.f32 %v4379_v56, %v4185_v30 }
 0x225   : > { %v4411_v21 = vpop.permute.xlu0 %2098 }
 0x226   : > { %7050 = vst [vmem:[#allocation61_spill] sm:$0xff] %v4411_v21  ;;  %v976_v8 = vmul.f32 1.442695, %v909_v32  ;;  %v972_v11 = vmul.f32 1.442695, %v907_v39  ;;  %v568_v21 = vmul.f32 %v4384_v60, %v4207_v7 }
 0x227   : > { %1476 = vperm.xlu1 %3537, %v4014_v35   ;;  %v970_v35 = vmul.f32 1.442695, %v906_v42  ;;  %v781_v42 = vmul.f32 %v4375_v51, %v4344_v54 }
 0x228   : > { %v4418_v4 = vpop.permute.xlu1 %662  ;;  %1211 = vperm.xlu0 %3541, %v4029_v44   ;;  %3554 = vpow2.f32 %v976_v8  ;;  %v566_v8 = vmul.f32 %v4384_v60, %v4199_v59 }
 0x229   : > { %v4422_v45 = vpop.permute.xlu0 %2108  ;;  %3556 = vpow2.f32 %v970_v35  ;;  %v782_v35 = vmul.f32 %v4370_v28, %v4350_v27 }
 0x22a   : > { %7051 = vst [vmem:[#allocation95_spill] sm:$0xff] %v4422_v45  ;;  %3558 = vpow2.f32 %v972_v11  ;;  %v567_v45 = vmul.f32 %v4379_v56, %v4207_v7  ;;  %v571_v7 = vmul.f32 %v4379_v56, %v4223_v29 }
 0x22b   : > { %1480 = vperm.xlu1 %3537, %v4016_v36  }
 0x22c   : > { %v4426_v47 = vpop.permute.xlu1 %666  ;;  %1219 = vperm.xlu0 %3541, %v4033_v46   ;;  %v846_v40 = vadd.f32 %v782_v35, %v567_v45  ;;  %v787_v35 = vmul.f32 %v4375_v51, %v4366_v5  ;;  %v789_v5 = vmul.f32 %v4375_v51, %v4388_v61 }
 0x22e   : > { %v4429_v49 = vpop.permute.xlu0 %674  ;;  %v4449_v16 = vpop.eup %3552 }
 0x22f   : > { %1488 = vperm.xlu1 %3537, %v4020_v38   ;;  %v780_v38 = vmul.f32 %v4370_v28, %v4344_v54  ;;  %7052 = vst [vmem:[#allocation96_spill] sm:$0xff] %v4449_v16 }
 0x230   : > { %v4432_v25 = vpop.permute.xlu1 %670  ;;  %1227 = vperm.xlu0 %3541, %v4037_v48  }
 0x232   : > { %v4435_v36 = vpop.permute.xlu0 %686  ;;  %v4451_v32 = vpop.eup %3554 }
 0x233   : > { %1496 = vperm.xlu1 %3537, %v4024_v41   ;;  %7053 = vst [vmem:[#allocation97_spill] sm:$0xff] %v4451_v32  ;;  %v565_v41 = vmul.f32 %v4379_v56, %v4199_v59  ;;  %v569_v59 = vmul.f32 %v4379_v56, %v4215_v17 }
 0x234   : > { %v4438_v19 = vpop.permute.xlu1 %678  ;;  %1235 = vperm.xlu0 %3541, %v4041_v50  }
 0x235   : > { %v844_v43 = vadd.f32 %v780_v38, %v565_v41  ;;  %v572_v38 = vmul.f32 %v4384_v60, %v4223_v29  ;;  %v845_v41 = vadd.f32 %v781_v42, %v566_v8  ;;  %v575_v29 = vmul.f32 %v4379_v56, %v7056_v9 }
 0x236   : > { %v4441_v20 = vpop.permute.xlu0 %694  ;;  %v576_v42 = vmul.f32 %v4384_v60, %v7056_v9 }
 0x237   : > { %1504 = vperm.xlu1 %3537, %v4029_v44   ;;  %v4459_v44 = vpop.eup %3556  ;;  %v910_v8 = vsub.f32 %v844_v43, %v4413_v31  ;;  %v579_v43 = vmul.f32 %v4379_v56, %v4257_v53  ;;  %v911_v9 = vsub.f32 %v845_v41, %v4413_v31  ;;  %v850_v41 = vadd.f32 %v786_v34, %v571_v7  ;;  %v7059_v53 = vld [vmem:[#allocation24_spill] sm:$0xff] }
 0x238   : > { %v4446_v22 = vpop.permute.xlu1 %682  ;;  %1243 = vperm.xlu0 %3541, %v4046_v52   ;;  %7054 = vst [vmem:[#allocation98_spill] sm:$0xff] %v4459_v44  ;;  %v4470_v11 = vpop.eup %3558  ;;  %v4474_v54 = vadd.f32 %v4459_v44, %v4449_v16  ;;  %v570_v44 = vmul.f32 %v4384_v60, %v4215_v17  ;;  %v783_v16 = vmul.f32 %v4375_v51, %v4350_v27 }
 0x239   : > { %7055 = vst [vmem:[#allocation99_spill] sm:$0xff] %v4470_v11  ;;  %v574_v17 = vmul.f32 %v4384_v60, %v4231_v58  ;;  %v785_v27 = vmul.f32 %v4375_v51, %v4356_v15  ;;  %v7057_v58 = vld [vmem:[#allocation70_spill] sm:$0xff]  ;;  %v4557_v34 = vmul.f32 %v4379_v56, %v4283_v63  ;;  %v980_v7 = vmul.f32 1.442695, %v911_v9 }
 0x23a   : > { %v4457_v39 = vpop.permute.xlu0 %702  ;;  %v847_v45 = vadd.f32 %v783_v16, %v568_v21  ;;  %v912_v21 = vsub.f32 %v846_v40, %v4413_v31  ;;  %v4550_v40 = vmul.f32 %v4384_v60, %v4269_v23 }
 0x23b   : > { %1512 = vperm.xlu1 %3537, %v4033_v46   ;;  %v4485_v46 = vadd.f32 %v4470_v11, %v4451_v32  ;;  %v784_v11 = vmul.f32 %v4370_v28, %v4356_v15  ;;  %v577_v15 = vmul.f32 %v4379_v56, %v7057_v58  ;;  %v849_v16 = vadd.f32 %v785_v27, %v570_v44 }
 0x23c   : > { %v4480_v14 = vpop.permute.xlu1 %690  ;;  %1251 = vperm.xlu0 %3541, %v4053_v55   ;;  %v913_v61 = vsub.f32 %v847_v45, %v4413_v31  ;;  %v791_v44 = vmul.f32 %v4375_v51, %v4408_v18  ;;  %v853_v45 = vadd.f32 %v789_v5, %v574_v17  ;;  %v793_v17 = vmul.f32 %v4375_v51, %v4418_v4 }
 0x23d   : > { %v848_v10 = vadd.f32 %v784_v11, %v569_v59  ;;  %v4541_v11 = vmul.f32 %v4379_v56, %v4269_v23  ;;  %v978_v59 = vmul.f32 1.442695, %v910_v8  ;;  %v852_v8 = vadd.f32 %v788_v62, %v573_v1  ;;  %v7060_v1 = vld [vmem:[#allocation27_spill] sm:$0xff] }
 0x23e   : > { %v4499_v32 = vpop.permute.xlu0 %710  ;;  %v4564_v23 = vmul.f32 %v4384_v60, %v4283_v63  ;;  %v984_v9 = vmul.f32 1.442695, %v913_v61 }
 0x23f   : > { %1520 = vperm.xlu1 %3537, %v4037_v48   ;;  %v578_v48 = vmul.f32 %v4384_v60, %v7057_v58  ;;  %v790_v58 = vmul.f32 %v4370_v28, %v4408_v18  ;;  %v914_v27 = vsub.f32 %v848_v10, %v4413_v31  ;;  %3560 = vpow2.f32 %v978_v59 }
 0x240   : > { %v4515_v3 = vpop.permute.xlu1 %698  ;;  %1259 = vperm.xlu0 %3541, %v4060_v57   ;;  %v916_v18 = vsub.f32 %v850_v41, %v4413_v31  ;;  %v792_v10 = vmul.f32 %v4370_v28, %v4418_v4  ;;  %3562 = vpow2.f32 %v980_v7  ;;  %v919_v41 = vsub.f32 %v853_v45, %v4413_v31  ;;  %v7061_v7 = vld [vmem:[#allocation30_spill] sm:$0xff] }
 0x242   : > { %v4529_v12 = vpop.permute.xlu0 %718  ;;  %v856_v61 = vadd.f32 %v792_v10, %v577_v15  ;;  %v585_v15 = vmul.f32 %v4379_v56, %v4295_v2 }
 0x243   : > { %7058 = vst [vmem:[#allocation68_spill] sm:$0xff] %v4529_v12  ;;  %1528 = vperm.xlu1 %3537, %v4041_v50   ;;  %v851_v50 = vadd.f32 %v787_v35, %v572_v38  ;;  %v982_v12 = vmul.f32 1.442695, %v912_v21  ;;  %v915_v38 = vsub.f32 %v849_v16, %v4413_v31  ;;  %v854_v35 = vadd.f32 %v790_v58, %v575_v29 }
 0x244   : > { %v4545_v26 = vpop.permute.xlu1 %706  ;;  %1267 = vperm.xlu0 %3541, %v7059_v53   ;;  %v855_v21 = vadd.f32 %v791_v44, %v576_v42  ;;  %v918_v16 = vsub.f32 %v852_v8, %v4413_v31  ;;  %v794_v29 = vmul.f32 %v4370_v28, %v4426_v47  ;;  %v795_v58 = vmul.f32 %v4375_v51, %v4426_v47 }
 0x245   : > { %v917_v63 = vsub.f32 %v851_v50, %v4413_v31  ;;  %3564 = vpow2.f32 %v982_v12  ;;  %v988_v59 = vmul.f32 1.442695, %v915_v38  ;;  %v990_v42 = vmul.f32 1.442695, %v916_v18 }
 0x246   : > { %v4560_v33 = vpop.permute.xlu0 %726  ;;  %v920_v4 = vsub.f32 %v854_v35, %v4413_v31  ;;  %v796_v50 = vmul.f32 %v4370_v28, %v4432_v25  ;;  %3566 = vpow2.f32 %v984_v9  ;;  %v857_v8 = vadd.f32 %v793_v17, %v578_v48 }
 0x247   : > { %1536 = vperm.xlu1 %3537, %v4046_v52   ;;  %v986_v52 = vmul.f32 1.442695, %v914_v27  ;;  %v992_v12 = vmul.f32 1.442695, %v917_v63  ;;  %v921_v27 = vsub.f32 %v855_v21, %v4413_v31  ;;  %v994_v47 = vmul.f32 1.442695, %v918_v16 }
 0x248   : > { %v4571_v62 = vpop.permute.xlu1 %714  ;;  %1275 = vperm.xlu0 %3541, %v7060_v1   ;;  %v858_v38 = vadd.f32 %v794_v29, %v579_v43  ;;  %v996_v18 = vmul.f32 1.442695, %v919_v41  ;;  %v859_v35 = vadd.f32 %v795_v58, %v4533_v13  ;;  %v998_v10 = vmul.f32 1.442695, %v920_v4 }
 0x249   : > { %3568 = vpow2.f32 %v986_v52  ;;  %v922_v48 = vsub.f32 %v856_v61, %v4413_v31  ;;  %v860_v43 = vadd.f32 %v796_v50, %v4541_v11  ;;  %v586_v63 = vmul.f32 %v4384_v60, %v4295_v2  ;;  %v4609_v13 = vpop.eup %3560  ;;  %v7065_v61 = vld [vmem:[#allocation37_spill] sm:$0xff] }
 0x24a   : > { %v4580_v5 = vpop.permute.xlu0 %734  ;;  %3570 = vpow2.f32 %v988_v59  ;;  %v1000_v21 = vmul.f32 1.442695, %v921_v27  ;;  %v923_v17 = vsub.f32 %v857_v8, %v4413_v31  ;;  %7063 = vst [vmem:[#allocation70_spill] sm:$0xff] %v4609_v13  ;;  %v798_v52 = vmul.f32 %v4370_v28, %v4429_v49  ;;  %v4623_v41 = vpop.eup %3562 }
 0x24b   : > { %1544 = vperm.xlu1 %3537, %v4053_v55   ;;  %v797_v55 = vmul.f32 %v4375_v51, %v4432_v25  ;;  %3572 = vpow2.f32 %v990_v42  ;;  %v7062_v25 = vld [vmem:[#allocation34_spill] sm:$0xff]  ;;  %v587_v29 = vmul.f32 %v4379_v56, %v4305_v6  ;;  %v925_v2 = vsub.f32 %v859_v35, %v4413_v31  ;;  %7064 = vst [vmem:[#allocation24_spill] sm:$0xff] %v4623_v41 }
 0x24c   : > { %v4589_v44 = vpop.permute.xlu1 %722  ;;  %1283 = vperm.xlu0 %3541, %v7061_v7   ;;  %3574 = vpow2.f32 %v992_v12  ;;  %v799_v59 = vmul.f32 %v4375_v51, %v4429_v49  ;;  %v1002_v58 = vmul.f32 1.442695, %v922_v48  ;;  %v926_v42 = vsub.f32 %v860_v43, %v4413_v31 }
 0x24d   : > { %3576 = vpow2.f32 %v994_v47  ;;  %v861_v11 = vadd.f32 %v797_v55, %v4550_v40  ;;  %v800_v40 = vmul.f32 %v4370_v28, %v4438_v19  ;;  %v588_v49 = vmul.f32 %v4384_v60, %v4305_v6 }
 0x24e   : > { %v4595_v45 = vpop.permute.xlu0 %742  ;;  %3578 = vpow2.f32 %v996_v18  ;;  %v801_v12 = vmul.f32 %v4375_v51, %v4438_v19  ;;  %v862_v8 = vadd.f32 %v798_v52, %v4557_v34  ;;  %v589_v6 = vmul.f32 %v4379_v56, %v4317_v37 }
 0x24f   : > { %1552 = vperm.xlu1 %3537, %v4060_v57   ;;  %v924_v57 = vsub.f32 %v858_v38, %v4413_v31  ;;  %3580 = vpow2.f32 %v998_v10  ;;  %v4631_v50 = vpop.eup %3564  ;;  %v927_v47 = vsub.f32 %v861_v11, %v4413_v31  ;;  %v802_v38 = vmul.f32 %v4370_v28, %v4446_v22 }
 0x250   : > { %v4603_v9 = vpop.permute.xlu1 %730  ;;  %1291 = vperm.xlu0 %3541, %v7062_v25   ;;  %7066 = vst [vmem:[#allocation27_spill] sm:$0xff] %v4631_v50  ;;  %3582 = vpow2.f32 %v1000_v21  ;;  %v4643_v18 = vpop.eup %3566  ;;  %v590_v35 = vmul.f32 %v4384_v60, %v4317_v37  ;;  %v1008_v10 = vmul.f32 1.442695, %v925_v2  ;;  %v863_v19 = vadd.f32 %v799_v59, %v4564_v23 }
 0x251   : > { %v1006_v27 = vmul.f32 1.442695, %v924_v57  ;;  %7068 = vst [vmem:[#allocation34_spill] sm:$0xff] %v4643_v18  ;;  %3584 = vpow2.f32 %v1002_v58  ;;  %v1010_v48 = vmul.f32 1.442695, %v926_v42  ;;  %v864_v43 = vadd.f32 %v800_v40, %v585_v15  ;;  %v7070_v57 = vld [vmem:[#allocation40_spill] sm:$0xff] }
 0x252   : > { %v4615_v16 = vpop.permute.xlu0 %750  ;;  %v803_v21 = vmul.f32 %v4375_v51, %v4446_v22  ;;  %v1099_v37 = vadd.f32 %v4609_v13, %v4474_v54  ;;  %v1136_v23 = vadd.f32 %v4623_v41, %v4485_v46  ;;  %v928_v15 = vsub.f32 %v862_v8, %v4413_v31 }
 0x253   : > { %1560 = vperm.xlu1 %3537, %v7059_v53   ;;  %v1004_v53 = vmul.f32 1.442695, %v923_v17  ;;  %v4651_v34 = vpop.eup %3568  ;;  %v1012_v22 = vmul.f32 1.442695, %v927_v47  ;;  %v866_v2 = vadd.f32 %v802_v38, %v587_v29  ;;  %v929_v46 = vsub.f32 %v863_v19, %v4413_v31 }
 0x254   : > { %v4628_v4 = vpop.permute.xlu1 %738  ;;  %1299 = vperm.xlu0 %3541, %v7065_v61   ;;  %7069 = vst [vmem:[#allocation37_spill] sm:$0xff] %v4651_v34  ;;  %v4658_v52 = vpop.eup %3570  ;;  %v1100_v42 = vadd.f32 %v4631_v50, %v1099_v37  ;;  %v1137_v54 = vadd.f32 %v4643_v18, %v1136_v23  ;;  %v804_v40 = vmul.f32 %v4370_v28, %v4435_v36 }
 0x255   : > { %7071 = vst [vmem:[#allocation100_spill] sm:$0xff] %v4658_v52  ;;  %3586 = vpow2.f32 %v1004_v53  ;;  %v4664_v11 = vpop.eup %3572  ;;  %v930_v29 = vsub.f32 %v864_v43, %v4413_v31  ;;  %v867_v53 = vadd.f32 %v803_v21, %v588_v49  ;;  %v932_v49 = vsub.f32 %v866_v2, %v4413_v31 }
 0x256   : > { %v4641_v55 = vpop.permute.xlu0 %2204  ;;  %7072 = vst [vmem:[#allocation101_spill] sm:$0xff] %v4664_v11  ;;  %3588 = vpow2.f32 %v1006_v27  ;;  %v4669_v58 = vpop.eup %3574  ;;  %v7076_v27 = vld [vmem:[#allocation45_spill] sm:$0xff]  ;;  %v1101_v47 = vadd.f32 %v4651_v34, %v1100_v42  ;;  %v1138_v38 = vadd.f32 %v4658_v52, %v1137_v54  ;;  %v806_v43 = vmul.f32 %v4370_v28, %v4480_v14 }
 0x257   : > { %7067 = vst [vmem:[#allocation30_spill] sm:$0xff] %v4641_v55  ;;  %1568 = vperm.xlu1 %3537, %v7060_v1   ;;  %v865_v1 = vadd.f32 %v801_v12, %v586_v63  ;;  %7074 = vst [vmem:[#allocation103_spill] sm:$0xff] %v4669_v58  ;;  %3590 = vpow2.f32 %v1008_v10  ;;  %v4675_v63 = vpop.eup %3576  ;;  %v591_v23 = vmul.f32 %v4379_v56, %v4330_v24  ;;  %v1016_v42 = vmul.f32 1.442695, %v929_v46 }
 0x258   : > { %v4655_v17 = vpop.permute.xlu1 %746  ;;  %2753 = vperm.xlu0 %3541, %v7070_v57   ;;  %7075 = vst [vmem:[#allocation104_spill] sm:$0xff] %v4675_v63  ;;  %3592 = vpow2.f32 %v1010_v48  ;;  %v4683_v8 = vpop.eup %3578  ;;  %v1014_v48 = vmul.f32 1.442695, %v928_v15  ;;  %v868_v15 = vadd.f32 %v804_v40, %v589_v6  ;;  %v933_v2 = vsub.f32 %v867_v53, %v4413_v31 }
 0x259   : > { %7077 = vst [vmem:[#allocation105_spill] sm:$0xff] %v4683_v8  ;;  %v931_v10 = vsub.f32 %v865_v1, %v4413_v31  ;;  %v4690_v19 = vpop.eup %3580  ;;  %3594 = vpow2.f32 %v1012_v22  ;;  %v1139_v1 = vadd.f32 %v4669_v58, %v1138_v38  ;;  %v1018_v22 = vmul.f32 1.442695, %v930_v29 }
 0x25a   : > { %v4667_v59 = vpop.permute.xlu0 %2216  ;;  %7078 = vst [vmem:[#allocation106_spill] sm:$0xff] %v4690_v19  ;;  %v4697_v37 = vpop.eup %3582  ;;  %v807_v54 = vmul.f32 %v4375_v51, %v4480_v14  ;;  %3596 = vpow2.f32 %v1014_v48  ;;  %v1022_v6 = vmul.f32 1.442695, %v932_v49  ;;  %v870_v40 = vadd.f32 %v806_v43, %v591_v23  ;;  %v7086_v49 = vld [vmem:[#allocation52_spill] sm:$0xff] }
 0x25b   : > { %7073 = vst [vmem:[#allocation102_spill] sm:$0xff] %v4667_v59  ;;  %1576 = vperm.xlu1 %3537, %v7061_v7   ;;  %v805_v7 = vmul.f32 %v4375_v51, %v4435_v36  ;;  %7080 = vst [vmem:[#allocation108_spill] sm:$0xff] %v4697_v37  ;;  %v1102_v36 = vadd.f32 %v4664_v11, %v1101_v47  ;;  %v1140_v55 = vadd.f32 %v4683_v8, %v1139_v1  ;;  %v4712_v46 = vpop.eup %3584 }
 0x25c   : > { %v4680_v12 = vpop.permute.xlu1 %754  ;;  %2765 = vperm.xlu0 %3541, %v7076_v27   ;;  %v1020_v47 = vmul.f32 1.442695, %v931_v10  ;;  %7082 = vst [vmem:[#allocation109_spill] sm:$0xff] %v4712_v46  ;;  %3598 = vpow2.f32 %v1016_v42  ;;  %v1024_v10 = vmul.f32 1.442695, %v933_v2  ;;  %v809_v23 = vmul.f32 %v4375_v51, %v4441_v20 }
 0x25d   : > { %v1103_v59 = vadd.f32 %v4675_v63, %v1102_v36  ;;  %v869_v27 = vadd.f32 %v805_v7, %v590_v35  ;;  %v1141_v38 = vadd.f32 %v4697_v37, %v1140_v55  ;;  %v808_v35 = vmul.f32 %v4370_v28, %v4441_v20 }
 0x25e   : > { %v4695_v21 = vpop.permute.xlu0 %2224  ;;  %3600 = vpow2.f32 %v1018_v22  ;;  %v594_v1 = vmul.f32 %v4384_v60, %v4185_v30  ;;  %v936_v42 = vsub.f32 %v870_v40, %v4413_v31 }
 0x25f   : > { %7079 = vst [vmem:[#allocation107_spill] sm:$0xff] %v4695_v21  ;;  %1584 = vperm.xlu1 %3537, %v7062_v25   ;;  %v7081_v21 = vld [vmem:[#allocation49_spill] sm:$0xff]  ;;  %v592_v25 = vmul.f32 %v4384_v60, %v4330_v24  ;;  %v4718_v14 = vpop.eup %3586  ;;  %v1104_v53 = vadd.f32 %v4690_v19, %v1103_v59  ;;  %v934_v24 = vsub.f32 %v868_v15, %v4413_v31  ;;  %3602 = vpow2.f32 %v1020_v47 }
 0x260   : > { %2773 = vperm.xlu0 %3541, %v7081_v21   ;;  %7084 = vst [vmem:[#allocation111_spill] sm:$0xff] %v4718_v14  ;;  %v4725_v7 = vpop.eup %3588  ;;  %v935_v55 = vsub.f32 %v869_v27, %v4413_v31  ;;  %3604 = vpow2.f32 %v1022_v6  ;;  %v810_v15 = vmul.f32 %v4370_v28, %v4515_v3  ;;  %v7090_v27 = vld [vmem:[#allocation73_spill] sm:$0xff]  ;;  %v1142_v20 = vadd.f32 %v4718_v14, %v1141_v38 }
 0x261   : > { %v4710_v11 = vpop.permute.xlu1 %1179  ;;  %7085 = vst [vmem:[#allocation112_spill] sm:$0xff] %v4725_v7  ;;  %v871_v48 = vadd.f32 %v807_v54, %v592_v25  ;;  %v4729_v43 = vpop.eup %3590  ;;  %v1105_v59 = vadd.f32 %v4712_v46, %v1104_v53  ;;  %v595_v2 = vmul.f32 %v4379_v56, %v7090_v27  ;;  %v872_v47 = vadd.f32 %v808_v35, %v4463_v0 }
 0x262   : > { %v4716_v29 = vpop.permute.xlu0 %2232  ;;  %7087 = vst [vmem:[#allocation113_spill] sm:$0xff] %v4729_v43  ;;  %v4737_v36 = vpop.eup %3592  ;;  %v7091_v25 = vmov 0   ;;  %v1026_v6 = vmul.f32 1.442695, %v934_v24  ;;  %3606 = vpow2.f32 %v1024_v10  ;;  %v811_v53 = vmul.f32 %v4375_v51, %v4515_v3  ;;  %v7095_v3 = vld [vmem:[#allocation63_spill] sm:$0xff] }
 0x263   : > { %7083 = vst [vmem:[#allocation110_spill] sm:$0xff] %v4716_v29  ;;  %1592 = vperm.xlu1 %3537, %v7065_v61   ;;  %7088 = vst [vmem:[#allocation114_spill] sm:$0xff] %v4737_v36  ;;  %v1106_v54 = vadd.f32 %v4725_v7, %v1105_v59  ;;  %v4752_v30 = vpop.eup %3594  ;;  %v937_v40 = vsub.f32 %v871_v48, %v4413_v31  ;;  %v1143_v38 = vadd.f32 %v4729_v43, %v1142_v20  ;;  %v7111_v7 = vld [vmem:[#allocation67_spill] sm:$0xff] }
 0x264   : > { %2781 = vperm.xlu0 %3541, %v7086_v49   ;;  %7092 = vst [vmem:[#allocation73_spill] sm:$0xff] %v4752_v30  ;;  %v1028_v0 = vmul.f32 1.442695, %v935_v55  ;;  %v873_v35 = vadd.f32 %v809_v23, %v594_v1  ;;  %v596_v24 = vmul.f32 %v4384_v60, %v7090_v27  ;;  %v1030_v10 = vmul.f32 1.442695, %v936_v42  ;;  %v4773_v23 = vpop.eup %3596  ;;  %v7097_v27 = vld [vmem:[#allocation44_spill] sm:$0xff] }
 0x265   : > { %v4735_v61 = vpop.permute.xlu1 %1183  ;;  %v1107_v59 = vadd.f32 %v4737_v36, %v1106_v54  ;;  %v874_v48 = vadd.f32 %v810_v15, %v595_v2  ;;  %v597_v49 = vmul.f32 %v4379_v56, %v7095_v3  ;;  %v1144_v20 = vadd.f32 %v4752_v30, %v1143_v38  ;;  %7096 = vst [vmem:[#allocation63_spill] sm:$0xff] %v4773_v23  ;;  %v7098_v2 = vld [vmem:[#allocation59_spill] sm:$0xff] }
 0x266   : > { %v4744_v22 = vpop.permute.xlu0 %2240  ;;  %v938_v55 = vsub.f32 %v872_v47, %v4413_v31  ;;  %3608 = vpow2.f32 %v1026_v6  ;;  %v812_v1 = vmul.f32 %v4370_v28, %v4457_v39  ;;  %v1032_v42 = vmul.f32 1.442695, %v937_v40  ;;  %v4779_v54 = vpop.eup %3598  ;;  %v7101_v40 = vld [vmem:[#allocation64_spill] sm:$0xff]  ;;  %v7106_v36 = vld [vmem:[#allocation47_spill] sm:$0xff] }
 0x267   : > { %7089 = vst [vmem:[#allocation115_spill] sm:$0xff] %v4744_v22  ;;  %3538 = vset.pattern.permute.xlu1 %v7091_v25  ;;  %v7093_v22 = vld [vmem:[#allocation55_spill] sm:$0xff]  ;;  %v875_v15 = vadd.f32 %v811_v53, %v596_v24  ;;  %7099 = vst [vmem:[#allocation117_spill] sm:$0xff] %v4779_v54  ;;  %3610 = vpow2.f32 %v1028_v0  ;;  %v939_v38 = vsub.f32 %v873_v35, %v4413_v31  ;;  %v7104_v35 = vld [vmem:[#allocation65_spill] sm:$0xff] }
 0x268   : > { %1963 = vperm.xlu1 %3538, %v7070_v57   ;;  %2789 = vperm.xlu0 %3541, %v7093_v22   ;;  %v598_v22 = vmul.f32 %v4384_v60, %v7095_v3  ;;  %v1108_v3 = vadd.f32 %v4773_v23, %v1107_v59  ;;  %v813_v47 = vmul.f32 %v4375_v51, %v4457_v39  ;;  %3612 = vpow2.f32 %v1030_v10  ;;  %v7107_v57 = vld [vmem:[#allocation62_spill] sm:$0xff] }
 0x269   : > { %v4761_v25 = vpop.permute.xlu1 %1191  ;;  %v599_v53 = vmul.f32 %v4379_v56, %v7101_v40  ;;  %v940_v24 = vsub.f32 %v874_v48, %v4413_v31  ;;  %v814_v0 = vmul.f32 %v4370_v28, %v4545_v26  ;;  %v600_v39 = vmul.f32 %v4384_v60, %v7101_v40 }
 0x26a   : > { %v4765_v29 = vpop.permute.xlu0 %2248  ;;  %v1145_v21 = vadd.f32 %v4779_v54, %v1144_v20  ;;  %v1034_v23 = vmul.f32 1.442695, %v938_v55  ;;  %v876_v10 = vadd.f32 %v812_v1, %v597_v49  ;;  %3614 = vpow2.f32 %v1032_v42  ;;  %v7109_v1 = vld [vmem:[#allocation66_spill] sm:$0xff] }
 0x26b   : > { %7094 = vst [vmem:[#allocation116_spill] sm:$0xff] %v4765_v29  ;;  %v4787_v29 = vpop.eup %3600  ;;  %v941_v48 = vsub.f32 %v875_v15, %v4413_v31  ;;  %v602_v40 = vmul.f32 %v4384_v60, %v7104_v35  ;;  %v1036_v20 = vmul.f32 1.442695, %v939_v38  ;;  %v877_v55 = vadd.f32 %v813_v47, %v598_v22 }
 0x26c   : > { %1973 = vperm.xlu1 %3538, %v7097_v27   ;;  %2797 = vperm.xlu0 %3541, %v7098_v2   ;;  %7100 = vst [vmem:[#allocation118_spill] sm:$0xff] %v4787_v29  ;;  %v4796_v59 = vpop.eup %3602  ;;  %v601_v2 = vmul.f32 %v4379_v56, %v7104_v35  ;;  %v1109_v43 = vadd.f32 %v4787_v29, %v1108_v3  ;;  %v1038_v15 = vmul.f32 1.442695, %v940_v24  ;;  %3616 = vpow2.f32 %v1034_v23  ;;  %v7112_v24 = vld [vmem:[#allocation50_spill] sm:$0xff] }
 0x26d   : > { %v4785_v6 = vpop.permute.xlu1 %1199  ;;  %7103 = vst [vmem:[#allocation119_spill] sm:$0xff] %v4796_v59  ;;  %v4803_v30 = vpop.eup %3604  ;;  %v603_v42 = vmul.f32 %v4379_v56, %v7109_v1  ;;  %v4825_v35 = vmul.f32 %v4379_v56, %v7111_v7  ;;  %v1146_v22 = vadd.f32 %v4796_v59, %v1145_v21  ;;  %v816_v38 = vmul.f32 %v4370_v28, %v4499_v32  ;;  %v7122_v59 = vld [vmem:[#allocation71_spill] sm:$0xff] }
 0x26e   : > { %v4794_v27 = vpop.permute.xlu0 %2256  ;;  %7105 = vst [vmem:[#allocation65_spill] sm:$0xff] %v4803_v30  ;;  %v4815_v49 = vpop.eup %3606  ;;  %v1110_v3 = vadd.f32 %v4803_v30, %v1109_v43  ;;  %v942_v47 = vsub.f32 %v876_v10, %v4413_v31  ;;  %v1040_v29 = vmul.f32 1.442695, %v941_v48  ;;  %3618 = vpow2.f32 %v1036_v20  ;;  %v7118_v20 = vld [vmem:[#allocation69_spill] sm:$0xff] }
 0x26f   : > { %7102 = vst [vmem:[#allocation64_spill] sm:$0xff] %v4794_v27  ;;  %v815_v27 = vmul.f32 %v4375_v51, %v4545_v26  ;;  %7108 = vst [vmem:[#allocation120_spill] sm:$0xff] %v4815_v49  ;;  %v604_v26 = vmul.f32 %v4384_v60, %v7109_v1  ;;  %v817_v21 = vmul.f32 %v4375_v51, %v4499_v32  ;;  %3620 = vpow2.f32 %v1038_v15 }
 0x270   : > { %1983 = vperm.xlu1 %3538, %v7106_v36   ;;  %2805 = vperm.xlu0 %3541, %v7107_v57   ;;  %v878_v36 = vadd.f32 %v814_v0, %v599_v53  ;;  %v7113_v53 = vld [vmem:[#allocation21_spill] sm:$0xff]  ;;  %v1147_v0 = vadd.f32 %v4815_v49, %v1146_v22  ;;  %v4840_v30 = vpop.eup %3608  ;;  %v606_v23 = vmul.f32 %v4384_v60, %v7111_v7  ;;  %3622 = vpow2.f32 %v1040_v29  ;;  %v7121_v49 = vld [vmem:[#allocation26_spill] sm:$0xff] }
 0x271   : > { %v4813_v54 = vpop.permute.xlu1 %1207  ;;  %v879_v1 = vadd.f32 %v815_v27, %v600_v39  ;;  %7115 = vst [vmem:[#allocation121_spill] sm:$0xff] %v4840_v30  ;;  %v818_v39 = vmul.f32 %v4370_v28, %v4571_v62  ;;  %v4849_v48 = vpop.eup %3610  ;;  %v4853_v32 = vmul.f32 %v4379_v56, %v7118_v20  ;;  %v1111_v7 = vadd.f32 %v4840_v30, %v1110_v3 }
 0x272   : > { %v4821_v57 = vpop.permute.xlu0 %2264  ;;  %v944_v27 = vsub.f32 %v878_v36, %v4413_v31  ;;  %7117 = vst [vmem:[#allocation123_spill] sm:$0xff] %v4849_v48  ;;  %v880_v15 = vadd.f32 %v816_v38, %v601_v2  ;;  %v4860_v22 = vpop.eup %3612  ;;  %v1042_v36 = vmul.f32 1.442695, %v942_v47  ;;  %v1148_v2 = vadd.f32 %v4849_v48, %v1147_v0 }
 0x273   : > { %7110 = vst [vmem:[#allocation66_spill] sm:$0xff] %v4821_v57  ;;  %v943_v57 = vsub.f32 %v877_v55, %v4413_v31  ;;  %v4857_v55 = vmul.f32 %v4384_v60, %v7118_v20  ;;  %7119 = vst [vmem:[#allocation69_spill] sm:$0xff] %v4860_v22  ;;  %v4869_v20 = vmul.f32 %v4379_v56, %v7122_v59 }
 0x274   : > { %1993 = vperm.xlu1 %3538, %v7112_v24   ;;  %2813 = vperm.xlu0 %3541, %v7113_v53   ;;  %v945_v24 = vsub.f32 %v879_v1, %v4413_v31  ;;  %v7120_v53 = vld [vmem:[#allocation54_spill] sm:$0xff]  ;;  %v881_v3 = vadd.f32 %v817_v21, %v602_v40  ;;  %v4874_v29 = vpop.eup %3614  ;;  %v4878_v47 = vmul.f32 %v4384_v60, %v7122_v59  ;;  %v7127_v21 = vld [vmem:[#allocation68_spill] sm:$0xff]  ;;  %3624 = vpow2.f32 %v1042_v36 }
 0x275   : > { %v4838_v43 = vpop.permute.xlu1 %1215  ;;  %7124 = vst [vmem:[#allocation124_spill] sm:$0xff] %v4874_v29  ;;  %v1112_v40 = vadd.f32 %v4860_v22, %v1111_v7  ;;  %v946_v0 = vsub.f32 %v880_v15, %v4413_v31  ;;  %v820_v59 = vmul.f32 %v4370_v28, %v7127_v21  ;;  %v821_v48 = vmul.f32 %v4375_v51, %v7127_v21  ;;  %v7130_v15 = vld [vmem:[#allocation31_spill] sm:$0xff] }
 0x276   : > { %7114 = vst [vmem:[#allocation67_spill] sm:$0xff] %v4838_v43  ;;  %v4847_v10 = vpop.permute.xlu0 %2272  ;;  %v1044_v43 = vmul.f32 1.442695, %v943_v57  ;;  %v947_v7 = vsub.f32 %v881_v3, %v4413_v31  ;;  %v4904_v36 = vpop.eup %3616  ;;  %v7135_v3 = vld [vmem:[#allocation78_spill] sm:$0xff]  ;;  %v829_v46 = vmul.f32 %v4375_v51, %v4580_v5 }
 0x277   : > { %7116 = vst [vmem:[#allocation122_spill] sm:$0xff] %v4847_v10  ;;  %v819_v10 = vmul.f32 %v4375_v51, %v4571_v62  ;;  %v7125_v62 = vld [vmem:[#allocation74_spill] sm:$0xff]  ;;  %v4917_v21 = vmul.f32 %v4379_v56, %v7135_v3  ;;  %v4929_v14 = vmul.f32 %v4384_v60, %v7135_v3 }
 0x278   : > { %2003 = vperm.xlu1 %3538, %v7120_v53   ;;  %2821 = vperm.xlu0 %3541, %v7121_v49   ;;  %v4882_v1 = vmul.f32 %v4379_v56, %v7125_v62  ;;  %v1046_v53 = vmul.f32 1.442695, %v944_v27  ;;  %v882_v49 = vadd.f32 %v818_v39, %v603_v42  ;;  %v4888_v57 = vmul.f32 %v4384_v60, %v7125_v62  ;;  %v7128_v42 = vld [vmem:[#allocation57_spill] sm:$0xff]  ;;  %v7129_v39 = vld [vmem:[#allocation76_spill] sm:$0xff] }
 0x279   : > { %v4872_v38 = vpop.permute.xlu1 %1223  ;;  %v883_v27 = vadd.f32 %v819_v10, %v604_v26  ;;  %3626 = vpow2.f32 %v1044_v43  ;;  %v1149_v62 = vadd.f32 %v4874_v29, %v1148_v2  ;;  %7132 = vst [vmem:[#allocation76_spill] sm:$0xff] %v4904_v36  ;;  %v822_v10 = vmul.f32 %v4370_v28, %v4589_v44  ;;  %v4913_v2 = vpop.eup %3618 }
 0x27a   : > { %7123 = vst [vmem:[#allocation71_spill] sm:$0xff] %v4872_v38  ;;  %v4884_v30 = vpop.permute.xlu0 %2280  ;;  %v1048_v38 = vmul.f32 1.442695, %v945_v24  ;;  %v614_v24 = vmul.f32 %v4384_v60, %v7129_v39  ;;  %3628 = vpow2.f32 %v1046_v53  ;;  %v948_v26 = vsub.f32 %v882_v49, %v4413_v31  ;;  %7134 = vst [vmem:[#allocation126_spill] sm:$0xff] %v4913_v2 }
 0x27b   : > { %7126 = vst [vmem:[#allocation74_spill] sm:$0xff] %v4884_v30  ;;  %v613_v30 = vmul.f32 %v4379_v56, %v7129_v39  ;;  %v884_v29 = vadd.f32 %v820_v59, %v4825_v35  ;;  %v4921_v39 = vpop.eup %3620  ;;  %v885_v53 = vadd.f32 %v821_v48, %v606_v23  ;;  %v949_v49 = vsub.f32 %v883_v27, %v4413_v31  ;;  %v7137_v59 = vld [vmem:[#allocation36_spill] sm:$0xff] }
 0x27c   : > { %2013 = vperm.xlu1 %3538, %v7128_v42   ;;  %2829 = vperm.xlu0 %3541, %v7130_v15   ;;  %v1050_v42 = vmul.f32 1.442695, %v946_v0  ;;  %v1113_v15 = vadd.f32 %v4904_v36, %v1112_v40  ;;  %3630 = vpow2.f32 %v1048_v38  ;;  %v1052_v0 = vmul.f32 1.442695, %v947_v7  ;;  %v4937_v48 = vpop.eup %3622  ;;  %v7140_v38 = vld [vmem:[#allocation81_spill] sm:$0xff] }
 0x27d   : > { %v4902_v22 = vpop.permute.xlu1 %1231  ;;  %v1150_v40 = vadd.f32 %v4913_v2, %v1149_v62  ;;  %v824_v35 = vmul.f32 %v4370_v28, %v4560_v33  ;;  %7139 = vst [vmem:[#allocation127_spill] sm:$0xff] %v4937_v48  ;;  %v825_v27 = vmul.f32 %v4375_v51, %v4560_v33  ;;  %v1054_v3 = vmul.f32 1.442695, %v948_v26  ;;  %v7142_v26 = vld [vmem:[#allocation72_spill] sm:$0xff] }
 0x27e   : > { %7131 = vst [vmem:[#allocation68_spill] sm:$0xff] %v4902_v22  ;;  %v4911_v43 = vpop.permute.xlu0 %2288  ;;  %v7136_v22 = vld [vmem:[#allocation60_spill] sm:$0xff]  ;;  %v886_v7 = vadd.f32 %v822_v10, %v4853_v32  ;;  %3632 = vpow2.f32 %v1050_v42  ;;  %v1114_v62 = vadd.f32 %v4921_v39, %v1113_v15  ;;  %v828_v2 = vmul.f32 %v4370_v28, %v4580_v5  ;;  %v7143_v15 = vld [vmem:[#allocation41_spill] sm:$0xff] }
 0x27f   : > { %7133 = vst [vmem:[#allocation125_spill] sm:$0xff] %v4911_v43  ;;  %v823_v43 = vmul.f32 %v4375_v51, %v4589_v44  ;;  %v617_v44 = vmul.f32 %v4379_v56, %v7140_v38  ;;  %v951_v36 = vsub.f32 %v885_v53, %v4413_v31  ;;  %3634 = vpow2.f32 %v1052_v0  ;;  %v4962_v53 = vpop.eup %3624 }
 0x280   : > { %2023 = vperm.xlu1 %3538, %v7136_v22   ;;  %2837 = vperm.xlu0 %3541, %v7137_v59   ;;  %v950_v59 = vsub.f32 %v884_v29, %v4413_v31  ;;  %v1151_v32 = vadd.f32 %v4937_v48, %v1150_v40  ;;  %v888_v42 = vadd.f32 %v824_v35, %v4869_v20  ;;  %3636 = vpow2.f32 %v1054_v3 }
 0x281   : > { %v4935_v23 = vpop.permute.xlu1 %1239  ;;  %v887_v33 = vadd.f32 %v823_v43, %v4857_v55  ;;  %v832_v29 = vmul.f32 %v4370_v28, %v4595_v45  ;;  %7144 = vst [vmem:[#allocation128_spill] sm:$0xff] %v4962_v53  ;;  %v889_v5 = vadd.f32 %v825_v27, %v4878_v47  ;;  %v952_v55 = vsub.f32 %v886_v7, %v4413_v31  ;;  %v7148_v7 = vld [vmem:[#allocation23_spill] sm:$0xff] }
 0x282   : > { %7138 = vst [vmem:[#allocation78_spill] sm:$0xff] %v4935_v23  ;;  %v4944_v22 = vpop.permute.xlu0 %2296  ;;  %v1056_v23 = vmul.f32 1.442695, %v949_v49  ;;  %v826_v43 = vmul.f32 %v4370_v28, %v4603_v9  ;;  %v1058_v0 = vmul.f32 1.442695, %v950_v59  ;;  %v1115_v40 = vadd.f32 %v4962_v53, %v1114_v62 }
 0x283   : > { %7141 = vst [vmem:[#allocation81_spill] sm:$0xff] %v4944_v22  ;;  %v4970_v20 = vpop.eup %3626  ;;  %v892_v35 = vadd.f32 %v828_v2, %v613_v30  ;;  %v1060_v47 = vmul.f32 1.442695, %v951_v36  ;;  %v893_v27 = vadd.f32 %v829_v46, %v614_v24  ;;  %v953_v3 = vsub.f32 %v887_v33, %v4413_v31 }
 0x284   : > { %2033 = vperm.xlu1 %3538, %v7142_v26   ;;  %2845 = vperm.xlu0 %3541, %v7143_v15   ;;  %7146 = vst [vmem:[#allocation130_spill] sm:$0xff] %v4970_v20  ;;  %v827_v26 = vmul.f32 %v4375_v51, %v4603_v9  ;;  %v4975_v22 = vpop.eup %3628  ;;  %3638 = vpow2.f32 %v1056_v23  ;;  %v1152_v59 = vadd.f32 %v4970_v20, %v1151_v32  ;;  %v7149_v2 = vmov 3  }
 0x285   : > { %v4960_v10 = vpop.permute.xlu1 %1247  ;;  %7147 = vst [vmem:[#allocation131_spill] sm:$0xff] %v4975_v22  ;;  %v954_v62 = vsub.f32 %v888_v42, %v4413_v31  ;;  %v896_v30 = vadd.f32 %v832_v29, %v617_v44  ;;  %v955_v46 = vsub.f32 %v889_v5, %v4413_v31  ;;  %v1062_v36 = vmul.f32 1.442695, %v952_v55  ;;  %v7153_v29 = vld [vmem:[#allocation83_spill] sm:$0xff] }
 0x286   : > { %v4968_v49 = vpop.permute.xlu0 %2304  ;;  %v4986_v15 = vpop.eup %3630  ;;  %v833_v24 = vmul.f32 %v4375_v51, %v4595_v45  ;;  %v890_v23 = vadd.f32 %v826_v43, %v4882_v1  ;;  %3640 = vpow2.f32 %v1058_v0  ;;  %v1116_v44 = vadd.f32 %v4975_v22, %v1115_v40  ;;  %v7154_v1 = vld [vmem:[#allocation28_spill] sm:$0xff] }
 0x287   : > { %7145 = vst [vmem:[#allocation129_spill] sm:$0xff] %v4968_v49  ;;  %v618_v49 = vmul.f32 %v4384_v60, %v7140_v38  ;;  %7150 = vst [vmem:[#allocation132_spill] sm:$0xff] %v4986_v15  ;;  %v7151_v38 = vld [vmem:[#allocation11_spill] sm:$0xff]  ;;  %v958_v32 = vsub.f32 %v892_v35, %v4413_v31  ;;  %v891_v42 = vadd.f32 %v827_v26, %v4888_v57  ;;  %3642 = vpow2.f32 %v1060_v47 }
 0x288   : > { %2043 = vperm.xlu1 %3538, %v7148_v7   ;;  %3543 = vset.pattern.permute.xlu0 %v7149_v2  ;;  %v5000_v5 = vmul.f32 %v4379_v56, %v7153_v29  ;;  %v959_v45 = vsub.f32 %v893_v27, %v4413_v31  ;;  %v1064_v55 = vmul.f32 1.442695, %v953_v3  ;;  %v5004_v43 = vpop.eup %3632  ;;  %v1153_v0 = vadd.f32 %v4986_v15, %v1152_v59  ;;  %v7157_v3 = vld [vmem:[#allocation12_spill] sm:$0xff] }
 0x289   : > { %v4984_v9 = vpop.permute.xlu1 %1255  ;;  %1472 = vperm.xlu0 %3543, %v7151_v38   ;;  %7155 = vst [vmem:[#allocation83_spill] sm:$0xff] %v5004_v43  ;;  %v1066_v38 = vmul.f32 1.442695, %v954_v62  ;;  %v962_v40 = vsub.f32 %v896_v30, %v4413_v31  ;;  %v830_v57 = vmul.f32 %v4370_v28, %v4628_v4  ;;  %v1068_v35 = vmul.f32 1.442695, %v955_v46  ;;  %v7161_v46 = vld [vmem:[#allocation85_spill] sm:$0xff] }
 0x28a   : > { %v4993_v33 = vpop.permute.xlu0 %2312  ;;  %3644 = vpow2.f32 %v1062_v36  ;;  %v897_v47 = vadd.f32 %v833_v24, %v618_v49  ;;  %v956_v27 = vsub.f32 %v890_v23, %v4413_v31  ;;  %v1117_v59 = vadd.f32 %v5004_v43, %v1116_v44  ;;  %v7162_v23 = vld [vmem:[#allocation33_spill] sm:$0xff] }
 0x28b   : > { %7152 = vst [vmem:[#allocation11_spill] sm:$0xff] %v4993_v33  ;;  %v1074_v62 = vmul.f32 1.442695, %v958_v32  ;;  %v957_v30 = vsub.f32 %v891_v42, %v4413_v31  ;;  %v831_v7 = vmul.f32 %v4375_v51, %v4628_v4  ;;  %v5026_v49 = vmul.f32 %v4384_v60, %v7153_v29 }
 0x28c   : > { %2053 = vperm.xlu1 %3538, %v7154_v1   ;;  %v5016_v1 = vpop.eup %3634  ;;  %v621_v36 = vmul.f32 %v4379_v56, %v7161_v46  ;;  %v1076_v24 = vmul.f32 1.442695, %v959_v45  ;;  %3646 = vpow2.f32 %v1064_v55  ;;  %v1082_v32 = vmul.f32 1.442695, %v962_v40  ;;  %v7164_v55 = vld [vmem:[#allocation13_spill] sm:$0xff] }
 0x28d   : > { %v5010_v26 = vpop.permute.xlu1 %1263  ;;  %1484 = vperm.xlu0 %3543, %v7157_v3   ;;  %7159 = vst [vmem:[#allocation134_spill] sm:$0xff] %v5016_v1  ;;  %v5022_v33 = vpop.eup %3636  ;;  %3648 = vpow2.f32 %v1066_v38  ;;  %v1154_v44 = vadd.f32 %v5016_v1, %v1153_v0  ;;  %v894_v42 = vadd.f32 %v830_v57, %v4917_v21  ;;  %v963_v29 = vsub.f32 %v897_v47, %v4413_v31  ;;  %v7166_v57 = vld [vmem:[#allocation88_spill] sm:$0xff] }
 0x28e   : > { %7156 = vst [vmem:[#allocation133_spill] sm:$0xff] %v5010_v26  ;;  %v5014_v2 = vpop.permute.xlu0 %2320  ;;  %7160 = vst [vmem:[#allocation135_spill] sm:$0xff] %v5022_v33  ;;  %v5035_v3 = vpop.eup %3638  ;;  %3650 = vpow2.f32 %v1068_v35  ;;  %v836_v45 = vmul.f32 %v4370_v28, %v4615_v16  ;;  %v1118_v0 = vadd.f32 %v5022_v33, %v1117_v59  ;;  %v1072_v38 = vmul.f32 1.442695, %v957_v30 }
 0x28f   : > { %7158 = vst [vmem:[#allocation12_spill] sm:$0xff] %v5014_v2  ;;  %v1070_v2 = vmul.f32 1.442695, %v956_v27  ;;  %3652 = vpow2.f32 %v1074_v62  ;;  %v895_v21 = vadd.f32 %v831_v7, %v4929_v14  ;;  %v622_v40 = vmul.f32 %v4384_v60, %v7161_v46  ;;  %v7167_v27 = vld [vmem:[#allocation38_spill] sm:$0xff] }
 0x290   : > { %2063 = vperm.xlu1 %3538, %v7162_v23   ;;  %v5049_v35 = vmul.f32 %v4379_v56, %v7166_v57  ;;  %3654 = vpow2.f32 %v1076_v24  ;;  %v837_v47 = vmul.f32 %v4375_v51, %v4615_v16  ;;  %v1155_v59 = vadd.f32 %v5035_v3, %v1154_v44  ;;  %v7171_v24 = vld [vmem:[#allocation14_spill] sm:$0xff] }
 0x291   : > { %v5033_v4 = vpop.permute.xlu1 %1271  ;;  %1492 = vperm.xlu0 %3543, %v7164_v55   ;;  %v5054_v55 = vpop.eup %3640  ;;  %3656 = vpow2.f32 %v1082_v32  ;;  %v960_v14 = vsub.f32 %v894_v42, %v4413_v31  ;;  %v834_v7 = vmul.f32 %v4370_v28, %v4655_v17  ;;  %v5066_v30 = vmul.f32 %v4384_v60, %v7166_v57  ;;  %v7172_v60 = vld [vmem:[#allocation96_spill] sm:$0xff] }
 0x292   : > { %7163 = vst [vmem:[#allocation85_spill] sm:$0xff] %v5033_v4  ;;  %v5041_v23 = vpop.permute.xlu0 %2328  ;;  %7168 = vst [vmem:[#allocation88_spill] sm:$0xff] %v5054_v55  ;;  %v5062_v56 = vpop.eup %3642  ;;  %v1084_v16 = vmul.f32 1.442695, %v963_v29  ;;  %3658 = vpow2.f32 %v1070_v2  ;;  %v5068_v46 = vadd.f32 %v836_v45, %v621_v36  ;;  %v1119_v44 = vadd.f32 %v5054_v55, %v1118_v0  ;;  %v7173_v2 = vld [vmem:[#allocation97_spill] sm:$0xff]  ;;  %v7174_v29 = vld [vmem:[#allocation98_spill] sm:$0xff] }
 0x293   : > { %7165 = vst [vmem:[#allocation13_spill] sm:$0xff] %v5041_v23  ;;  %7170 = vst [vmem:[#allocation137_spill] sm:$0xff] %v5062_v56  ;;  %3660 = vpow2.f32 %v1072_v38  ;;  %v961_v32 = vsub.f32 %v895_v21, %v4413_v31  ;;  %v835_v42 = vmul.f32 %v4375_v51, %v4655_v17  ;;  %v1304_v57 = vmul.f32 %v7172_v60, %v4710_v11  ;;  %v7176_v0 = vld [vmem:[#allocation43_spill] sm:$0xff] }
 0x294   : > { %2073 = vperm.xlu1 %3538, %v7167_v27   ;;  %v5075_v27 = vpop.eup %3644  ;;  %v1305_v36 = vmul.f32 %v7173_v2, %v4710_v11  ;;  %v1156_v38 = vadd.f32 %v5062_v56, %v1155_v59  ;;  %v5085_v21 = vadd.f32 %v837_v47, %v622_v40  ;;  %v1078_v17 = vmul.f32 1.442695, %v960_v14 }
 0x295   : > { %v5060_v62 = vpop.permute.xlu1 %1279  ;;  %1500 = vperm.xlu0 %3543, %v7171_v24   ;;  %v7175_v24 = vld [vmem:[#allocation99_spill] sm:$0xff]  ;;  %v898_v4 = vadd.f32 %v834_v7, %v5000_v5  ;;  %v1306_v11 = vmul.f32 %v4609_v13, %v4735_v61  ;;  %v1307_v2 = vmul.f32 %v4623_v41, %v4735_v61  ;;  %v1120_v40 = vadd.f32 %v5075_v27, %v1119_v44 }
 0x296   : > { %7169 = vst [vmem:[#allocation136_spill] sm:$0xff] %v5060_v62  ;;  %v5090_v26 = vpop.eup %3646  ;;  %3662 = vpow2.f32 %v1084_v16  ;;  %v1080_v5 = vmul.f32 1.442695, %v961_v32  ;;  %v899_v47 = vadd.f32 %v835_v42, %v5026_v49  ;;  %v838_v49 = vmul.f32 %v4370_v28, %v4680_v12 }
 0x297   : > { %v1176_v23 = vpop.permute.xlu0 %1175  ;;  %v5097_v59 = vpop.eup %3648  ;;  %v1157_v44 = vadd.f32 %v5090_v26, %v1156_v38  ;;  %3664 = vpow2.f32 %v1078_v17  ;;  %v964_v16 = vsub.f32 %v898_v4, %v4413_v31  ;;  %v839_v17 = vmul.f32 %v4375_v51, %v4680_v12 }
 0x298   : > { %v1302_v45 = vmul.f32 %v7174_v29, %v1176_v23  ;;  %v1303_v62 = vmul.f32 %v7175_v24, %v1176_v23  ;;  %2083 = vperm.xlu1 %3538, %v7176_v0   ;;  %v7177_v24 = vld [vmem:[#allocation15_spill] sm:$0xff]  ;;  %7178 = vst [vmem:[#allocation14_spill] sm:$0xff] %v5097_v59  ;;  %v5101_v7 = vpop.eup %3650  ;;  %v1121_v4 = vadd.f32 %v5097_v59, %v1120_v40  ;;  %3666 = vpow2.f32 %v1080_v5 }
 0x299   : > { %v5088_v55 = vpop.permute.xlu1 %1287  ;;  %1508 = vperm.xlu0 %3543, %v7177_v24   ;;  %7179 = vst [vmem:[#allocation15_spill] sm:$0xff] %v5101_v7  ;;  %v965_v28 = vsub.f32 %v899_v47, %v4413_v31  ;;  %v1158_v5 = vadd.f32 %v5101_v7, %v1157_v44  ;;  %v966_v47 = vsub.f32 %v5068_v46, %v4413_v31  ;;  %v1086_v51 = vmul.f32 1.442695, %v964_v16 }
 0x29a   : > { %v1366_v23 = vadd.f32 %v1304_v57, %v1302_v45  ;;  %v1403_v60 = vadd.f32 %v1305_v36, %v1303_v62  ;;  %v7180_v57 = vld [vmem:[#allocation48_spill] sm:$0xff]  ;;  %v5106_v36 = vpop.eup %3652  ;;  %v1310_v45 = vmul.f32 %v4651_v34, %v4761_v25  ;;  %v902_v12 = vadd.f32 %v838_v49, %v5049_v35 }
 0x29b   : > { %v1188_v14 = vpop.permute.xlu0 %1187  ;;  %7181 = vst [vmem:[#allocation138_spill] sm:$0xff] %v5106_v36  ;;  %v5114_v42 = vpop.eup %3654  ;;  %v967_v35 = vsub.f32 %v5085_v21, %v4413_v31  ;;  %v1088_v44 = vmul.f32 1.442695, %v965_v28  ;;  %v903_v16 = vadd.f32 %v839_v17, %v5066_v30  ;;  %3668 = vpow2.f32 %v1086_v51  ;;  %v7190_v30 = vld [vmem:[#allocation109_spill] sm:$0xff]  ;;  %v7191_v17 = vld [vmem:[#allocation111_spill] sm:$0xff] }
 0x29c   : > { %v1308_v13 = vmul.f32 %v4631_v50, %v1188_v14  ;;  %v1309_v29 = vmul.f32 %v4643_v18, %v1188_v14  ;;  %v1367_v61 = vadd.f32 %v1366_v23, %v1306_v11  ;;  %v1404_v62 = vadd.f32 %v1403_v60, %v1307_v2  ;;  %2093 = vperm.xlu1 %3538, %v7180_v57   ;;  %v7183_v11 = vld [vmem:[#allocation16_spill] sm:$0xff]  ;;  %v5121_v38 = vpop.eup %3656  ;;  %v7203_v57 = vld [vmem:[#allocation117_spill] sm:$0xff] }
 0x29d   : > { %v5112_v32 = vpop.permute.xlu1 %1295  ;;  %7182 = vst [vmem:[#allocation139_spill] sm:$0xff] %v5114_v42  ;;  %v1311_v60 = vmul.f32 %v4658_v52, %v4761_v25  ;;  %1516 = vperm.xlu0 %3543, %v7183_v11   ;;  %7184 = vst [vmem:[#allocation16_spill] sm:$0xff] %v5121_v38  ;;  %v5128_v14 = vpop.eup %3658  ;;  %v7185_v25 = vld [vmem:[#allocation101_spill] sm:$0xff]  ;;  %v968_v21 = vsub.f32 %v902_v12, %v4413_v31  ;;  %v1318_v28 = vmul.f32 %v7190_v30, %v4813_v54  ;;  %v7193_v30 = vld [vmem:[#allocation112_spill] sm:$0xff] }
 0x29e   : > { %v1368_v2 = vadd.f32 %v1367_v61, %v1308_v13  ;;  %v1405_v24 = vadd.f32 %v1404_v62, %v1309_v29  ;;  %v7186_v11 = vld [vmem:[#allocation53_spill] sm:$0xff]  ;;  %v5133_v40 = vpop.eup %3660  ;;  %v1122_v46 = vadd.f32 %v5128_v14, %v1121_v4  ;;  %3670 = vpow2.f32 %v1088_v44  ;;  %v7197_v44 = vld [vmem:[#allocation67_spill] sm:$0xff] }
 0x29f   : > { %v1196_v23 = vpop.permute.xlu0 %1195  ;;  %v1159_v4 = vadd.f32 %v5133_v40, %v1158_v5  ;;  %v969_v12 = vsub.f32 %v903_v16, %v4413_v31  ;;  %v1094_v31 = vmul.f32 1.442695, %v968_v21 }
 0x2a0   : > { %v1312_v13 = vmul.f32 %v7185_v25, %v1196_v23  ;;  %v1313_v29 = vmul.f32 %v4669_v58, %v1196_v23  ;;  %v1369_v61 = vadd.f32 %v1368_v2, %v1310_v45  ;;  %v1406_v62 = vadd.f32 %v1405_v24, %v1311_v60  ;;  %2103 = vperm.xlu1 %3538, %v7186_v11   ;;  %v7187_v24 = vld [vmem:[#allocation17_spill] sm:$0xff] }
 0x2a1   : > { %v1314_v23 = vmul.f32 %v4675_v63, %v4785_v6  ;;  %v1315_v45 = vmul.f32 %v4683_v8, %v4785_v6  ;;  %1524 = vperm.xlu0 %3543, %v7187_v24   ;;  %v1090_v24 = vmul.f32 1.442695, %v966_v47  ;;  %v1092_v47 = vmul.f32 1.442695, %v967_v35  ;;  %v7196_v35 = vld [vmem:[#allocation40_spill] sm:$0xff]  ;;  %v7219_v25 = vld [vmem:[#allocation69_spill] sm:$0xff] }
 0x2a2   : > { %v1370_v60 = vadd.f32 %v1369_v61, %v1312_v13  ;;  %v1407_v2 = vadd.f32 %v1406_v62, %v1313_v29  ;;  %v5146_v52 = vpop.permute.xlu1 %1468  ;;  %v7188_v61 = vld [vmem:[#allocation58_spill] sm:$0xff]  ;;  %v5156_v62 = vpop.eup %3662  ;;  %v1123_v51 = vadd.f32 %v5106_v36, %v1122_v46  ;;  %v1160_v46 = vadd.f32 %v5114_v42, %v1159_v4 }
 0x2a3   : > { %v1204_v49 = vpop.permute.xlu0 %1203  ;;  %7189 = vst [vmem:[#allocation17_spill] sm:$0xff] %v5156_v62  ;;  %v5171_v5 = vpop.eup %3664  ;;  %3672 = vpow2.f32 %v1090_v24  ;;  %v1096_v24 = vmul.f32 1.442695, %v969_v12  ;;  %v7207_v12 = vld [vmem:[#allocation119_spill] sm:$0xff] }
 0x2a4   : > { %v1316_v63 = vmul.f32 %v4690_v19, %v1204_v49  ;;  %v1317_v6 = vmul.f32 %v4697_v37, %v1204_v49  ;;  %v1371_v13 = vadd.f32 %v1370_v60, %v1314_v23  ;;  %v1408_v29 = vadd.f32 %v1407_v2, %v1315_v45  ;;  %2113 = vperm.xlu1 %3538, %v7188_v61   ;;  %v7192_v2 = vld [vmem:[#allocation18_spill] sm:$0xff]  ;;  %v7194_v61 = vld [vmem:[#allocation113_spill] sm:$0xff] }
 0x2a5   : > { %v1319_v23 = vmul.f32 %v7191_v17, %v4813_v54  ;;  %1532 = vperm.xlu0 %3543, %v7192_v2   ;;  %v7200_v2 = vld [vmem:[#allocation19_spill] sm:$0xff]  ;;  %3674 = vpow2.f32 %v1092_v47  ;;  %v1124_v4 = vadd.f32 %v5171_v5, %v1123_v51  ;;  %v7214_v19 = vld [vmem:[#allocation121_spill] sm:$0xff] }
 0x2a6   : > { %v1372_v45 = vadd.f32 %v1371_v13, %v1316_v63  ;;  %v1409_v60 = vadd.f32 %v1408_v29, %v1317_v6  ;;  %v5169_v49 = vpop.permute.xlu1 %1476  ;;  %v7195_v6 = vmov 1   ;;  %v5178_v29 = vpop.eup %3666  ;;  %v7202_v17 = vld [vmem:[#allocation63_spill] sm:$0xff]  ;;  %3676 = vpow2.f32 %v1094_v31 }
 0x2a7   : > { %v1212_v8 = vpop.permute.xlu0 %1211  ;;  %v7205_v47 = vld [vmem:[#allocation71_spill] sm:$0xff]  ;;  %3678 = vpow2.f32 %v1096_v24  ;;  %v1125_v31 = vadd.f32 %v5121_v38, %v1124_v4  ;;  %v7213_v24 = vld [vmem:[#allocation68_spill] sm:$0xff] }
 0x2a8   : > { %v1320_v34 = vmul.f32 %v7193_v30, %v1212_v8  ;;  %v1321_v54 = vmul.f32 %v7194_v61, %v1212_v8  ;;  %v1373_v63 = vadd.f32 %v1372_v45, %v1318_v28  ;;  %v1410_v13 = vadd.f32 %v1409_v60, %v1319_v23  ;;  %3540 = vset.pattern.permute.xlu1 %v7195_v6  ;;  %v7198_v8 = vld [vmem:[#allocation114_spill] sm:$0xff]  ;;  %v7199_v28 = vld [vmem:[#allocation73_spill] sm:$0xff] }
 0x2a9   : > { %2208 = vperm.xlu1 %3540, %v7196_v35   ;;  %v1322_v16 = vmul.f32 %v7198_v8, %v7197_v44  ;;  %v1323_v23 = vmul.f32 %v7199_v28, %v7197_v44  ;;  %1540 = vperm.xlu0 %3543, %v7200_v2   ;;  %v1327_v44 = vmul.f32 %v7207_v12, %v7205_v47 }
 0x2aa   : > { %v1374_v45 = vadd.f32 %v1373_v63, %v1320_v34  ;;  %v1411_v60 = vadd.f32 %v1410_v13, %v1321_v54  ;;  %v5193_v6 = vpop.permute.xlu1 %1480  ;;  %v1791_v34 = vstv %s5158_s9  ;;  %v1161_v54 = vadd.f32 %v5178_v29, %v1160_v46  ;;  %v7204_v63 = vld [vmem:[#allocation42_spill] sm:$0xff] }
 0x2ab   : > { %7201 = vst [vmem:[#allocation18_spill] sm:$0xff] %v5193_v6  ;;  %v1220_v21 = vpop.permute.xlu0 %1219  ;;  %v7206_v13 = vld [vmem:[#allocation118_spill] sm:$0xff]  ;;  %v1330_v4 = vmul.f32 %v7214_v19, %v7213_v24 }
 0x2ac   : > { %v1324_v11 = vmul.f32 %v7202_v17, %v1220_v21  ;;  %v1325_v61 = vmul.f32 %v7203_v57, %v1220_v21  ;;  %v1375_v30 = vadd.f32 %v1374_v45, %v1322_v16  ;;  %v1412_v8 = vadd.f32 %v1411_v60, %v1323_v23  ;;  %v7208_v23 = vld [vmem:[#allocation20_spill] sm:$0xff]  ;;  %v5212_v60 = vpop.eup %3668  ;;  %v7210_v21 = vld [vmem:[#allocation65_spill] sm:$0xff] }
 0x2ad   : > { %2212 = vperm.xlu1 %3540, %v7204_v63   ;;  %v1326_v51 = vmul.f32 %v7206_v13, %v7205_v47  ;;  %1548 = vperm.xlu0 %3543, %v7208_v23   ;;  %v7211_v13 = vld [vmem:[#allocation120_spill] sm:$0xff]  ;;  %v5217_v47 = vpop.eup %3670  ;;  %v7212_v23 = vld [vmem:[#allocation45_spill] sm:$0xff]  ;;  %v1162_v12 = vadd.f32 %v5156_v62, %v1161_v54 }
 0x2ae   : > { %v1376_v2 = vadd.f32 %v1375_v30, %v1324_v11  ;;  %v1413_v16 = vadd.f32 %v1412_v8, %v1325_v61  ;;  %v5210_v45 = vpop.permute.xlu1 %1488  ;;  %v1760_v11 = vstv %s5182_s11  ;;  %v3818_v61 = vld [vmem:[%s3940_s7] sm:$0xf]  ;;  %v1795_v8 = vstv %s5184_s12  ;;  %s3483_s7 = sadd.s32 52, %s3927_s20 }
 0x2af   : > { %7209 = vst [vmem:[#allocation40_spill] sm:$0xff] %v5210_v45  ;;  %v1228_v46 = vpop.permute.xlu0 %1227  ;;  %v1792_v30 = vmul.f32 %v3818_v61, %v1791_v34  ;;  %v7220_v45 = vld [vmem:[#allocation124_spill] sm:$0xff]  ;;  %s5315_s20 = sld [smem:[#allocation4 + %s3483_s7]] }
 0x2b0   : > { %v1328_v28 = vmul.f32 %v7210_v21, %v1228_v46  ;;  %v1329_v57 = vmul.f32 %v7211_v13, %v1228_v46  ;;  %v1377_v17 = vadd.f32 %v1376_v2, %v1326_v51  ;;  %v1414_v37 = vadd.f32 %v1413_v16, %v1327_v44  ;;  %v7215_v21 = vld [vmem:[#allocation123_spill] sm:$0xff]  ;;  %v7216_v44 = vld [vmem:[#allocation22_spill] sm:$0xff]  ;;  %v5231_v16 = vpop.eup %3672 }
 0x2b1   : > { %2220 = vperm.xlu1 %3540, %v7212_v23   ;;  %v1331_v58 = vmul.f32 %v7215_v21, %v7213_v24  ;;  %1556 = vperm.xlu0 %3543, %v7216_v44   ;;  %7218 = vst [vmem:[#allocation19_spill] sm:$0xff] %v5231_v16  ;;  %v1126_v13 = vadd.f32 %v5212_v60, %v1125_v31  ;;  %v5236_v6 = vpop.eup %3674  ;;  %v7223_v44 = vld [vmem:[#allocation78_spill] sm:$0xff]  ;;  %v7224_v21 = vld [vmem:[#allocation76_spill] sm:$0xff] }
 0x2b2   : > { %v1378_v46 = vadd.f32 %v1377_v17, %v1328_v28  ;;  %v1415_v51 = vadd.f32 %v1414_v37, %v1329_v57  ;;  %v5229_v2 = vpop.permute.xlu1 %1496  ;;  %7221 = vst [vmem:[#allocation71_spill] sm:$0xff] %v5236_v6  ;;  %v1761_v24 = vmul.f32 %v3818_v61, %v1760_v11  ;;  %v1765_v17 = vstv %s5200_s13  ;;  %v7222_v57 = vld [vmem:[#allocation49_spill] sm:$0xff]  ;;  %v7225_v31 = vld [vmem:[#allocation126_spill] sm:$0xff]  ;;  %v5250_v11 = vpop.eup %3676 }
 0x2b3   : > { %7217 = vst [vmem:[#allocation67_spill] sm:$0xff] %v5229_v2  ;;  %v1236_v34 = vpop.permute.xlu0 %1235  ;;  %v5239_v37 = vadd.f32 %v1795_v8, %v1792_v30  ;;  %v1163_v28 = vadd.f32 %v5217_v47, %v1162_v12  ;;  %v1334_v2 = vmul.f32 %v7224_v21, %v7223_v44  ;;  %v1127_v30 = vadd.f32 %v5231_v16, %v1126_v13  ;;  %v5255_v21 = vpop.eup %3678 }
 0x2b4   : > { %v1332_v54 = vmul.f32 %v7219_v25, %v1236_v34  ;;  %v1333_v18 = vmul.f32 %v7220_v45, %v1236_v34  ;;  %v1379_v50 = vadd.f32 %v1378_v46, %v1330_v4  ;;  %v1416_v19 = vadd.f32 %v1415_v51, %v1331_v58  ;;  %v7226_v4 = vld [vmem:[#allocation25_spill] sm:$0xff] }
 0x2b5   : > { %2228 = vperm.xlu1 %3540, %v7222_v57   ;;  %v1335_v25 = vmul.f32 %v7225_v31, %v7223_v44  ;;  %1564 = vperm.xlu0 %3543, %v7226_v4   ;;  %v5257_v44 = vadd.f32 %v1765_v17, %v1761_v24  ;;  %v1338_v13 = vmul.f32 %v4962_v53, %v4960_v10  ;;  %s2478_s14 = sand.u32 2147483647, %s5315_s20 }
 0x2b6   : > { %v1380_v41 = vadd.f32 %v1379_v50, %v1332_v54  ;;  %v1417_v34 = vadd.f32 %v1416_v19, %v1333_v18  ;;  %v5248_v58 = vpop.permute.xlu1 %1504  ;;  %v1813_v50 = vmul.f32 %v5239_v37, %v5239_v37  ;;  %v7227_v18 = vld [vmem:[#allocation52_spill] sm:$0xff]  ;;  %v1164_v19 = vadd.f32 %v5236_v6, %v1163_v28 }
 0x2b7   : > { %v1244_v61 = vpop.permute.xlu0 %1243  ;;  %v1339_v54 = vmul.f32 %v4970_v20, %v4960_v10  ;;  %v1128_v17 = vadd.f32 %v5250_v11, %v1127_v30  ;;  %v1787_v53 = vmul.f32 %v5257_v44, %v5257_v44  ;;  %v7229_v10 = vld [vmem:[#allocation55_spill] sm:$0xff]  ;;  %v1343_v30 = vmul.f32 %v5016_v1, %v4984_v9 }
 0x2b8   : > { %v1336_v8 = vmul.f32 %v4921_v39, %v1244_v61  ;;  %v1337_v12 = vmul.f32 %v4937_v48, %v1244_v61  ;;  %v1381_v46 = vadd.f32 %v1380_v41, %v1334_v2  ;;  %v1418_v51 = vadd.f32 %v1417_v34, %v1335_v25  ;;  %v7228_v25 = vld [vmem:[#allocation29_spill] sm:$0xff] }
 0x2b9   : > { %2236 = vperm.xlu1 %3540, %v7227_v18   ;;  %1572 = vperm.xlu0 %3543, %v7228_v25   ;;  %v3451_v48 = vrot.slane %v1813_v50, 9  ;;  %v7230_v25 = vld [vmem:[#allocation32_spill] sm:$0xff] }
 0x2ba   : > { %v1382_v4 = vadd.f32 %v1381_v46, %v1336_v8  ;;  %v1419_v41 = vadd.f32 %v1418_v51, %v1337_v12  ;;  %v5268_v2 = vpop.permute.xlu1 %1512  ;;  %v1165_v8 = vadd.f32 %v5255_v21, %v1164_v19  ;;  %v1342_v12 = vmul.f32 %v5004_v43, %v4984_v9  ;;  %v7233_v9 = vld [vmem:[#allocation88_spill] sm:$0xff] }
 0x2bb   : > { %v1252_v24 = vpop.permute.xlu0 %1251  ;;  %v1818_v20 = vadd.f32 %v3451_v48, %v1787_v53 }
 0x2bc   : > { %v1340_v34 = vmul.f32 %v4975_v22, %v1252_v24  ;;  %v1341_v61 = vmul.f32 %v4986_v15, %v1252_v24  ;;  %v1383_v28 = vadd.f32 %v1382_v4, %v1338_v13  ;;  %v1420_v31 = vadd.f32 %v1419_v41, %v1339_v54  ;;  %v7231_v15 = vld [vmem:[#allocation59_spill] sm:$0xff]  ;;  %v7232_v22 = vld [vmem:[#allocation133_spill] sm:$0xff] }
 0x2bd   : > { %2244 = vperm.xlu1 %3540, %v7229_v10   ;;  %1580 = vperm.xlu0 %3543, %v7230_v25   ;;  %v1129_v4 = vrot.slane %v1128_v17, 4  ;;  %v1166_v43 = vrot.slane %v1165_v8, 4  ;;  %v7234_v25 = vld [vmem:[#allocation35_spill] sm:$0xff] }
 0x2be   : > { %v1384_v46 = vadd.f32 %v1383_v28, %v1340_v34  ;;  %v1421_v51 = vadd.f32 %v1420_v31, %v1341_v61  ;;  %v5282_v13 = vpop.permute.xlu1 %1520  ;;  %v1346_v34 = vmul.f32 %v7233_v9, %v7232_v22  ;;  %v1347_v31 = vmul.f32 %v5062_v56, %v7232_v22  ;;  %v7236_v22 = vld [vmem:[#allocation85_spill] sm:$0xff] }
 0x2bf   : > { %v1260_v54 = vpop.permute.xlu0 %1259  ;;  %v1167_v9 = vadd.f32 %v1166_v43, %v1165_v8 }
 0x2c0   : > { %v1344_v50 = vmul.f32 %v5022_v33, %v1260_v54  ;;  %v1345_v41 = vmul.f32 %v5035_v3, %v1260_v54  ;;  %v1385_v24 = vadd.f32 %v1384_v46, %v1342_v12  ;;  %v1422_v19 = vadd.f32 %v1421_v51, %v1343_v30  ;;  %v7235_v51 = vld [vmem:[#allocation62_spill] sm:$0xff] }
 0x2c1   : > { %2252 = vperm.xlu1 %3540, %v7231_v15   ;;  %1588 = vperm.xlu0 %3543, %v7234_v25   ;;  %v1130_v54 = vadd.f32 %v1129_v4, %v1128_v17  ;;  %v1828_v46 = vmax.f32 %v1818_v20, 1e-24 }
 0x2c2   : > { %v1386_v61 = vadd.f32 %v1385_v24, %v1344_v50  ;;  %v1423_v28 = vadd.f32 %v1422_v19, %v1345_v41  ;;  %v5292_v1 = vpop.permute.xlu1 %1528  ;;  %v1350_v50 = vmul.f32 %v5097_v59, %v7236_v22  ;;  %v1351_v41 = vmul.f32 %v5101_v7, %v7236_v22  ;;  %v7286_v7 = vld [vmem:[#allocation87_spill] sm:$0xff] }
 0x2c3   : > { %v1268_v33 = vpop.permute.xlu0 %1267  ;;  %3680 = vrsqrt.f32 %v1828_v46 }
 0x2c4   : > { %v1348_v48 = vmul.f32 %v5075_v27, %v1268_v33  ;;  %v1349_v53 = vmul.f32 %v5090_v26, %v1268_v33  ;;  %v1387_v12 = vadd.f32 %v1386_v61, %v1346_v34  ;;  %v1424_v30 = vadd.f32 %v1423_v28, %v1347_v31  ;;  %v7237_v31 = vld [vmem:[#allocation21_spill] sm:$0xff]  ;;  %v7238_v28 = vld [vmem:[#allocation136_spill] sm:$0xff] }
 0x2c5   : > { %2260 = vperm.xlu1 %3540, %v7235_v51   ;;  %3042 = vperm.xlu0 %3543, %v7196_v35   ;;  %v1131_v33 = vrot.slane %v1130_v54, 2  ;;  %v1168_v61 = vrot.slane %v1167_v9, 2  ;;  %v1354_v25 = vmul.f32 %v5106_v36, %v7238_v28  ;;  %v1355_v35 = vmul.f32 %v5114_v42, %v7238_v28  ;;  %v1440_v42 = vld [vmem:[#allocation2] ss:$2 sm:$0x3] }
 0x2c6   : > { %v1388_v24 = vadd.f32 %v1387_v12, %v1348_v48  ;;  %v1425_v19 = vadd.f32 %v1424_v30, %v1349_v53  ;;  %v5302_v17 = vpop.permute.xlu1 %1536  ;;  %v7280_v36 = vmov 2  }
 0x2c7   : > { %v1276_v4 = vpop.permute.xlu0 %1275  ;;  %v1132_v22 = vadd.f32 %v1131_v33, %v1130_v54 }
 0x2c8   : > { %v1352_v20 = vmul.f32 %v5128_v14, %v1276_v4  ;;  %v1353_v34 = vmul.f32 %v5133_v40, %v1276_v4  ;;  %v1389_v43 = vadd.f32 %v1388_v24, %v1350_v50  ;;  %v1426_v8 = vadd.f32 %v1425_v19, %v1351_v41  ;;  %v7239_v19 = vld [vmem:[#allocation26_spill] sm:$0xff] }
 0x2c9   : > { %2268 = vperm.xlu1 %3540, %v7237_v31   ;;  %3054 = vperm.xlu0 %3543, %v7212_v23   ;;  %v1169_v4 = vadd.f32 %v1168_v61, %v1167_v9  ;;  %v1359_v23 = vmul.f32 %v5156_v62, %v5088_v55  ;;  %v7241_v62 = vld [vmem:[#allocation36_spill] sm:$0xff] }
 0x2ca   : > { %v1390_v48 = vadd.f32 %v1389_v43, %v1352_v20  ;;  %v1427_v53 = vadd.f32 %v1426_v8, %v1353_v34  ;;  %v5313_v12 = vpop.permute.xlu1 %1544  ;;  %v1358_v20 = vmul.f32 %v5121_v38, %v5088_v55  ;;  %v1133_v8 = vrot.slane %v1132_v22, 1 }
 0x2cb   : > { %v1284_v30 = vpop.permute.xlu0 %1283  ;;  %v1362_v55 = vmul.f32 %v5231_v16, %v5112_v32 }
 0x2cc   : > { %v1356_v46 = vmul.f32 %v5171_v5, %v1284_v30  ;;  %v1357_v50 = vmul.f32 %v5178_v29, %v1284_v30  ;;  %v1391_v41 = vadd.f32 %v1390_v48, %v1354_v25  ;;  %v1428_v24 = vadd.f32 %v1427_v53, %v1355_v35  ;;  %v7240_v35 = vld [vmem:[#allocation31_spill] sm:$0xff] }
 0x2cd   : > { %2276 = vperm.xlu1 %3540, %v7239_v19   ;;  %3062 = vperm.xlu0 %3543, %v7222_v57   ;;  %v1170_v48 = vrot.slane %v1169_v4, 1  ;;  %v1363_v57 = vmul.f32 %v5236_v6, %v5112_v32  ;;  %v7279_v6 = vld [vmem:[#allocation30_spill] sm:$0xff] }
 0x2ce   : > { %v1392_v34 = vadd.f32 %v1391_v41, %v1356_v46  ;;  %v1429_v43 = vadd.f32 %v1428_v24, %v1357_v50  ;;  %v5325_v54 = vpop.permute.xlu1 %1552  ;;  %v3681_v50 = vpop.eup %3680  ;;  %v1830_v41 = vstv %s5315_s20 }
 0x2cf   : > { %v1292_v33 = vpop.permute.xlu0 %1291  ;;  %v1171_v16 = vadd.f32 %v1170_v48, %v1169_v4 }
 0x2d0   : > { %v1360_v28 = vmul.f32 %v5212_v60, %v1292_v33  ;;  %v1361_v25 = vmul.f32 %v5217_v47, %v1292_v33  ;;  %v1393_v9 = vadd.f32 %v1392_v34, %v1358_v20  ;;  %v1430_v61 = vadd.f32 %v1429_v43, %v1359_v23 }
 0x2d1   : > { %2284 = vperm.xlu1 %3540, %v7240_v35   ;;  %3070 = vperm.xlu0 %3543, %v7227_v18   ;;  %v1134_v20 = vadd.f32 %v1133_v8, %v1132_v22 }
 0x2d2   : > { %v1394_v53 = vadd.f32 %v1393_v9, %v1360_v28  ;;  %v1431_v30 = vadd.f32 %v1430_v61, %v1361_v25  ;;  %v5335_v46 = vpop.permute.xlu1 %1560  ;;  %v1831_v25 = vmul.f32 %v3681_v50, %v1830_v41 }
 0x2d3   : > { %v1300_v24 = vpop.permute.xlu0 %1299  ;;  %3682 = vrcp.f32 %v1134_v20 }
 0x2d4   : > { %v1364_v23 = vmul.f32 %v5250_v11, %v1300_v24  ;;  %v1365_v34 = vmul.f32 %v5255_v21, %v1300_v24  ;;  %v1395_v43 = vadd.f32 %v1394_v53, %v1362_v55  ;;  %v1432_v33 = vadd.f32 %v1431_v30, %v1363_v57  ;;  %v7243_v24 = vld [vmem:[#allocation41_spill] sm:$0xff] }
 0x2d5   : > { %2292 = vperm.xlu1 %3540, %v7241_v62   ;;  %3078 = vperm.xlu0 %3543, %v7229_v10   ;;  %v2200_v61 = vrot.slane %v1831_v25, 7  ;;  %3684 = vrcp.f32 %v1171_v16  ;;  %v1955_v10 = vmul.f32 %v1831_v25, %v5257_v44  ;;  %v3878_v53 = vmov 1966171168   ;;  %v7248_v44 = vld [vmem:[#allocation9_spill] sm:$0xff] }
 0x2d6   : > { %v1396_v32 = vadd.f32 %v1395_v43, %v1364_v23  ;;  %v1433_v28 = vadd.f32 %v1432_v33, %v1365_v34  ;;  %v5342_v18 = vpop.permute.xlu1 %1568  ;;  %v1447_v30 = vunpack.c.l.s4 %v3878_v53  ;;  %v7245_v23 = vld [vmem:[#allocation46_spill] sm:$0xff]  ;;  %v7249_v53 = vld [vmem:[#allocation8_spill] sm:$0xff] }
 0x2d7   : > { %v5344_v9 = vpop.permute.xlu0 %2753  ;;  %v2202_v20 = vmul.f32 %v2200_v61, %v5239_v37  ;;  %v7250_v37 = vld [vmem:[#allocation10_spill] sm:$0xff] }
 0x2d8   : > { %7242 = vst [vmem:[#allocation20_spill] sm:$0xff] %v5344_v9  ;;  %v1397_v22 = vrot.slane %v1396_v32, 4  ;;  %v1434_v8 = vrot.slane %v1433_v28, 4  ;;  %v1448_v25 = vunpack.c.0.s8 %v1447_v30  ;;  %v7251_v9 = vld [vmem:[#allocation51_spill] sm:$0xff] }
 0x2d9   : > { %2300 = vperm.xlu1 %3540, %v7243_v24   ;;  %3086 = vperm.xlu0 %3543, %v7231_v15   ;;  %v7246_v15 = vld [vmem:[#allocation7_spill] sm:$0xff]  ;;  %v2339_v61 = vrot.slane %v2202_v20, %v7250_v37 }
 0x2da   : > { %v1398_v55 = vadd.f32 %v1397_v22, %v1396_v32  ;;  %v1435_v4 = vadd.f32 %v1434_v8, %v1433_v28  ;;  %v5348_v48 = vpop.permute.xlu1 %1576  ;;  %v2120_v33 = vrot.slane %v1955_v10, %v7246_v15  ;;  %v2124_v28 = vrot.slane %v1955_v10, %v7248_v44 }
 0x2db   : > { %v5351_v57 = vpop.permute.xlu0 %2765 }
 0x2dc   : > { %7244 = vst [vmem:[#allocation45_spill] sm:$0xff] %v5351_v57  ;;  %v1399_v50 = vrot.slane %v1398_v55, 2  ;;  %v1436_v41 = vrot.slane %v1435_v4, 2  ;;  %v2335_v57 = vrot.slane %v2202_v20, %v7249_v53  ;;  %v5373_v10 = vrot.slane %v2120_v33, %v7246_v15  ;;  %v7257_v20 = vld [vmem:[#allocation6_spill] sm:$0xff]  ;;  %v7261_v33 = vld [vmem:[#allocation56_spill] sm:$0xff] }
 0x2dd   : > { %2308 = vperm.xlu1 %3540, %v7245_v23   ;;  %3094 = vperm.xlu0 %3543, %v7235_v51   ;;  %v5378_v44 = vrot.slane %v2124_v28, %v7246_v15  ;;  %v5381_v37 = vsub.s32 %v1448_v25, %v7257_v20  ;;  %v7263_v25 = vld [vmem:[#allocation77_spill] sm:$0xff] }
 0x2de   : > { %v1400_v16 = vadd.f32 %v1399_v50, %v1398_v55  ;;  %v1437_v34 = vadd.f32 %v1436_v41, %v1435_v4  ;;  %v5356_v43 = vpop.permute.xlu1 %1584  ;;  %v5365_v55 = vpop.eup %3682  ;;  %7254 = vst [vmem:[#allocation49_spill] sm:$0xff] %v5373_v10 }
 0x2df   : > { %v5359_v32 = vpop.permute.xlu0 %2773  ;;  %7252 = vst [vmem:[#allocation22_spill] sm:$0xff] %v5365_v55  ;;  %v5370_v41 = vpop.eup %3684  ;;  %7256 = vst [vmem:[#allocation25_spill] sm:$0xff] %v5378_v44 }
 0x2e0   : > { %7247 = vst [vmem:[#allocation68_spill] sm:$0xff] %v5359_v32  ;;  %v1401_v22 = vrot.slane %v1400_v16, 1  ;;  %v1438_v8 = vrot.slane %v1437_v34, 1  ;;  %7253 = vst [vmem:[#allocation124_spill] sm:$0xff] %v5370_v41 }
 0x2e1   : > { %2316 = vperm.xlu1 %3540, %v7251_v9   ;;  %3102 = vperm.xlu0 %3543, %v7237_v31   ;;  %7258 = vst [vmem:[#allocation52_spill] sm:$0xff] %v5381_v37  ;;  %v5386_v31 = vrot.slane %v2335_v57, %v7249_v53  ;;  %v5403_v57 = vmul.f32 %v5378_v44, %v7263_v25 }
 0x2e2   : > { %v1402_v51 = vadd.f32 %v1401_v22, %v1400_v16  ;;  %v1439_v4 = vadd.f32 %v1438_v8, %v1437_v34  ;;  %v5368_v50 = vpop.permute.xlu1 %1592  ;;  %v5389_v22 = vrot.slane %v2339_v61, %v7249_v53  ;;  %v7262_v8 = vld [vmem:[#allocation75_spill] sm:$0xff] }
 0x2e3   : > { %v5375_v30 = vpop.permute.xlu0 %2781  ;;  %7259 = vst [vmem:[#allocation29_spill] sm:$0xff] %v5386_v31  ;;  %v2136_v15 = vmul.f32 %v5378_v44, %v7262_v8  ;;  %7265 = vst [vmem:[#allocation59_spill] sm:$0xff] %v5403_v57  ;;  %v7266_v53 = vld [vmem:[#allocation79_spill] sm:$0xff]  ;;  %v2350_v38 = vmul.f32 %v5386_v31, %v7279_v6 }
 0x2e4   : > { %7255 = vst [vmem:[#allocation78_spill] sm:$0xff] %v5375_v30  ;;  %v1441_v16 = vmul.f32 %v5365_v55, %v1402_v51  ;;  %v1442_v34 = vmul.f32 %v5370_v41, %v1439_v4  ;;  %7260 = vst [vmem:[#allocation55_spill] sm:$0xff] %v5389_v22  ;;  %v2135_v30 = vmul.f32 %v5373_v10, %v7262_v8 }
 0x2e5   : > { %2324 = vperm.xlu1 %3540, %v7261_v33   ;;  %3110 = vperm.xlu0 %3543, %v7239_v19   ;;  %v5399_v51 = vmul.f32 %v5373_v10, %v7263_v25  ;;  %v5407_v61 = vmul.f32 %v5373_v10, %v7266_v53  ;;  %v5411_v4 = vmul.f32 %v5378_v44, %v7266_v53  ;;  %v7271_v19 = vld [vmem:[#allocation80_spill] sm:$0xff]  ;;  %v7274_v25 = vld [vmem:[#allocation82_spill] sm:$0xff] }
 0x2e6   : > { %v1445_v28 = vcombine.low %v1441_v16, %v1442_v34  ;;  %v5419_v34 = vmul.f32 %v5373_v10, %v7271_v19  ;;  %v5423_v8 = vmul.f32 %v5378_v44, %v7271_v19  ;;  %v5427_v32 = vmul.f32 %v5373_v10, %v7274_v25 }
 0x2e7   : > { %7264 = vst [vmem:[#allocation32_spill] sm:$0xff] %v5399_v51  ;;  %7267 = vst [vmem:[#allocation133_spill] sm:$0xff] %v5407_v61  ;;  %v5413_v20 = vpop.permute.xlu1 %1963  ;;  %v5415_v16 = vpop.permute.xlu0 %2789  ;;  %v5432_v41 = vmul.f32 %v5378_v44, %v7274_v25  ;;  %v2351_v19 = vmul.f32 %v5389_v22, %v7279_v6  ;;  %v2414_v59 = vadd.f32 %v2350_v38, %v2135_v30  ;;  %v7307_v38 = vld [vmem:[#allocation93_spill] sm:$0xff] }
 0x2e8   : > { %7268 = vst [vmem:[#allocation35_spill] sm:$0xff] %v5411_v4  ;;  %7269 = vst [vmem:[#allocation62_spill] sm:$0xff] %v5413_v20  ;;  %v1452_v53 = vrot.slane %v1445_v28, %v5381_v37  ;;  %v5518_v30 = vmul.f32 %v5373_v10, %v7307_v38  ;;  %v7329_v4 = vld [vmem:[#allocation66_spill] sm:$0xff] }
 0x2e9   : > { %7270 = vst [vmem:[#allocation85_spill] sm:$0xff] %v5415_v16  ;;  %7272 = vst [vmem:[#allocation21_spill] sm:$0xff] %v5419_v34  ;;  %v7277_v16 = vld [vmem:[#allocation84_spill] sm:$0xff]  ;;  %3542 = vset.pattern.permute.xlu1 %v7280_v36  ;;  %3118 = vperm.xlu0 %3543, %v7240_v35   ;;  %v5460_v36 = vmul.f32 %v5373_v10, %v7286_v7  ;;  %v5496_v34 = vadd.f32 %v2351_v19, %v2136_v15 }
 0x2ea   : > { %7273 = vst [vmem:[#allocation136_spill] sm:$0xff] %v5423_v8  ;;  %7275 = vst [vmem:[#allocation26_spill] sm:$0xff] %v5427_v32  ;;  %v5436_v55 = vmul.f32 %v5373_v10, %v7277_v16  ;;  %v5445_v28 = vmul.f32 %v5378_v44, %v7277_v16  ;;  %v7282_v32 = vld [vmem:[#allocation86_spill] sm:$0xff]  ;;  %v5464_v16 = vmul.f32 %v5378_v44, %v7286_v7  ;;  %v7300_v8 = vld [vmem:[#allocation91_spill] sm:$0xff] }
 0x2eb   : > { %7276 = vst [vmem:[#allocation31_spill] sm:$0xff] %v5432_v41  ;;  %v5449_v25 = vmul.f32 %v5373_v10, %v7282_v32  ;;  %v1459_v41 = vrot.slane %v1452_v53, %v5381_v37  ;;  %v5456_v6 = vmul.f32 %v5378_v44, %v7282_v32  ;;  %7287 = vst [vmem:[#allocation8_spill] sm:$0xff] %v5460_v36  ;;  %v7290_v53 = vmov 0  ;;  %v5472_v35 = vpop.permute.xlu1 %1973  ;;  %v5474_v37 = vpop.permute.xlu0 %2797  ;;  %v7294_v32 = vld [vmem:[#allocation89_spill] sm:$0xff]  ;;  %v7297_v7 = vld [vmem:[#allocation90_spill] sm:$0xff] }
 0x2ec   : > { %7278 = vst [vmem:[#allocation36_spill] sm:$0xff] %v5436_v55  ;;  %7281 = vst [vmem:[#allocation41_spill] sm:$0xff] %v5445_v28  ;;  %v7284_v55 = vld [vmem:[#allocation39_spill] sm:$0xff]  ;;  %v5482_v36 = vmul.f32 %v5378_v44, %v7294_v32  ;;  %v5490_v28 = vmul.f32 %v5378_v44, %v7297_v7  ;;  %v5522_v15 = vmul.f32 %v5378_v44, %v7307_v38 }
 0x2ed   : > { %7283 = vst [vmem:[#allocation7_spill] sm:$0xff] %v5449_v25  ;;  %2749 = vperm.xlu1 %3542, %v7284_v55   ;;  %7285 = vst [vmem:[#allocation9_spill] sm:$0xff] %v5456_v6  ;;  %v7289_v25 = vlaneseq  ;;  %v5478_v6 = vmul.f32 %v5373_v10, %v7294_v32  ;;  %v5500_v32 = vmul.f32 %v5378_v44, %v7300_v8  ;;  %3126 = vperm.xlu0 %3543, %v7241_v62   ;;  %v7338_v55 = vld [vmem:[#allocation125_spill] sm:$0xff] }
 0x2ee   : > { %7288 = vst [vmem:[#allocation10_spill] sm:$0xff] %v5464_v16  ;;  %7293 = vst [vmem:[#allocation75_spill] sm:$0xff] %v5474_v37  ;;  %v5486_v16 = vmul.f32 %v5373_v10, %v7297_v7  ;;  %v5494_v37 = vmul.f32 %v5373_v10, %v7300_v8  ;;  %v7310_v8 = vld [vmem:[#allocation94_spill] sm:$0xff]  ;;  %v5611_v61 = vmul.f32 %v5386_v31, %v7329_v4 }
 0x2ef   : > { %vm5468_vm4 = vcmp.lt.s32.totalorder %v7289_v25, 256  ;;  %7295 = vst [vmem:[#allocation77_spill] sm:$0xff] %v5478_v6  ;;  %7296 = vst [vmem:[#allocation79_spill] sm:$0xff] %v5482_v36  ;;  %v1461_v25 = vadd.f32 %v1459_v41, %v1440_v42  ;;  %v7303_v36 = vld [vmem:[#allocation92_spill] sm:$0xff]  ;;  %v5510_v41 = vstv %s2478_s14  ;;  %v5530_v19 = vmul.f32 %v5378_v44, %v7310_v8  ;;  %v5532_v7 = vpop.permute.xlu1 %1983  ;;  %v5534_v62 = vpop.permute.xlu0 %2805 }
 0x2f0   : > { %v7291_v53 = vsel %vm5468_vm4, 4294967295, %v7290_v53  ;;  %7298 = vst [vmem:[#allocation80_spill] sm:$0xff] %v5486_v16  ;;  %7299 = vst [vmem:[#allocation82_spill] sm:$0xff] %v5490_v28  ;;  %v5504_v6 = vmul.f32 %v5373_v10, %v7303_v36  ;;  %v5508_v42 = vmul.f32 %v5378_v44, %v7303_v36  ;;  %v5526_v36 = vmul.f32 %v5373_v10, %v7310_v8  ;;  %v7327_v16 = vld [vmem:[#allocation64_spill] sm:$0xff] }
 0x2f1   : > { %7292 = vst [vmem:[#allocation6_spill] sm:$0xff] %v7291_v53  ;;  %7301 = vst [vmem:[#allocation84_spill] sm:$0xff] %v5494_v37  ;;  %2757 = vperm.xlu1 %3542, %v7204_v63   ;;  %3134 = vperm.xlu0 %3543, %v7243_v24   ;;  %v5603_v56 = vmul.f32 %v5386_v31, %v7327_v16  ;;  %v5615_v57 = vmul.f32 %v5389_v22, %v7329_v4 }
 0x2f2   : > { %7302 = vst [vmem:[#allocation30_spill] sm:$0xff] %v5500_v32  ;;  %7304 = vst [vmem:[#allocation86_spill] sm:$0xff] %v5504_v6  ;;  %v7325_v32 = vld [vmem:[#allocation116_spill] sm:$0xff]  ;;  %v5635_v4 = vmul.f32 %v5386_v31, %v7338_v55  ;;  %v5639_v20 = vmul.f32 %v5389_v22, %v7338_v55 }
 0x2f3   : > { %7305 = vst [vmem:[#allocation87_spill] sm:$0xff] %v5508_v42  ;;  %7306 = vst [vmem:[#allocation89_spill] sm:$0xff] %v5510_v41  ;;  %v7324_v42 = vld [vmem:[#allocation115_spill] sm:$0xff]  ;;  %v5591_v37 = vmul.f32 %v5386_v31, %v7325_v32  ;;  %v5593_v28 = vpop.permute.xlu1 %1993  ;;  %v5595_v24 = vpop.permute.xlu0 %2813 }
 0x2f4   : > { %1466 = vst.msk [vmem:[#allocation2] ss:$2 sm:$0x3] %vm5468_vm4, %v1461_v25  ;;  %7308 = vst [vmem:[#allocation90_spill] sm:$0xff] %v5518_v30  ;;  %v7314_v25 = vld [vmem:[#allocation61_spill] sm:$0xff]  ;;  %v5583_v6 = vmul.f32 %v5386_v31, %v7324_v42 }
 0x2f5   : > { %7309 = vst [vmem:[#allocation91_spill] sm:$0xff] %v5522_v15  ;;  %7311 = vst [vmem:[#allocation92_spill] sm:$0xff] %v5526_v36  ;;  %v5538_v53 = vmul.f32 %v5373_v10, %v7314_v25  ;;  %v5542_v38 = vmul.f32 %v5378_v44, %v7314_v25  ;;  %v7317_v15 = vld [vmem:[#allocation95_spill] sm:$0xff]  ;;  %v7320_v36 = vld [vmem:[#allocation102_spill] sm:$0xff]  ;;  %3138 = vperm.xlu0 %3543, %v7176_v0  }
 0x2f6   : > { %7312 = vst [vmem:[#allocation93_spill] sm:$0xff] %v5530_v19  ;;  %7313 = vst [vmem:[#allocation94_spill] sm:$0xff] %v5534_v62  ;;  %v5546_v30 = vmul.f32 %v5373_v10, %v7317_v15  ;;  %v5550_v8 = vmul.f32 %v5378_v44, %v7317_v15  ;;  %v2480_v19 = vsub.f32 %v2414_v59, %v5510_v41  ;;  %v7322_v59 = vld [vmem:[#allocation110_spill] sm:$0xff] }
 0x2f7   : > { %7315 = vst [vmem:[#allocation61_spill] sm:$0xff] %v5538_v53  ;;  %7316 = vst [vmem:[#allocation140_spill] sm:$0xff] %v5542_v38  ;;  %v2481_v62 = vsub.f32 %v5496_v34, %v5510_v41  ;;  %v5557_v53 = vmul.f32 %v5386_v31, %v7320_v36  ;;  %v5561_v25 = vmul.f32 %v5389_v22, %v7320_v36  ;;  %v7321_v38 = vld [vmem:[#allocation107_spill] sm:$0xff]  ;;  %v7323_v34 = vld [vmem:[#allocation44_spill] sm:$0xff]  ;;  %v5659_v0 = vpop.permute.xlu0 %2821 }
 0x2f8   : > { %7318 = vst [vmem:[#allocation95_spill] sm:$0xff] %v5546_v30  ;;  %7319 = vst [vmem:[#allocation141_spill] sm:$0xff] %v5550_v8  ;;  %v5565_v30 = vmul.f32 %v5386_v31, %v7321_v38  ;;  %v5569_v15 = vmul.f32 %v5389_v22, %v7321_v38  ;;  %v5573_v8 = vmul.f32 %v5386_v31, %v7322_v59  ;;  %2761 = vperm.xlu1 %3542, %v7323_v34   ;;  %v7335_v34 = vld [vmem:[#allocation74_spill] sm:$0xff] }
 0x2f9   : > { %v5579_v36 = vmul.f32 %v5389_v22, %v7322_v59  ;;  %v5587_v38 = vmul.f32 %v5389_v22, %v7324_v42  ;;  %7326 = vst [vmem:[#allocation102_spill] sm:$0xff] %v5595_v24  ;;  %v5599_v59 = vmul.f32 %v5389_v22, %v7325_v32  ;;  %v5607_v42 = vmul.f32 %v5389_v22, %v7327_v16  ;;  %v7332_v24 = vld [vmem:[#allocation122_spill] sm:$0xff] }
 0x2fa   : > { %7330 = vst [vmem:[#allocation110_spill] sm:$0xff] %v5611_v61  ;;  %7331 = vst [vmem:[#allocation115_spill] sm:$0xff] %v5615_v57  ;;  %v5619_v32 = vmul.f32 %v5386_v31, %v7332_v24  ;;  %v5623_v51 = vmul.f32 %v5389_v22, %v7332_v24  ;;  %v5627_v16 = vmul.f32 %v5386_v31, %v7335_v34  ;;  %v7341_v24 = vld [vmem:[#allocation47_spill] sm:$0xff]  ;;  %v7360_v61 = vld [vmem:[#allocation18_spill] sm:$0xff]  ;;  %3142 = vperm.xlu0 %3543, %v7245_v23  }
 0x2fb   : > { %7328 = vst [vmem:[#allocation107_spill] sm:$0xff] %v5607_v42  ;;  %v5631_v63 = vmul.f32 %v5389_v22, %v7335_v34  ;;  %7339 = vst [vmem:[#allocation74_spill] sm:$0xff] %v5635_v4  ;;  %v7364_v42 = vld [vmem:[#allocation40_spill] sm:$0xff] }
 0x2fc   : > { %7333 = vst [vmem:[#allocation116_spill] sm:$0xff] %v5619_v32  ;;  %7334 = vst [vmem:[#allocation64_spill] sm:$0xff] %v5623_v51  ;;  %2769 = vperm.xlu1 %3542, %v7341_v24   ;;  %v7342_v51 = vld [vmem:[#allocation81_spill] sm:$0xff]  ;;  %v7349_v24 = vld [vmem:[#allocation11_spill] sm:$0xff] }
 0x2fd   : > { %7336 = vst [vmem:[#allocation66_spill] sm:$0xff] %v5627_v16  ;;  %7337 = vst [vmem:[#allocation122_spill] sm:$0xff] %v5631_v63  ;;  %v5645_v32 = vmul.f32 %v5386_v31, %v7342_v51  ;;  %v5649_v34 = vmul.f32 %v5389_v22, %v7342_v51  ;;  %v7345_v63 = vld [vmem:[#allocation129_spill] sm:$0xff]  ;;  %v5663_v4 = vmul.f32 %v5386_v31, %v7349_v24  ;;  %v7352_v51 = vld [vmem:[#allocation12_spill] sm:$0xff] }
 0x2fe   : > { %7340 = vst [vmem:[#allocation125_spill] sm:$0xff] %v5639_v20  ;;  %v5653_v16 = vmul.f32 %v5386_v31, %v7345_v63  ;;  %v5657_v55 = vmul.f32 %v5389_v22, %v7345_v63  ;;  %v2004_v20 = vpop.permute.xlu1 %2003  ;;  %7348 = vst [vmem:[#allocation144_spill] sm:$0xff] %v5659_v0  ;;  %v7355_v63 = vld [vmem:[#allocation98_spill] sm:$0xff]  ;;  %v7356_v0 = vld [vmem:[#allocation99_spill] sm:$0xff] }
 0x2ff   : > { %7343 = vst [vmem:[#allocation81_spill] sm:$0xff] %v5645_v32  ;;  %7344 = vst [vmem:[#allocation142_spill] sm:$0xff] %v5649_v34  ;;  %v5667_v32 = vmul.f32 %v5389_v22, %v7349_v24  ;;  %v5671_v34 = vmul.f32 %v5386_v31, %v7352_v51  ;;  %v5683_v57 = vmul.f32 %v7356_v0, %v5146_v52  ;;  %v7374_v23 = vld [vmem:[#allocation112_spill] sm:$0xff] }
 0x300   : > { %7346 = vst [vmem:[#allocation129_spill] sm:$0xff] %v5653_v16  ;;  %7347 = vst [vmem:[#allocation143_spill] sm:$0xff] %v5657_v55  ;;  %v5675_v16 = vmul.f32 %v5389_v22, %v7352_v51  ;;  %v5679_v55 = vmul.f32 %v7355_v63, %v5146_v52  ;;  %v7361_v51 = vld [vmem:[#allocation27_spill] sm:$0xff]  ;;  %v7363_v63 = vld [vmem:[#allocation34_spill] sm:$0xff] }
 0x301   : > { %7350 = vst [vmem:[#allocation11_spill] sm:$0xff] %v5663_v4  ;;  %7351 = vst [vmem:[#allocation145_spill] sm:$0xff] %v5667_v32  ;;  %v7357_v4 = vld [vmem:[#allocation70_spill] sm:$0xff]  ;;  %v7358_v32 = vld [vmem:[#allocation24_spill] sm:$0xff]  ;;  %v5699_v22 = vmul.f32 %v7363_v63, %v7360_v61  ;;  %v2141_v63 = vmul.f32 %v5373_v10, %v5472_v35 }
 0x302   : > { %7353 = vst [vmem:[#allocation12_spill] sm:$0xff] %v5671_v34  ;;  %7354 = vst [vmem:[#allocation146_spill] sm:$0xff] %v5675_v16  ;;  %v5687_v24 = vmul.f32 %v7357_v4, %v5169_v49  ;;  %v5691_v31 = vmul.f32 %v7358_v32, %v5169_v49  ;;  %v2544_v34 = vmul.f32 1.442695, %v2480_v19  ;;  %v5695_v16 = vmul.f32 %v7361_v51, %v7360_v61  ;;  %v7365_v52 = vld [vmem:[#allocation101_spill] sm:$0xff]  ;;  %v7367_v4 = vld [vmem:[#allocation50_spill] sm:$0xff] }
 0x303   : > { %v5703_v0 = vmul.f32 %v7365_v52, %v7364_v42  ;;  %2777 = vperm.xlu1 %3542, %v7367_v4   ;;  %v7368_v49 = vld [vmem:[#allocation103_spill] sm:$0xff]  ;;  %v2014_v52 = vpop.permute.xlu1 %2013  ;;  %v7376_v4 = vld [vmem:[#allocation113_spill] sm:$0xff] }
 0x304   : > { %7359 = vst [vmem:[#allocation98_spill] sm:$0xff] %v5691_v31  ;;  %7362 = vst [vmem:[#allocation99_spill] sm:$0xff] %v5695_v16  ;;  %v5709_v32 = vmul.f32 %v7368_v49, %v7364_v42  ;;  %v7369_v19 = vld [vmem:[#allocation67_spill] sm:$0xff]  ;;  %v7370_v31 = vld [vmem:[#allocation106_spill] sm:$0xff]  ;;  %v5727_v42 = vmul.f32 %v7376_v4, %v5248_v58  ;;  %3686 = vpow2.f32 %v2544_v34 }
 0x305   : > { %7366 = vst [vmem:[#allocation70_spill] sm:$0xff] %v5703_v0  ;;  %v5713_v51 = vmul.f32 %v7370_v31, %v7369_v19  ;;  %v7372_v16 = vld [vmem:[#allocation108_spill] sm:$0xff]  ;;  %v5723_v0 = vmul.f32 %v7374_v23, %v5248_v58  ;;  %v7378_v49 = vld [vmem:[#allocation63_spill] sm:$0xff]  ;;  %v7382_v23 = vld [vmem:[#allocation65_spill] sm:$0xff] }
 0x306   : > { %v5717_v61 = vmul.f32 %v7372_v16, %v7369_v19  ;;  %7377 = vst [vmem:[#allocation34_spill] sm:$0xff] %v5727_v42  ;;  %v5731_v31 = vmul.f32 %v7378_v49, %v5268_v2  ;;  %v2142_v16 = vmul.f32 %v5378_v44, %v5472_v35  ;;  %v5735_v19 = vpop.permute.xlu0 %2829  ;;  %v7383_v58 = vld [vmem:[#allocation120_spill] sm:$0xff]  ;;  %v2145_v49 = vmul.f32 %v5373_v10, %v5532_v7  ;;  %v7384_v35 = vld [vmem:[#allocation69_spill] sm:$0xff] }
 0x307   : > { %7371 = vst [vmem:[#allocation24_spill] sm:$0xff] %v5713_v51  ;;  %7375 = vst [vmem:[#allocation27_spill] sm:$0xff] %v5723_v0  ;;  %v5743_v0 = vmul.f32 %v7382_v23, %v5282_v13  ;;  %v5747_v4 = vmul.f32 %v7383_v58, %v5282_v13  ;;  %v5753_v42 = vmul.f32 %v7384_v35, %v5292_v1  ;;  %v7387_v23 = vld [vmem:[#allocation48_spill] sm:$0xff]  ;;  %v7390_v35 = vld [vmem:[#allocation131_spill] sm:$0xff] }
 0x308   : > { %7373 = vst [vmem:[#allocation18_spill] sm:$0xff] %v5717_v61  ;;  %7379 = vst [vmem:[#allocation40_spill] sm:$0xff] %v5731_v31  ;;  %v7381_v61 = vld [vmem:[#allocation117_spill] sm:$0xff]  ;;  %v2546_v31 = vmul.f32 1.442695, %v2481_v62  ;;  %3146 = vperm.xlu0 %3543, %v7387_v23   ;;  %v5765_v13 = vmul.f32 %v4921_v39, %v5302_v17  ;;  %v7389_v62 = vld [vmem:[#allocation127_spill] sm:$0xff]  ;;  %v2421_v39 = vadd.f32 %v5561_v25, %v2142_v16 }
 0x309   : > { %7380 = vst [vmem:[#allocation101_spill] sm:$0xff] %v5735_v19  ;;  %v5739_v51 = vmul.f32 %v7381_v61, %v5268_v2  ;;  %7385 = vst [vmem:[#allocation103_spill] sm:$0xff] %v5753_v42  ;;  %v5757_v2 = vmul.f32 %v7220_v45, %v5292_v1  ;;  %v2146_v61 = vmul.f32 %v5378_v44, %v5532_v7  ;;  %v7388_v19 = vld [vmem:[#allocation54_spill] sm:$0xff]  ;;  %v2024_v45 = vpop.permute.xlu1 %2023  ;;  %v7391_v7 = vld [vmem:[#allocation132_spill] sm:$0xff] }
 0x30a   : > { %2785 = vperm.xlu1 %3542, %v7388_v19   ;;  %v5769_v58 = vmul.f32 %v7389_v62, %v5302_v17  ;;  %v5773_v42 = vmul.f32 %v7390_v35, %v5313_v12  ;;  %v2420_v1 = vadd.f32 %v5557_v53, %v2141_v63  ;;  %v5778_v23 = vmul.f32 %v7391_v7, %v5313_v12  ;;  %v7392_v19 = vld [vmem:[#allocation135_spill] sm:$0xff]  ;;  %v5787_v62 = vpop.permute.xlu0 %2837  ;;  %v7396_v7 = vld [vmem:[#allocation53_spill] sm:$0xff] }
 0x30b   : > { %7386 = vst [vmem:[#allocation67_spill] sm:$0xff] %v5757_v2  ;;  %v5782_v2 = vmul.f32 %v7392_v19, %v5325_v54  ;;  %v2149_v17 = vmul.f32 %v5373_v10, %v5593_v28  ;;  %7393 = vst [vmem:[#allocation106_spill] sm:$0xff] %v5787_v62  ;;  %v5791_v35 = vmul.f32 %v5035_v3, %v5325_v54  ;;  %v7394_v3 = vld [vmem:[#allocation57_spill] sm:$0xff]  ;;  %3688 = vpow2.f32 %v2546_v31  ;;  %v7421_v62 = vld [vmem:[#allocation64_spill] sm:$0xff] }
 0x30c   : > { %v5795_v53 = vmul.f32 %v5075_v27, %v5335_v46  ;;  %v2424_v12 = vadd.f32 %v5565_v30, %v2145_v49  ;;  %v2150_v63 = vmul.f32 %v5378_v44, %v5593_v28  ;;  %v5802_v25 = vmul.f32 %v5090_v26, %v5335_v46  ;;  %3150 = vperm.xlu0 %3543, %v7251_v9   ;;  %v7425_v9 = vld [vmem:[#allocation62_spill] sm:$0xff] }
 0x30d   : > { %v2425_v16 = vadd.f32 %v5569_v15, %v2146_v61  ;;  %v2153_v19 = vmul.f32 %v5373_v10, %v2004_v20  ;;  %v5810_v27 = vmul.f32 %v5128_v14, %v5342_v18  ;;  %v5814_v54 = vmul.f32 %v5133_v40, %v5342_v18  ;;  %v5818_v46 = vpop.permute.xlu1 %2033 }
 0x30e   : > { %2793 = vperm.xlu1 %3542, %v7394_v3   ;;  %v2486_v28 = vsub.f32 %v2420_v1, %v5510_v41  ;;  %v2154_v26 = vmul.f32 %v5378_v44, %v2004_v20  ;;  %v5822_v30 = vmul.f32 %v5171_v5, %v5348_v48  ;;  %v2487_v15 = vsub.f32 %v2421_v39, %v5510_v41  ;;  %v5827_v49 = vpop.permute.xlu0 %2845  ;;  %v7397_v39 = vld [vmem:[#allocation60_spill] sm:$0xff] }
 0x30f   : > { %v2428_v34 = vadd.f32 %v5573_v8, %v2149_v17  ;;  %v2157_v14 = vmul.f32 %v5373_v10, %v2014_v52  ;;  %7395 = vst [vmem:[#allocation108_spill] sm:$0xff] %v5827_v49  ;;  %v5831_v40 = vmul.f32 %v5178_v29, %v5348_v48  ;;  %v2490_v18 = vsub.f32 %v2424_v12, %v5510_v41 }
 0x310   : > { %v2429_v20 = vadd.f32 %v5579_v36, %v2150_v63  ;;  %v2158_v61 = vmul.f32 %v5378_v44, %v2014_v52  ;;  %v5838_v5 = vmul.f32 %v5212_v60, %v5356_v43  ;;  %v2491_v8 = vsub.f32 %v2425_v16, %v5510_v41  ;;  %3154 = vperm.xlu0 %3543, %v7396_v7  }
 0x311   : > { %v2432_v1 = vadd.f32 %v5583_v6, %v2153_v19  ;;  %v5846_v29 = vmul.f32 %v5217_v47, %v5356_v43  ;;  %v2556_v48 = vmul.f32 1.442695, %v2486_v28  ;;  %v2433_v36 = vadd.f32 %v5587_v38, %v2154_v26  ;;  %v5850_v31 = vpop.permute.xlu1 %2043  ;;  %v7400_v26 = vld [vmem:[#allocation96_spill] sm:$0xff] }
 0x312   : > { %2801 = vperm.xlu1 %3542, %v7397_v39   ;;  %v2161_v52 = vmul.f32 %v5373_v10, %v2024_v45  ;;  %v5854_v60 = vmul.f32 %v5250_v11, %v5368_v50  ;;  %v2558_v6 = vmul.f32 1.442695, %v2487_v15  ;;  %v2494_v17 = vsub.f32 %v2428_v34, %v5510_v41  ;;  %v1473_v16 = vpop.permute.xlu0 %1472  ;;  %v7402_v34 = vld [vmem:[#allocation97_spill] sm:$0xff] }
 0x313   : > { %v2436_v12 = vadd.f32 %v5591_v37, %v2157_v14  ;;  %v5860_v47 = vmul.f32 %v5255_v21, %v5368_v50  ;;  %v2564_v43 = vmul.f32 1.442695, %v2490_v18  ;;  %v2495_v38 = vsub.f32 %v2429_v20, %v5510_v41  ;;  %v7401_v37 = vld [vmem:[#allocation72_spill] sm:$0xff]  ;;  %v5872_v18 = vpop.eup %3686 }
 0x314   : > { %7398 = vst [vmem:[#allocation112_spill] sm:$0xff] %v5854_v60  ;;  %v2437_v63 = vadd.f32 %v5599_v59, %v2158_v61  ;;  %v2566_v19 = vmul.f32 1.442695, %v2491_v8  ;;  %v2498_v28 = vsub.f32 %v2432_v1, %v5510_v41  ;;  %v2162_v11 = vmul.f32 %v5378_v44, %v2024_v45  ;;  %3158 = vperm.xlu0 %3543, %v7261_v33  }
 0x315   : > { %7399 = vst [vmem:[#allocation113_spill] sm:$0xff] %v5860_v47  ;;  %v1597_v15 = vmul.f32 %v7400_v26, %v1473_v16  ;;  %3690 = vpow2.f32 %v2556_v48  ;;  %v2499_v21 = vsub.f32 %v2433_v36, %v5510_v41  ;;  %v2440_v50 = vadd.f32 %v5603_v56, %v2161_v52  ;;  %v2054_v59 = vpop.permute.xlu1 %2053  ;;  %7403 = vst [vmem:[#allocation63_spill] sm:$0xff] %v5872_v18  ;;  %v7404_v52 = vld [vmem:[#allocation107_spill] sm:$0xff] }
 0x316   : > { %2809 = vperm.xlu1 %3542, %v7401_v37   ;;  %v1598_v14 = vmul.f32 %v7402_v34, %v1473_v16  ;;  %3692 = vpow2.f32 %v2558_v6  ;;  %v2572_v20 = vmul.f32 1.442695, %v2494_v17  ;;  %v2502_v45 = vsub.f32 %v2436_v12, %v5510_v41  ;;  %v1485_v36 = vpop.permute.xlu0 %1484  ;;  %v7405_v34 = vld [vmem:[#allocation58_spill] sm:$0xff]  ;;  %v7406_v6 = vld [vmem:[#allocation23_spill] sm:$0xff] }
 0x317   : > { %v1659_v61 = vadd.f32 %v1597_v15, %v5679_v55  ;;  %3694 = vpow2.f32 %v2564_v43  ;;  %v2574_v8 = vmul.f32 1.442695, %v2495_v38  ;;  %v2503_v1 = vsub.f32 %v2437_v63, %v5510_v41  ;;  %v7407_v43 = vld [vmem:[#allocation98_spill] sm:$0xff]  ;;  %v5886_v63 = vpop.eup %3688 }
 0x318   : > { %v1696_v48 = vadd.f32 %v1598_v14, %v5683_v57  ;;  %3696 = vpow2.f32 %v2566_v19  ;;  %v2580_v56 = vmul.f32 1.442695, %v2498_v28  ;;  %v2441_v16 = vadd.f32 %v7404_v52, %v2162_v11  ;;  %3162 = vperm.xlu0 %3543, %v7405_v34   ;;  %v7408_v28 = vld [vmem:[#allocation37_spill] sm:$0xff] }
 0x319   : > { %v1660_v26 = vadd.f32 %v1659_v61, %v5687_v24  ;;  %v2582_v17 = vmul.f32 1.442695, %v2499_v21  ;;  %v2506_v55 = vsub.f32 %v2440_v50, %v5510_v41  ;;  %v2165_v12 = vmul.f32 %v5373_v10, %v5818_v46  ;;  %v2064_v57 = vpop.permute.xlu1 %2063  ;;  %v7409_v24 = vld [vmem:[#allocation99_spill] sm:$0xff]  ;;  %v7410_v61 = vld [vmem:[#allocation100_spill] sm:$0xff] }
 0x31a   : > { %2817 = vperm.xlu1 %3542, %v7406_v6   ;;  %v1697_v38 = vadd.f32 %v1696_v48, %v7407_v43  ;;  %3698 = vpow2.f32 %v2572_v20  ;;  %v2588_v19 = vmul.f32 1.442695, %v2502_v45  ;;  %v1603_v11 = vmul.f32 %v7408_v28, %v1485_v36  ;;  %v1493_v52 = vpop.permute.xlu0 %1492  ;;  %v7411_v20 = vld [vmem:[#allocation28_spill] sm:$0xff]  ;;  %v7412_v28 = vld [vmem:[#allocation110_spill] sm:$0xff] }
 0x31b   : > { %v1661_v15 = vadd.f32 %v1660_v26, %v7409_v24  ;;  %3700 = vpow2.f32 %v2574_v8  ;;  %v2590_v14 = vmul.f32 1.442695, %v2503_v1  ;;  %v1604_v21 = vmul.f32 %v7410_v61, %v1485_v36  ;;  %v7413_v36 = vld [vmem:[#allocation104_spill] sm:$0xff]  ;;  %v7416_v61 = vld [vmem:[#allocation115_spill] sm:$0xff] }
 0x31c   : > { %v1698_v50 = vadd.f32 %v1697_v38, %v5699_v22  ;;  %3702 = vpow2.f32 %v2580_v56  ;;  %v2507_v49 = vsub.f32 %v2441_v16, %v5510_v41  ;;  %v2166_v48 = vmul.f32 %v5378_v44, %v5818_v46  ;;  %v7414_v38 = vld [vmem:[#allocation70_spill] sm:$0xff] }
 0x31d   : > { %v1662_v43 = vadd.f32 %v1661_v15, %v1603_v11  ;;  %3704 = vpow2.f32 %v2582_v17  ;;  %v2596_v45 = vmul.f32 1.442695, %v2506_v55  ;;  %v2444_v26 = vadd.f32 %v7412_v28, %v2165_v12  ;;  %v2074_v1 = vpop.permute.xlu1 %2073  ;;  %v7415_v17 = vld [vmem:[#allocation105_spill] sm:$0xff] }
 0x31e   : > { %2825 = vperm.xlu1 %3542, %v7411_v20   ;;  %v1699_v8 = vadd.f32 %v1698_v50, %v1604_v21  ;;  %3706 = vpow2.f32 %v2588_v19  ;;  %v2169_v22 = vmul.f32 %v5373_v10, %v5850_v31  ;;  %v1607_v56 = vmul.f32 %v7413_v36, %v1493_v52  ;;  %v1501_v11 = vpop.permute.xlu0 %1500 }
 0x31f   : > { %v1663_v16 = vadd.f32 %v1662_v43, %v7414_v38  ;;  %v5901_v24 = vpop.eup %3690  ;;  %3708 = vpow2.f32 %v2590_v14  ;;  %v2170_v46 = vmul.f32 %v5378_v44, %v5850_v31  ;;  %v1608_v55 = vmul.f32 %v7415_v17, %v1493_v52  ;;  %v7417_v43 = vld [vmem:[#allocation33_spill] sm:$0xff] }
 0x320   : > { %v1700_v12 = vadd.f32 %v1699_v8, %v5709_v32  ;;  %v5907_v15 = vpop.eup %3692  ;;  %v2598_v19 = vmul.f32 1.442695, %v2507_v49  ;;  %v2445_v21 = vadd.f32 %v7416_v61, %v2166_v48  ;;  %v2173_v50 = vmul.f32 %v5373_v10, %v2054_v59  ;;  %v7418_v49 = vld [vmem:[#allocation116_spill] sm:$0xff]  ;;  %v7419_v17 = vld [vmem:[#allocation109_spill] sm:$0xff] }
 0x321   : > { %v1664_v28 = vadd.f32 %v1663_v16, %v1607_v56  ;;  %v5912_v36 = vpop.eup %3694  ;;  %3710 = vpow2.f32 %v2596_v45  ;;  %v2510_v31 = vsub.f32 %v2444_v26, %v5510_v41  ;;  %v2174_v14 = vmul.f32 %v5378_v44, %v2054_v59  ;;  %v5916_v32 = vpop.permute.xlu1 %2083  ;;  %v7420_v16 = vld [vmem:[#allocation24_spill] sm:$0xff]  ;;  %v7422_v26 = vld [vmem:[#allocation111_spill] sm:$0xff]  ;;  %v7423_v59 = vld [vmem:[#allocation18_spill] sm:$0xff] }
 0x322   : > { %2833 = vperm.xlu1 %3542, %v7417_v43   ;;  %v1701_v52 = vadd.f32 %v1700_v12, %v1608_v55  ;;  %v5918_v8 = vpop.eup %3696  ;;  %v2448_v38 = vadd.f32 %v7418_v49, %v2169_v22  ;;  %v2177_v48 = vmul.f32 %v5373_v10, %v2064_v57  ;;  %v1611_v56 = vmul.f32 %v7419_v17, %v1501_v11  ;;  %v1509_v12 = vpop.permute.xlu0 %1508  ;;  %v7426_v49 = vld [vmem:[#allocation66_spill] sm:$0xff] }
 0x323   : > { %v1665_v61 = vadd.f32 %v1664_v28, %v7420_v16  ;;  %v2449_v34 = vadd.f32 %v7421_v62, %v2170_v46  ;;  %v2178_v45 = vmul.f32 %v5378_v44, %v2064_v57  ;;  %v1612_v33 = vmul.f32 %v7422_v26, %v1501_v11  ;;  %v7427_v28 = vld [vmem:[#allocation38_spill] sm:$0xff] }
 0x324   : > { %v1702_v55 = vadd.f32 %v1701_v52, %v7423_v59  ;;  %v5928_v7 = vpop.eup %3698  ;;  %v5932_v22 = vmul.f32 %v5373_v10, %v7425_v9  ;;  %3712 = vpow2.f32 %v2598_v19  ;;  %v2452_v17 = vadd.f32 %v7426_v49, %v2173_v50  ;;  %v7429_v11 = vld [vmem:[#allocation122_spill] sm:$0xff] }
 0x325   : > { %7424 = vst [vmem:[#allocation117_spill] sm:$0xff] %v5928_v7  ;;  %v1666_v47 = vadd.f32 %v1665_v61, %v1611_v56  ;;  %v5936_v62 = vpop.eup %3700  ;;  %v2511_v57 = vsub.f32 %v2445_v21, %v5510_v41  ;;  %v2604_v46 = vmul.f32 1.442695, %v2510_v31  ;;  %v2453_v52 = vadd.f32 %v7429_v11, %v2174_v14  ;;  %v5940_v26 = vpop.permute.xlu1 %2093  ;;  %v7431_v19 = vld [vmem:[#allocation74_spill] sm:$0xff]  ;;  %v7433_v61 = vld [vmem:[#allocation27_spill] sm:$0xff]  ;;  %v7435_v31 = vld [vmem:[#allocation125_spill] sm:$0xff] }
 0x326   : > { %2841 = vperm.xlu1 %3542, %v7427_v28   ;;  %7428 = vst [vmem:[#allocation65_spill] sm:$0xff] %v5936_v62  ;;  %v1703_v16 = vadd.f32 %v1702_v55, %v1612_v33  ;;  %v5942_v59 = vpop.eup %3702  ;;  %v2514_v60 = vsub.f32 %v2448_v38, %v5510_v41  ;;  %v2456_v43 = vadd.f32 %v7431_v19, %v2177_v48  ;;  %v7432_v50 = vld [vmem:[#allocation114_spill] sm:$0xff]  ;;  %v7436_v14 = vld [vmem:[#allocation73_spill] sm:$0xff]  ;;  %v1517_v7 = vpop.permute.xlu0 %1516 }
 0x327   : > { %7430 = vst [vmem:[#allocation120_spill] sm:$0xff] %v5942_v59  ;;  %v1615_v56 = vmul.f32 %v7432_v50, %v1509_v12  ;;  %v1667_v49 = vadd.f32 %v1666_v47, %v7433_v61  ;;  %v5948_v28 = vpop.eup %3704  ;;  %v2515_v21 = vsub.f32 %v2449_v34, %v5510_v41  ;;  %v2457_v62 = vadd.f32 %v7435_v31, %v2178_v45  ;;  %v7437_v55 = vld [vmem:[#allocation34_spill] sm:$0xff] }
 0x328   : > { %7434 = vst [vmem:[#allocation69_spill] sm:$0xff] %v5948_v28  ;;  %v1616_v33 = vmul.f32 %v7436_v14, %v1509_v12  ;;  %v1704_v11 = vadd.f32 %v1703_v16, %v7437_v55  ;;  %v5954_v59 = vpop.eup %3706  ;;  %v2518_v38 = vsub.f32 %v2452_v17, %v5510_v41  ;;  %v2181_v48 = vmul.f32 %v5373_v10, %v2074_v1  ;;  %v7441_v16 = vld [vmem:[#allocation39_spill] sm:$0xff]  ;;  %v7443_v55 = vld [vmem:[#allocation118_spill] sm:$0xff] }
 0x329   : > { %7438 = vst [vmem:[#allocation127_spill] sm:$0xff] %v5954_v59  ;;  %v2182_v19 = vmul.f32 %v5378_v44, %v2074_v1  ;;  %v1668_v47 = vadd.f32 %v1667_v49, %v1615_v56  ;;  %v7439_v50 = vmov 3   ;;  %v5960_v61 = vpop.eup %3708  ;;  %3714 = vpow2.f32 %v2604_v46  ;;  %v5964_v31 = vpop.permute.xlu1 %2103  ;;  %v7444_v1 = vld [vmem:[#allocation40_spill] sm:$0xff] }
 0x32a   : > { %3544 = vset.pattern.permute.xlu1 %v7439_v50  ;;  %7440 = vst [vmem:[#allocation131_spill] sm:$0xff] %v5960_v61  ;;  %v2606_v34 = vmul.f32 1.442695, %v2511_v57  ;;  %v2519_v45 = vsub.f32 %v2453_v52, %v5510_v41  ;;  %v1705_v12 = vadd.f32 %v1704_v11, %v1616_v33  ;;  %7442 = vst [vmem:[#allocation132_spill] sm:$0xff] %v5964_v31  ;;  %v2612_v14 = vmul.f32 1.442695, %v2514_v60  ;;  %v1525_v33 = vpop.permute.xlu0 %1524 }
 0x32b   : > { %3038 = vperm.xlu1 %3544, %v7441_v16   ;;  %v2522_v17 = vsub.f32 %v2456_v43, %v5510_v41  ;;  %v1619_v59 = vmul.f32 %v7443_v55, %v1517_v7  ;;  %v1669_v56 = vadd.f32 %v1668_v47, %v7444_v1  ;;  %v5969_v49 = vpop.eup %3710  ;;  %v2614_v50 = vmul.f32 1.442695, %v2515_v21  ;;  %v7445_v57 = vld [vmem:[#allocation119_spill] sm:$0xff]  ;;  %v7446_v16 = vld [vmem:[#allocation81_spill] sm:$0xff]  ;;  %v7447_v60 = vld [vmem:[#allocation142_spill] sm:$0xff] }
 0x32c   : > { %v2523_v46 = vsub.f32 %v2457_v62, %v5510_v41  ;;  %v1620_v61 = vmul.f32 %v7445_v57, %v1517_v7  ;;  %v1706_v52 = vadd.f32 %v1705_v12, %v5739_v51  ;;  %v2620_v11 = vmul.f32 1.442695, %v2518_v38  ;;  %v7448_v21 = vld [vmem:[#allocation42_spill] sm:$0xff]  ;;  %v7451_v38 = vld [vmem:[#allocation121_spill] sm:$0xff] }
 0x32d   : > { %v2460_v31 = vadd.f32 %v7446_v16, %v2181_v48  ;;  %v2461_v28 = vadd.f32 %v7447_v60, %v2182_v19  ;;  %v1670_v43 = vadd.f32 %v1669_v56, %v1619_v59  ;;  %3716 = vpow2.f32 %v2606_v34  ;;  %v5979_v62 = vpop.permute.xlu1 %2113  ;;  %v7452_v19 = vld [vmem:[#allocation123_spill] sm:$0xff] }
 0x32e   : > { %v2622_v55 = vmul.f32 1.442695, %v2519_v45  ;;  %v2185_v47 = vmul.f32 %v5373_v10, %v5916_v32  ;;  %v1707_v1 = vadd.f32 %v1706_v52, %v1620_v61  ;;  %7449 = vst [vmem:[#allocation135_spill] sm:$0xff] %v5979_v62  ;;  %v5981_v7 = vpop.eup %3712  ;;  %3718 = vpow2.f32 %v2612_v14  ;;  %v1533_v56 = vpop.permute.xlu0 %1532 }
 0x32f   : > { %3046 = vperm.xlu1 %3544, %v7448_v21   ;;  %7450 = vst [vmem:[#allocation57_spill] sm:$0xff] %v5981_v7  ;;  %v2628_v51 = vmul.f32 1.442695, %v2522_v17  ;;  %v1623_v12 = vmul.f32 %v7451_v38, %v1525_v33  ;;  %v1671_v48 = vadd.f32 %v1670_v43, %v5743_v0  ;;  %3720 = vpow2.f32 %v2614_v50  ;;  %v7453_v17 = vld [vmem:[#allocation129_spill] sm:$0xff]  ;;  %v7454_v50 = vld [vmem:[#allocation44_spill] sm:$0xff]  ;;  %v7458_v43 = vld [vmem:[#allocation126_spill] sm:$0xff] }
 0x330   : > { %v2630_v59 = vmul.f32 1.442695, %v2523_v46  ;;  %v1624_v34 = vmul.f32 %v7452_v19, %v1525_v33  ;;  %v1708_v45 = vadd.f32 %v1707_v1, %v5747_v4  ;;  %3722 = vpow2.f32 %v2620_v11  ;;  %v7455_v46 = vld [vmem:[#allocation76_spill] sm:$0xff]  ;;  %v7460_v1 = vld [vmem:[#allocation29_spill] sm:$0xff] }
 0x331   : > { %v2526_v61 = vsub.f32 %v2460_v31, %v5510_v41  ;;  %v2527_v57 = vsub.f32 %v2461_v28, %v5510_v41  ;;  %v1672_v52 = vadd.f32 %v1671_v48, %v1623_v12  ;;  %3724 = vpow2.f32 %v2622_v55  ;;  %v7456_v31 = vld [vmem:[#allocation103_spill] sm:$0xff]  ;;  %v2209_v28 = vpop.permute.xlu1 %2208 }
 0x332   : > { %v2186_v14 = vmul.f32 %v5378_v44, %v5916_v32  ;;  %v5992_v16 = vadd.f32 %v7453_v17, %v2185_v47  ;;  %v1709_v0 = vadd.f32 %v1708_v45, %v1624_v34  ;;  %v2138_v4 = vmul.f32 %v5378_v44, %v7425_v9  ;;  %v7459_v55 = vld [vmem:[#allocation67_spill] sm:$0xff]  ;;  %v1541_v38 = vpop.permute.xlu0 %1540 }
 0x333   : > { %3050 = vperm.xlu1 %3544, %v7454_v50   ;;  %3726 = vpow2.f32 %v2628_v51  ;;  %v1627_v33 = vmul.f32 %v7455_v46, %v1533_v56  ;;  %v1673_v11 = vadd.f32 %v1672_v52, %v7456_v31  ;;  %v5999_v60 = vpop.eup %3714  ;;  %v1628_v32 = vmul.f32 %v7458_v43, %v1533_v56  ;;  %v7461_v51 = vld [vmem:[#allocation55_spill] sm:$0xff]  ;;  %v7472_v52 = vld [vmem:[#allocation134_spill] sm:$0xff] }
 0x334   : > { %7457 = vst [vmem:[#allocation60_spill] sm:$0xff] %v5999_v60  ;;  %3728 = vpow2.f32 %v2630_v59  ;;  %v1710_v47 = vadd.f32 %v1709_v0, %v7459_v55  ;;  %v2352_v21 = vmul.f32 %v7460_v1, %v2209_v28  ;;  %v2636_v12 = vmul.f32 1.442695, %v2526_v61  ;;  %v7462_v34 = vld [vmem:[#allocation143_spill] sm:$0xff] }
 0x335   : > { %v6004_v48 = vmul.f32 1.442695, %v2527_v57  ;;  %v1674_v9 = vadd.f32 %v1673_v11, %v1627_v33  ;;  %v2353_v19 = vmul.f32 %v7461_v51, %v2209_v28  ;;  %v6008_v45 = vadd.f32 %v7462_v34, %v2186_v14  ;;  %v7463_v17 = vld [vmem:[#allocation47_spill] sm:$0xff]  ;;  %v7464_v57 = vld [vmem:[#allocation128_spill] sm:$0xff]  ;;  %v2213_v33 = vpop.permute.xlu1 %2212  ;;  %v7466_v11 = vld [vmem:[#allocation130_spill] sm:$0xff] }
 0x336   : > { %v1711_v59 = vadd.f32 %v1710_v47, %v1628_v32  ;;  %v2416_v56 = vadd.f32 %v2352_v21, %v5932_v22  ;;  %v6016_v0 = vmul.f32 %v5373_v10, %v5940_v26  ;;  %v1631_v50 = vmul.f32 %v7464_v57, %v1541_v38  ;;  %v1549_v32 = vpop.permute.xlu0 %1548  ;;  %v7468_v34 = vld [vmem:[#allocation32_spill] sm:$0xff] }
 0x337   : > { %3058 = vperm.xlu1 %3544, %v7463_v17   ;;  %v2417_v61 = vadd.f32 %v2353_v19, %v2138_v4  ;;  %v1675_v46 = vadd.f32 %v1674_v9, %v5765_v13  ;;  %v6020_v14 = vpop.eup %3716  ;;  %v1632_v28 = vmul.f32 %v7466_v11, %v1541_v38  ;;  %v2354_v43 = vmul.f32 %v7460_v1, %v2213_v33  ;;  %v7469_v38 = vld [vmem:[#allocation83_spill] sm:$0xff] }
 0x338   : > { %7465 = vst [vmem:[#allocation96_spill] sm:$0xff] %v6020_v14  ;;  %v2482_v31 = vsub.f32 %v2416_v56, %v5510_v41  ;;  %v1712_v22 = vadd.f32 %v1711_v59, %v5769_v58  ;;  %v6026_v55 = vpop.eup %3718  ;;  %3730 = vpow2.f32 %v2636_v12  ;;  %v2355_v13 = vmul.f32 %v7461_v51, %v2213_v33  ;;  %v7470_v58 = vld [vmem:[#allocation50_spill] sm:$0xff]  ;;  %v7471_v11 = vld [vmem:[#allocation59_spill] sm:$0xff] }
 0x339   : > { %v2483_v4 = vsub.f32 %v2417_v61, %v5510_v41  ;;  %v1676_v47 = vadd.f32 %v1675_v46, %v1631_v50  ;;  %v6030_v21 = vpop.eup %3720  ;;  %v2418_v56 = vadd.f32 %v2354_v43, %v7468_v34  ;;  %v1635_v17 = vmul.f32 %v7469_v38, %v1549_v32  ;;  %v2221_v46 = vpop.permute.xlu1 %2220 }
 0x33a   : > { %7467 = vst [vmem:[#allocation72_spill] sm:$0xff] %v6030_v21  ;;  %v2548_v9 = vmul.f32 1.442695, %v2482_v31  ;;  %v1713_v19 = vadd.f32 %v1712_v22, %v1632_v28  ;;  %v6035_v59 = vpop.eup %3722  ;;  %v2419_v12 = vadd.f32 %v2355_v13, %v7471_v11  ;;  %v1636_v61 = vmul.f32 %v7472_v52, %v1549_v32  ;;  %v1557_v43 = vpop.permute.xlu0 %1556  ;;  %v7478_v11 = vld [vmem:[#allocation35_spill] sm:$0xff] }
 0x33b   : > { %3066 = vperm.xlu1 %3544, %v7470_v58   ;;  %v2550_v57 = vmul.f32 1.442695, %v2483_v4  ;;  %v1677_v50 = vadd.f32 %v1676_v47, %v5773_v42  ;;  %v6040_v33 = vpop.eup %3724  ;;  %v2484_v31 = vsub.f32 %v2418_v56, %v5510_v41  ;;  %v2358_v22 = vmul.f32 %v7460_v1, %v2221_v46  ;;  %v7476_v56 = vld [vmem:[#allocation88_spill] sm:$0xff] }
 0x33c   : > { %7473 = vst [vmem:[#allocation97_spill] sm:$0xff] %v6040_v33  ;;  %3732 = vpow2.f32 %v2548_v9  ;;  %v1714_v28 = vadd.f32 %v1713_v19, %v5778_v23  ;;  %v2485_v4 = vsub.f32 %v2419_v12, %v5510_v41  ;;  %v2359_v52 = vmul.f32 %v7461_v51, %v2221_v46  ;;  %v7475_v9 = vld [vmem:[#allocation133_spill] sm:$0xff]  ;;  %v7477_v23 = vld [vmem:[#allocation54_spill] sm:$0xff] }
 0x33d   : > { %v6045_v34 = vpop.eup %3726  ;;  %3734 = vpow2.f32 %v2550_v57  ;;  %v1678_v13 = vadd.f32 %v1677_v50, %v1635_v17  ;;  %v2552_v32 = vmul.f32 1.442695, %v2484_v31  ;;  %v2422_v38 = vadd.f32 %v2358_v22, %v7475_v9  ;;  %v2229_v17 = vpop.permute.xlu1 %2228 }
 0x33e   : > { %7474 = vst [vmem:[#allocation107_spill] sm:$0xff] %v6045_v34  ;;  %v6049_v42 = vpop.eup %3728  ;;  %v1715_v47 = vadd.f32 %v1714_v28, %v1636_v61  ;;  %v1639_v58 = vmul.f32 %v7476_v56, %v1557_v43  ;;  %v2554_v19 = vmul.f32 1.442695, %v2485_v4  ;;  %v2423_v62 = vadd.f32 %v2359_v52, %v7478_v11  ;;  %v7479_v34 = vld [vmem:[#allocation137_spill] sm:$0xff]  ;;  %v1565_v31 = vpop.permute.xlu0 %1564  ;;  %v7484_v56 = vld [vmem:[#allocation15_spill] sm:$0xff] }
 0x33f   : > { %3074 = vperm.xlu1 %3544, %v7477_v23   ;;  %v1640_v57 = vmul.f32 %v7479_v34, %v1557_v43  ;;  %v1679_v12 = vadd.f32 %v1678_v13, %v5782_v2  ;;  %3736 = vpow2.f32 %v2552_v32  ;;  %v2488_v50 = vsub.f32 %v2422_v38, %v5510_v41  ;;  %v7480_v43 = vld [vmem:[#allocation21_spill] sm:$0xff]  ;;  %v7481_v2 = vld [vmem:[#allocation14_spill] sm:$0xff] }
 0x340   : > { %v1716_v46 = vadd.f32 %v1715_v47, %v5791_v35  ;;  %v2362_v61 = vmul.f32 %v7460_v1, %v2229_v17  ;;  %3738 = vpow2.f32 %v2554_v19  ;;  %v2489_v28 = vsub.f32 %v2423_v62, %v5510_v41  ;;  %v7483_v47 = vld [vmem:[#allocation136_spill] sm:$0xff] }
 0x341   : > { %v1680_v22 = vadd.f32 %v1679_v12, %v1639_v58  ;;  %v2363_v4 = vmul.f32 %v7461_v51, %v2229_v17  ;;  %v2560_v52 = vmul.f32 1.442695, %v2488_v50  ;;  %v1643_v13 = vmul.f32 %v7481_v2, %v1565_v31  ;;  %v2237_v58 = vpop.permute.xlu1 %2236  ;;  %v7489_v2 = vld [vmem:[#allocation139_spill] sm:$0xff] }
 0x342   : > { %v1717_v9 = vadd.f32 %v1716_v46, %v1640_v57  ;;  %v2426_v34 = vadd.f32 %v2362_v61, %v7480_v43  ;;  %v6065_v32 = vpop.eup %3730  ;;  %v2562_v35 = vmul.f32 1.442695, %v2489_v28  ;;  %v1644_v23 = vmul.f32 %v7484_v56, %v1565_v31  ;;  %v1573_v12 = vpop.permute.xlu0 %1572  ;;  %v7488_v43 = vld [vmem:[#allocation31_spill] sm:$0xff] }
 0x343   : > { %3082 = vperm.xlu1 %3544, %v7394_v3   ;;  %7482 = vst [vmem:[#allocation23_spill] sm:$0xff] %v6065_v32  ;;  %v2427_v38 = vadd.f32 %v2363_v4, %v7483_v47  ;;  %v1681_v62 = vadd.f32 %v1680_v22, %v5795_v53  ;;  %3740 = vpow2.f32 %v2560_v52  ;;  %v2366_v57 = vmul.f32 %v7460_v1, %v2237_v58  ;;  %v7486_v53 = vld [vmem:[#allocation26_spill] sm:$0xff] }
 0x344   : > { %v2492_v19 = vsub.f32 %v2426_v34, %v5510_v41  ;;  %v1718_v11 = vadd.f32 %v1717_v9, %v5802_v25  ;;  %3742 = vpow2.f32 %v2562_v35  ;;  %v2367_v50 = vmul.f32 %v7461_v51, %v2237_v58  ;;  %v7487_v22 = vld [vmem:[#allocation138_spill] sm:$0xff] }
 0x345   : > { %v2493_v3 = vsub.f32 %v2427_v38, %v5510_v41  ;;  %v1682_v17 = vadd.f32 %v1681_v62, %v1643_v13  ;;  %v2430_v28 = vadd.f32 %v2366_v57, %v7486_v53  ;;  %v1647_v4 = vmul.f32 %v7487_v22, %v1573_v12  ;;  %v2245_v35 = vpop.permute.xlu1 %2244 }
 0x346   : > { %v6075_v46 = vpop.eup %3732  ;;  %v2568_v61 = vmul.f32 1.442695, %v2492_v19  ;;  %v1719_v31 = vadd.f32 %v1718_v11, %v1644_v23  ;;  %v2431_v34 = vadd.f32 %v2367_v50, %v7488_v43  ;;  %v1648_v13 = vmul.f32 %v7489_v2, %v1573_v12  ;;  %v7493_v43 = vld [vmem:[#allocation17_spill] sm:$0xff] }
 0x347   : > { %7485 = vst [vmem:[#allocation98_spill] sm:$0xff] %v6075_v46  ;;  %3090 = vperm.xlu1 %3544, %v7397_v39   ;;  %v6080_v25 = vpop.eup %3734  ;;  %v2672_v52 = vadd.f32 %v6075_v46, %v5872_v18  ;;  %v2570_v9 = vmul.f32 1.442695, %v2493_v3  ;;  %v2496_v38 = vsub.f32 %v2430_v28, %v5510_v41  ;;  %v1683_v56 = vadd.f32 %v1682_v17, %v5810_v27  ;;  %v1581_v39 = vpop.permute.xlu0 %1580  ;;  %v7490_v3 = vld [vmem:[#allocation16_spill] sm:$0xff] }
 0x348   : > { %v2709_v47 = vadd.f32 %v6080_v25, %v5886_v63  ;;  %3744 = vpow2.f32 %v2568_v61  ;;  %v2497_v23 = vsub.f32 %v2431_v34, %v5510_v41  ;;  %v1720_v62 = vadd.f32 %v1719_v31, %v5814_v54  ;;  %v7491_v28 = vld [vmem:[#allocation36_spill] sm:$0xff] }
 0x349   : > { %3746 = vpow2.f32 %v2570_v9  ;;  %v2370_v58 = vmul.f32 %v7460_v1, %v2245_v35  ;;  %v6093_v19 = vpop.eup %3736  ;;  %v2576_v11 = vmul.f32 1.442695, %v2496_v38  ;;  %v1684_v57 = vadd.f32 %v1683_v56, %v1647_v4  ;;  %v2253_v31 = vpop.permute.xlu1 %2252  ;;  %v7492_v9 = vld [vmem:[#allocation41_spill] sm:$0xff] }
 0x34a   : > { %v2371_v12 = vmul.f32 %v7461_v51, %v2245_v35  ;;  %v1651_v50 = vmul.f32 %v7490_v3, %v1581_v39  ;;  %v6098_v61 = vpop.eup %3738  ;;  %v2673_v27 = vadd.f32 %v6093_v19, %v2672_v52  ;;  %v2578_v17 = vmul.f32 1.442695, %v2497_v23 }
 0x34b   : > { %3098 = vperm.xlu1 %3544, %v7401_v37   ;;  %v1721_v53 = vadd.f32 %v1720_v62, %v1648_v13  ;;  %v2434_v54 = vadd.f32 %v2370_v58, %v7491_v28  ;;  %v2710_v22 = vadd.f32 %v6098_v61, %v2709_v47  ;;  %3748 = vpow2.f32 %v2576_v11  ;;  %v1589_v23 = vpop.permute.xlu0 %1588  ;;  %v7495_v28 = vld [vmem:[#allocation9_spill] sm:$0xff] }
 0x34c   : > { %v2435_v4 = vadd.f32 %v2371_v12, %v7492_v9  ;;  %v1652_v34 = vmul.f32 %v7493_v43, %v1581_v39  ;;  %v2674_v2 = vadd.f32 %v5901_v24, %v2673_v27  ;;  %3750 = vpow2.f32 %v2578_v17  ;;  %v7494_v17 = vld [vmem:[#allocation7_spill] sm:$0xff] }
 0x34d   : > { %v2500_v37 = vsub.f32 %v2434_v54, %v5510_v41  ;;  %v1685_v35 = vadd.f32 %v1684_v57, %v5822_v30  ;;  %v6108_v52 = vpop.eup %3740  ;;  %v2711_v13 = vadd.f32 %v5907_v15, %v2710_v22  ;;  %v1722_v47 = vadd.f32 %v1721_v53, %v5831_v40  ;;  %v2261_v57 = vpop.permute.xlu1 %2260  ;;  %v7496_v54 = vld [vmem:[#allocation19_spill] sm:$0xff] }
 0x34e   : > { %v2501_v38 = vsub.f32 %v2435_v4, %v5510_v41  ;;  %v2374_v56 = vmul.f32 %v7460_v1, %v2253_v31  ;;  %v6115_v39 = vpop.eup %3742  ;;  %v2675_v62 = vadd.f32 %v6108_v52, %v2674_v2  ;;  %v2375_v30 = vmul.f32 %v7461_v51, %v2253_v31  ;;  %v7497_v4 = vld [vmem:[#allocation71_spill] sm:$0xff] }
 0x34f   : > { %3106 = vperm.xlu1 %3544, %v7406_v6   ;;  %v2584_v58 = vmul.f32 1.442695, %v2500_v37  ;;  %v1686_v11 = vadd.f32 %v1685_v35, %v1651_v50  ;;  %v2712_v12 = vadd.f32 %v6115_v39, %v2711_v13  ;;  %v1723_v27 = vadd.f32 %v1722_v47, %v1652_v34 }
 0x350   : > { %v2586_v3 = vmul.f32 1.442695, %v2501_v38  ;;  %v2438_v40 = vadd.f32 %v2374_v56, %v7494_v17  ;;  %v2676_v53 = vadd.f32 %v5912_v36, %v2675_v62  ;;  %v2439_v6 = vadd.f32 %v2375_v30, %v7495_v28  ;;  %v7503_v28 = vld [vmem:[#allocation33_spill] sm:$0xff] }
 0x351   : > { %3752 = vpow2.f32 %v2584_v58  ;;  %v1655_v22 = vmul.f32 %v7496_v54, %v1589_v23  ;;  %v2713_v50 = vadd.f32 %v5918_v8, %v2712_v12  ;;  %v1656_v43 = vmul.f32 %v7497_v4, %v1589_v23  ;;  %v2269_v38 = vpop.permute.xlu1 %2268  ;;  %v7498_v58 = vld [vmem:[#allocation117_spill] sm:$0xff]  ;;  %v7505_v54 = vld [vmem:[#allocation112_spill] sm:$0xff] }
 0x352   : > { %v6124_v9 = vpop.eup %3744  ;;  %3754 = vpow2.f32 %v2586_v3  ;;  %v2504_v31 = vsub.f32 %v2438_v40, %v5510_v41  ;;  %v2505_v37 = vsub.f32 %v2439_v6, %v5510_v41  ;;  %v1687_v35 = vadd.f32 %v1686_v11, %v5838_v5  ;;  %v7500_v40 = vld [vmem:[#allocation65_spill] sm:$0xff]  ;;  %v7501_v5 = vld [vmem:[#allocation8_spill] sm:$0xff]  ;;  %v7502_v11 = vld [vmem:[#allocation10_spill] sm:$0xff] }
 0x353   : > { %3114 = vperm.xlu1 %3544, %v7411_v20   ;;  %v6130_v34 = vpop.eup %3746  ;;  %v2677_v2 = vadd.f32 %v6124_v9, %v2676_v53  ;;  %v1724_v13 = vadd.f32 %v1723_v27, %v5846_v29  ;;  %v2378_v62 = vmul.f32 %v7460_v1, %v2261_v57  ;;  %v2379_v23 = vmul.f32 %v7461_v51, %v2261_v57 }
 0x354   : > { %v2714_v47 = vadd.f32 %v6130_v34, %v2713_v50  ;;  %v2592_v56 = vmul.f32 1.442695, %v2504_v31  ;;  %v2594_v30 = vmul.f32 1.442695, %v2505_v37  ;;  %v1688_v12 = vadd.f32 %v1687_v35, %v1655_v22  ;;  %v7506_v22 = vld [vmem:[#allocation113_spill] sm:$0xff] }
 0x355   : > { %v2678_v20 = vadd.f32 %v7498_v58, %v2677_v2  ;;  %v1725_v3 = vadd.f32 %v1724_v13, %v1656_v43  ;;  %v6140_v17 = vpop.eup %3748  ;;  %v2442_v29 = vadd.f32 %v2378_v62, %v7501_v5  ;;  %v2443_v27 = vadd.f32 %v2379_v23, %v7502_v11  ;;  %v2277_v4 = vpop.permute.xlu1 %2276  ;;  %v7507_v13 = vld [vmem:[#allocation120_spill] sm:$0xff]  ;;  %v7508_v23 = vld [vmem:[#allocation69_spill] sm:$0xff] }
 0x356   : > { %7499 = vst [vmem:[#allocation37_spill] sm:$0xff] %v6140_v17  ;;  %v2715_v53 = vadd.f32 %v7500_v40, %v2714_v47  ;;  %3756 = vpow2.f32 %v2592_v56  ;;  %v6146_v6 = vpop.eup %3750  ;;  %v1689_v50 = vadd.f32 %v1688_v12, %v7505_v54  ;;  %v6153_v43 = vmul.f32 %v5378_v44, %v5940_v26  ;;  %v7509_v26 = vld [vmem:[#allocation38_spill] sm:$0xff] }
 0x357   : > { %3122 = vperm.xlu1 %3544, %v7503_v28   ;;  %7504 = vst [vmem:[#allocation99_spill] sm:$0xff] %v6146_v6  ;;  %v2679_v57 = vadd.f32 %v6140_v17, %v2678_v20  ;;  %3758 = vpow2.f32 %v2594_v30  ;;  %v1726_v31 = vadd.f32 %v1725_v3, %v7506_v22  ;;  %v2508_v37 = vsub.f32 %v2442_v29, %v5510_v41 }
 0x358   : > { %v2716_v2 = vadd.f32 %v6146_v6, %v2715_v53  ;;  %v2509_v35 = vsub.f32 %v2443_v27, %v5510_v41  ;;  %3760 = vpow2.f32 %v6004_v48  ;;  %v1690_v56 = vrot.slane %v1689_v50, 4 }
 0x359   : > { %v2680_v47 = vadd.f32 %v7507_v13, %v2679_v57  ;;  %v1727_v62 = vrot.slane %v1726_v31, 4  ;;  %v2600_v30 = vmul.f32 1.442695, %v2508_v37  ;;  %v2382_v3 = vmul.f32 %v7460_v1, %v2269_v38  ;;  %v2285_v27 = vpop.permute.xlu1 %2284 }
 0x35a   : > { %v2717_v20 = vadd.f32 %v7508_v23, %v2716_v2  ;;  %v2602_v12 = vmul.f32 1.442695, %v2509_v35  ;;  %v2531_v53 = vsub.f32 %v6008_v45, %v5510_v41  ;;  %v1691_v29 = vadd.f32 %v1690_v56, %v1689_v50  ;;  %v7513_v2 = vld [vmem:[#allocation77_spill] sm:$0xff]  ;;  %v7514_v50 = vld [vmem:[#allocation127_spill] sm:$0xff] }
 0x35b   : > { %3130 = vperm.xlu1 %3544, %v7509_v26   ;;  %v6163_v5 = vpop.eup %3752  ;;  %v1728_v11 = vadd.f32 %v1727_v62, %v1726_v31  ;;  %v2383_v48 = vmul.f32 %v7461_v51, %v2269_v38  ;;  %v7512_v57 = vsub.f32 %v5992_v16, %v5510_v41  ;;  %3762 = vpow2.f32 %v2600_v30  ;;  %v7515_v38 = vld [vmem:[#allocation79_spill] sm:$0xff] }
 0x35c   : > { %7510 = vst [vmem:[#allocation100_spill] sm:$0xff] %v6163_v5  ;;  %v6168_v28 = vpop.eup %3754  ;;  %v2681_v22 = vadd.f32 %v6163_v5, %v2680_v47  ;;  %v2446_v37 = vadd.f32 %v2382_v3, %v7513_v2  ;;  %v1692_v26 = vrot.slane %v1691_v29, 2  ;;  %3764 = vpow2.f32 %v2602_v12 }
 0x35d   : > { %7511 = vst [vmem:[#allocation28_spill] sm:$0xff] %v6168_v28  ;;  %v2644_v54 = vmul.f32 1.442695, %v7512_v57  ;;  %v2718_v35 = vadd.f32 %v6168_v28, %v2717_v20  ;;  %v1729_v45 = vrot.slane %v1728_v11, 2  ;;  %v2447_v56 = vadd.f32 %v2383_v48, %v7515_v38  ;;  %v7517_v57 = vld [vmem:[#allocation131_spill] sm:$0xff]  ;;  %v2293_v2 = vpop.permute.xlu1 %2292 }
 0x35e   : > { %v2682_v31 = vadd.f32 %v7514_v50, %v2681_v22  ;;  %v2512_v62 = vsub.f32 %v2446_v37, %v5510_v41  ;;  %v2386_v23 = vmul.f32 %v7460_v1, %v2277_v4  ;;  %v7516_v16 = vmov 2   ;;  %v7518_v20 = vld [vmem:[#allocation43_spill] sm:$0xff]  ;;  %v7520_v37 = vld [vmem:[#allocation80_spill] sm:$0xff] }
 0x35f   : > { %3545 = vset.pattern.permute.xlu1 %v7516_v16  ;;  %v2719_v47 = vadd.f32 %v7517_v57, %v2718_v35  ;;  %v1693_v30 = vadd.f32 %v1692_v26, %v1691_v29  ;;  %v1730_v5 = vadd.f32 %v1729_v45, %v1728_v11  ;;  %v2387_v3 = vmul.f32 %v7461_v51, %v2277_v4  ;;  %v7522_v11 = vld [vmem:[#allocation82_spill] sm:$0xff] }
 0x360   : > { %2849 = vperm.xlu1 %3545, %v7518_v20   ;;  %v6184_v12 = vpop.eup %3756  ;;  %3766 = vpow2.f32 %v2644_v54  ;;  %v2513_v48 = vsub.f32 %v2447_v56, %v5510_v41  ;;  %v2608_v22 = vmul.f32 1.442695, %v2512_v62  ;;  %v2450_v38 = vadd.f32 %v2386_v23, %v7520_v37  ;;  %v7524_v57 = vld [vmem:[#allocation46_spill] sm:$0xff] }
 0x361   : > { %7519 = vst [vmem:[#allocation110_spill] sm:$0xff] %v6184_v12  ;;  %v6188_v50 = vpop.eup %3758  ;;  %v2683_v16 = vadd.f32 %v6184_v12, %v2682_v31  ;;  %v1694_v35 = vrot.slane %v1693_v30, 1  ;;  %v1731_v29 = vrot.slane %v1730_v5, 1  ;;  %v2451_v26 = vadd.f32 %v2387_v3, %v7522_v11  ;;  %v2301_v31 = vpop.permute.xlu1 %2300  ;;  %v7525_v12 = vld [vmem:[#allocation11_spill] sm:$0xff]  ;;  %v7527_v11 = vld [vmem:[#allocation124_spill] sm:$0xff] }
 0x362   : > { %7521 = vst [vmem:[#allocation104_spill] sm:$0xff] %v6188_v50  ;;  %v2720_v4 = vadd.f32 %v6188_v50, %v2719_v47  ;;  %3768 = vpow2.f32 %v2608_v22  ;;  %v2610_v45 = vmul.f32 1.442695, %v2513_v48  ;;  %v2516_v20 = vsub.f32 %v2450_v38, %v5510_v41  ;;  %v6194_v54 = vpop.eup %3760  ;;  %v7526_v22 = vld [vmem:[#allocation22_spill] sm:$0xff] }
 0x363   : > { %7523 = vst [vmem:[#allocation70_spill] sm:$0xff] %v6194_v54  ;;  %v1695_v56 = vadd.f32 %v1694_v35, %v1693_v30  ;;  %v1732_v62 = vadd.f32 %v1731_v29, %v1730_v5  ;;  %v2684_v23 = vadd.f32 %v5969_v49, %v2683_v16  ;;  %v2517_v37 = vsub.f32 %v2451_v26, %v5510_v41 }
 0x364   : > { %2853 = vperm.xlu1 %3545, %v7524_v57   ;;  %v6201_v3 = vadd.f32 %v7525_v12, %v6016_v0  ;;  %v2721_v47 = vadd.f32 %v5981_v7, %v2720_v4  ;;  %3770 = vpow2.f32 %v2610_v45  ;;  %v2616_v48 = vmul.f32 1.442695, %v2516_v20  ;;  %v7529_v57 = vld [vmem:[#allocation145_spill] sm:$0xff]  ;;  %v7531_v20 = vld [vmem:[#allocation84_spill] sm:$0xff] }
 0x365   : > { %v1735_v38 = vmul.f32 %v7526_v22, %v1695_v56  ;;  %v1736_v30 = vmul.f32 %v7527_v11, %v1732_v62  ;;  %v2618_v5 = vmul.f32 1.442695, %v2517_v37  ;;  %v2390_v16 = vmul.f32 %v7460_v1, %v2285_v27  ;;  %v6207_v35 = vpop.eup %3762  ;;  %v7532_v62 = vld [vmem:[#allocation48_spill] sm:$0xff]  ;;  %v2309_v37 = vpop.permute.xlu1 %2308  ;;  %v7533_v22 = vld [vmem:[#allocation30_spill] sm:$0xff] }
 0x366   : > { %7528 = vst [vmem:[#allocation105_spill] sm:$0xff] %v6207_v35  ;;  %v2646_v29 = vmul.f32 1.442695, %v2531_v53  ;;  %v6211_v26 = vadd.f32 %v7529_v57, %v6153_v43  ;;  %3772 = vpow2.f32 %v2616_v48  ;;  %v2391_v0 = vmul.f32 %v7461_v51, %v2285_v27  ;;  %v6214_v12 = vpop.eup %3764  ;;  %v1734_v57 = vld [vmem:[#allocation2 + $0x1] ss:$2 sm:$0x3] }
 0x367   : > { %7530 = vst [vmem:[#allocation115_spill] sm:$0xff] %v6214_v12  ;;  %v1739_v4 = vcombine.low %v1735_v38, %v1736_v30  ;;  %v2685_v45 = vadd.f32 %v6207_v35, %v2684_v23  ;;  %3774 = vpow2.f32 %v2618_v5  ;;  %v2454_v56 = vadd.f32 %v2390_v16, %v7531_v20  ;;  %v7534_v38 = vld [vmem:[#allocation52_spill] sm:$0xff]  ;;  %v7536_v20 = vld [vmem:[#allocation86_spill] sm:$0xff] }
 0x368   : > { %2857 = vperm.xlu1 %3545, %v7532_v62   ;;  %v2722_v53 = vadd.f32 %v6214_v12, %v2721_v47  ;;  %v2455_v11 = vadd.f32 %v2391_v0, %v7533_v22  ;;  %v2394_v43 = vmul.f32 %v7460_v1, %v2293_v2  ;;  %v2395_v48 = vmul.f32 %v7461_v51, %v2293_v2  ;;  %v7537_v2 = vld [vmem:[#allocation87_spill] sm:$0xff] }
 0x369   : > { %v2534_v27 = vsub.f32 %v6201_v3, %v5510_v41  ;;  %v1746_v30 = vrot.slane %v1739_v4, %v7534_v38  ;;  %v2686_v23 = vadd.f32 %v5999_v60, %v2685_v45  ;;  %v2520_v5 = vsub.f32 %v2454_v56, %v5510_v41  ;;  %v7538_v56 = vld [vmem:[#allocation51_spill] sm:$0xff]  ;;  %v2317_v60 = vpop.permute.xlu1 %2316 }
 0x36a   : > { %v6228_v16 = vpop.eup %3766  ;;  %v2535_v47 = vsub.f32 %v6211_v26, %v5510_v41  ;;  %v2521_v0 = vsub.f32 %v2455_v11, %v5510_v41  ;;  %v2458_v62 = vadd.f32 %v2394_v43, %v7536_v20  ;;  %v2459_v22 = vadd.f32 %v2395_v48, %v7537_v2 }
 0x36b   : > { %7535 = vst [vmem:[#allocation116_spill] sm:$0xff] %v6228_v16  ;;  %v1753_v3 = vrot.slane %v1746_v30, %v7534_v38  ;;  %v2723_v4 = vadd.f32 %v6020_v14, %v2722_v53  ;;  %v2624_v12 = vmul.f32 1.442695, %v2520_v5  ;;  %v2398_v45 = vmul.f32 %v7460_v1, %v2301_v31  ;;  %v7539_v53 = vld [vmem:[#allocation90_spill] sm:$0xff]  ;;  %v7540_v38 = vld [vmem:[#allocation91_spill] sm:$0xff] }
 0x36c   : > { %2861 = vperm.xlu1 %3545, %v7538_v56   ;;  %v6239_v35 = vpop.eup %3768  ;;  %v2626_v26 = vmul.f32 1.442695, %v2521_v0  ;;  %v2524_v7 = vsub.f32 %v2458_v62, %v5510_v41  ;;  %v2525_v11 = vsub.f32 %v2459_v22, %v5510_v41  ;;  %v2399_v43 = vmul.f32 %v7461_v51, %v2301_v31  ;;  %v7545_v0 = vld [vmem:[#allocation56_spill] sm:$0xff] }
 0x36d   : > { %v1755_v48 = vadd.f32 %v1753_v3, %v1734_v57  ;;  %v2687_v30 = vadd.f32 %v6239_v35, %v2686_v23  ;;  %3776 = vpow2.f32 %v2624_v12  ;;  %v2462_v5 = vadd.f32 %v2398_v45, %v7539_v53  ;;  %v7542_v12 = vld [vmem:[#allocation53_spill] sm:$0xff]  ;;  %v2325_v57 = vpop.permute.xlu1 %2324  ;;  %v7543_v3 = vld [vmem:[#allocation132_spill] sm:$0xff] }
 0x36e   : > { %v6246_v20 = vpop.eup %3770  ;;  %3778 = vpow2.f32 %v2626_v26  ;;  %v2632_v2 = vmul.f32 1.442695, %v2524_v7  ;;  %v2634_v56 = vmul.f32 1.442695, %v2525_v11  ;;  %v2463_v14 = vadd.f32 %v2399_v43, %v7540_v38  ;;  %v7544_v53 = vld [vmem:[#allocation92_spill] sm:$0xff] }
 0x36f   : > { %3780 = vpow2.f32 %v2646_v29  ;;  %1756 = vst.msk [vmem:[#allocation2 + $0x1] ss:$2 sm:$0x3] %vm5468_vm4, %v1755_v48  ;;  %v2724_v62 = vadd.f32 %v6246_v20, %v2723_v4  ;;  %v2688_v31 = vadd.f32 %v6026_v55, %v2687_v30  ;;  %v2528_v23 = vsub.f32 %v2462_v5, %v5510_v41 }
 0x370   : > { %2865 = vperm.xlu1 %3545, %v7542_v12   ;;  %v6255_v22 = vpop.eup %3772  ;;  %v2193_v7 = vmul.f32 %v5373_v10, %v7543_v3  ;;  %3782 = vpow2.f32 %v2632_v2  ;;  %v2529_v29 = vsub.f32 %v2463_v14, %v5510_v41  ;;  %v2402_v38 = vmul.f32 %v7460_v1, %v2309_v37 }
 0x371   : > { %v6261_v45 = vpop.eup %3774  ;;  %v2689_v4 = vadd.f32 %v6255_v22, %v2688_v31  ;;  %v2725_v26 = vadd.f32 %v6030_v21, %v2724_v62  ;;  %3784 = vpow2.f32 %v2634_v56  ;;  %v2640_v11 = vmul.f32 1.442695, %v2528_v23  ;;  %v7546_v62 = vld [vmem:[#allocation93_spill] sm:$0xff] }
 0x372   : > { %v2194_v43 = vmul.f32 %v5378_v44, %v7543_v3  ;;  %v2642_v48 = vmul.f32 1.442695, %v2529_v29  ;;  %v2403_v30 = vmul.f32 %v7461_v51, %v2309_v37  ;;  %v2466_v5 = vadd.f32 %v2402_v38, %v7544_v53  ;;  %v2750_v3 = vpop.permute.xlu1 %2749  ;;  %v7547_v37 = vld [vmem:[#allocation12_spill] sm:$0xff]  ;;  %v7550_v53 = vld [vmem:[#allocation146_spill] sm:$0xff] }
 0x373   : > { %v2652_v2 = vmul.f32 1.442695, %v2534_v27  ;;  %v2726_v14 = vadd.f32 %v6261_v45, %v2725_v26  ;;  %v2690_v12 = vadd.f32 %v6035_v59, %v2689_v4  ;;  %3786 = vpow2.f32 %v2640_v11  ;;  %v7548_v11 = vld [vmem:[#allocation61_spill] sm:$0xff] }
 0x374   : > { %2869 = vperm.xlu1 %3545, %v7545_v0   ;;  %3788 = vpow2.f32 %v2642_v48  ;;  %v2467_v56 = vadd.f32 %v2403_v30, %v7546_v62  ;;  %v2532_v31 = vsub.f32 %v2466_v5, %v5510_v41  ;;  %v2406_v23 = vmul.f32 %v7460_v1, %v2317_v60  ;;  %v7551_v62 = vld [vmem:[#allocation140_spill] sm:$0xff] }
 0x375   : > { %v2654_v29 = vmul.f32 1.442695, %v2535_v47  ;;  %v2472_v44 = vadd.f32 %v7547_v37, %v2193_v7  ;;  %v2727_v27 = vadd.f32 %v6040_v33, %v2726_v14  ;;  %v2407_v38 = vmul.f32 %v7461_v51, %v2317_v60  ;;  %v7552_v37 = vld [vmem:[#allocation58_spill] sm:$0xff] }
 0x376   : > { %v2533_v4 = vsub.f32 %v2467_v56, %v5510_v41  ;;  %v2648_v26 = vmul.f32 1.442695, %v2532_v31  ;;  %v2470_v0 = vadd.f32 %v2406_v23, %v7548_v11  ;;  %v2410_v48 = vmul.f32 %v7460_v1, %v2325_v57  ;;  %v2758_v23 = vpop.permute.xlu1 %2757  ;;  %v7558_v1 = vld [vmem:[#allocation141_spill] sm:$0xff] }
 0x377   : > { %v6281_v30 = vpop.eup %3776  ;;  %3790 = vpow2.f32 %v2652_v2  ;;  %v2473_v5 = vadd.f32 %v7550_v53, %v2194_v43  ;;  %v2471_v47 = vadd.f32 %v2407_v38, %v7551_v62  ;;  %v2411_v7 = vmul.f32 %v7461_v51, %v2325_v57  ;;  %v7554_v57 = vld [vmem:[#allocation95_spill] sm:$0xff] }
 0x378   : > { %7549 = vst [vmem:[#allocation109_spill] sm:$0xff] %v6281_v30  ;;  %2873 = vperm.xlu1 %3545, %v7552_v37   ;;  %v6287_v14 = vpop.eup %3778  ;;  %v2691_v60 = vadd.f32 %v6281_v30, %v2690_v12  ;;  %3792 = vpow2.f32 %v2648_v26  ;;  %v2650_v56 = vmul.f32 1.442695, %v2533_v4  ;;  %v2536_v31 = vsub.f32 %v2470_v0, %v5510_v41  ;;  %v6299_v37 = vpop.permute.xlu0 %3042  ;;  %v7557_v12 = vld [vmem:[#allocation107_spill] sm:$0xff] }
 0x379   : > { %v6291_v11 = vpop.eup %3780  ;;  %v2538_v2 = vsub.f32 %v2472_v44, %v5510_v41  ;;  %v2728_v43 = vadd.f32 %v6287_v14, %v2727_v27  ;;  %v2537_v38 = vsub.f32 %v2471_v47, %v5510_v41  ;;  %v2474_v53 = vadd.f32 %v2410_v48, %v7554_v57  ;;  %7556 = vst [vmem:[#allocation111_spill] sm:$0xff] %v6299_v37 }
 0x37a   : > { %7553 = vst [vmem:[#allocation24_spill] sm:$0xff] %v6291_v11  ;;  %v6297_v62 = vpop.eup %3782  ;;  %v2692_v26 = vadd.f32 %v7557_v12, %v2691_v60  ;;  %3794 = vpow2.f32 %v2650_v56  ;;  %v2656_v4 = vmul.f32 1.442695, %v2536_v31  ;;  %v2475_v27 = vadd.f32 %v2411_v7, %v7558_v1  ;;  %v2762_v10 = vpop.permute.xlu1 %2761  ;;  %v7559_v7 = vld [vmem:[#allocation20_spill] sm:$0xff] }
 0x37b   : > { %7555 = vst [vmem:[#allocation64_spill] sm:$0xff] %v6297_v62  ;;  %v6302_v0 = vpop.eup %3784  ;;  %3796 = vpow2.f32 %v2654_v29  ;;  %v2729_v51 = vadd.f32 %v6049_v42, %v2728_v43  ;;  %v2658_v44 = vmul.f32 1.442695, %v2537_v38  ;;  %v2539_v47 = vsub.f32 %v2473_v5, %v5510_v41 }
 0x37c   : > { %v2693_v48 = vadd.f32 %v6297_v62, %v2692_v26  ;;  %3798 = vpow2.f32 %v2656_v4  ;;  %v2876_v57 = vmul.f32 %v5872_v18, %v2750_v3  ;;  %v2660_v60 = vmul.f32 1.442695, %v2538_v2  ;;  %v6323_v4 = vpop.permute.xlu0 %3054 }
 0x37d   : > { %v6309_v37 = vpop.eup %3786  ;;  %v2730_v56 = vadd.f32 %v6302_v0, %v2729_v51  ;;  %3800 = vpow2.f32 %v2658_v44  ;;  %v2540_v29 = vsub.f32 %v2474_v53, %v5510_v41  ;;  %v2877_v5 = vmul.f32 %v5886_v63, %v2750_v3  ;;  %7560 = vst [vmem:[#allocation18_spill] sm:$0xff] %v6323_v4 }
 0x37e   : > { %v6313_v31 = vpop.eup %3788  ;;  %v2694_v1 = vadd.f32 %v6065_v32, %v2693_v48  ;;  %v2878_v43 = vmul.f32 %v6075_v46, %v7559_v7  ;;  %v2879_v38 = vmul.f32 %v6080_v25, %v7559_v7  ;;  %v2541_v2 = vsub.f32 %v2475_v27, %v5510_v41  ;;  %v2770_v48 = vpop.permute.xlu1 %2769 }
 0x37f   : > { %v2731_v26 = vadd.f32 %v6194_v54, %v2730_v56  ;;  %v2662_v51 = vmul.f32 1.442695, %v2539_v47  ;;  %3802 = vpow2.f32 %v2660_v60  ;;  %v2880_v46 = vmul.f32 %v6093_v19, %v2758_v23 }
 0x380   : > { %v2695_v53 = vadd.f32 %v6309_v37, %v2694_v1  ;;  %v2940_v44 = vadd.f32 %v2878_v43, %v2876_v57  ;;  %v2977_v18 = vadd.f32 %v2879_v38, %v2877_v5  ;;  %v2881_v7 = vmul.f32 %v6098_v61, %v2758_v23  ;;  %v7564_v23 = vld [vmem:[#allocation45_spill] sm:$0xff] }
 0x381   : > { %v6326_v32 = vpop.eup %3790  ;;  %v2732_v3 = vadd.f32 %v6313_v31, %v2731_v26  ;;  %v2664_v47 = vmul.f32 1.442695, %v2540_v29  ;;  %v2882_v41 = vmul.f32 %v5901_v24, %v2762_v10  ;;  %v2883_v57 = vmul.f32 %v5907_v15, %v2762_v10 }
 0x382   : > { %7561 = vst [vmem:[#allocation62_spill] sm:$0xff] %v6326_v32  ;;  %v6331_v56 = vpop.eup %3792  ;;  %v2696_v27 = vadd.f32 %v6228_v16, %v2695_v53  ;;  %v2666_v5 = vmul.f32 1.442695, %v2541_v2  ;;  %v2941_v43 = vadd.f32 %v2940_v44, %v2880_v46  ;;  %v2978_v60 = vadd.f32 %v2977_v18, %v2881_v7  ;;  %v2778_v53 = vpop.permute.xlu1 %2777 }
 0x383   : > { %7562 = vst [vmem:[#allocation66_spill] sm:$0xff] %v6331_v56  ;;  %v2733_v1 = vadd.f32 %v6291_v11, %v2732_v3  ;;  %3804 = vpow2.f32 %v2662_v51  ;;  %v2884_v4 = vmul.f32 %v6108_v52, %v7564_v23  ;;  %v2885_v29 = vmul.f32 %v6115_v39, %v7564_v23  ;;  %v6350_v51 = vpop.permute.xlu0 %3062 }
 0x384   : > { %v6337_v38 = vpop.eup %3794  ;;  %v2697_v26 = vadd.f32 %v6331_v56, %v2696_v27  ;;  %v2942_v3 = vadd.f32 %v2941_v43, %v2882_v41  ;;  %v2979_v2 = vadd.f32 %v2978_v60, %v2883_v57  ;;  %v2886_v18 = vmul.f32 %v5912_v36, %v2770_v48  ;;  %v7568_v57 = vld [vmem:[#allocation68_spill] sm:$0xff] }
 0x385   : > { %7563 = vst [vmem:[#allocation122_spill] sm:$0xff] %v6337_v38  ;;  %v6344_v16 = vpop.eup %3796  ;;  %v2734_v10 = vadd.f32 %v6337_v38, %v2733_v1  ;;  %3806 = vpow2.f32 %v2664_v47  ;;  %v2887_v7 = vmul.f32 %v5918_v8, %v2770_v48  ;;  %v2888_v43 = vmul.f32 %v6124_v9, %v7568_v57 }
 0x386   : > { %7565 = vst [vmem:[#allocation74_spill] sm:$0xff] %v6344_v16  ;;  %v6348_v46 = vpop.eup %3798  ;;  %v2698_v44 = vadd.f32 %v6326_v32, %v2697_v26  ;;  %3808 = vpow2.f32 %v2666_v5  ;;  %v2943_v56 = vadd.f32 %v2942_v3, %v2884_v4  ;;  %v2980_v1 = vadd.f32 %v2979_v2, %v2885_v29  ;;  %v7570_v2 = vld [vmem:[#allocation78_spill] sm:$0xff] }
 0x387   : > { %7566 = vst [vmem:[#allocation114_spill] sm:$0xff] %v6348_v46  ;;  %v6354_v27 = vpop.eup %3800  ;;  %v2735_v23 = vadd.f32 %v6344_v16, %v2734_v10  ;;  %v2889_v60 = vmul.f32 %v6130_v34, %v7568_v57  ;;  %v2890_v26 = vmul.f32 %v7498_v58, %v2778_v53  ;;  %v2891_v10 = vmul.f32 %v7500_v40, %v2778_v53  ;;  %v6367_v3 = vpop.permute.xlu0 %3070 }
 0x388   : > { %7567 = vst [vmem:[#allocation27_spill] sm:$0xff] %v6354_v27  ;;  %v2699_v41 = vadd.f32 %v6348_v46, %v2698_v44  ;;  %v2944_v32 = vadd.f32 %v2943_v56, %v2886_v18  ;;  %v2981_v38 = vadd.f32 %v2980_v1, %v2887_v7  ;;  %v2892_v44 = vmul.f32 %v6140_v17, %v7570_v2  ;;  %v7571_v18 = vld [vmem:[#allocation69_spill] sm:$0xff] }
 0x389   : > { %v2786_v47 = vpop.permute.xlu1 %2785  ;;  %v2736_v48 = vadd.f32 %v6354_v27, %v2735_v23  ;;  %v6365_v5 = vpop.eup %3802  ;;  %v2893_v57 = vmul.f32 %v6146_v6, %v7570_v2  ;;  %v7574_v1 = vld [vmem:[#allocation85_spill] sm:$0xff] }
 0x38a   : > { %7569 = vst [vmem:[#allocation125_spill] sm:$0xff] %v6365_v5  ;;  %v2945_v4 = vadd.f32 %v2944_v32, %v2888_v43  ;;  %v2982_v29 = vadd.f32 %v2981_v38, %v2889_v60  ;;  %v2894_v56 = vmul.f32 %v7507_v13, %v2786_v47  ;;  %v2895_v7 = vmul.f32 %v7571_v18, %v2786_v47  ;;  %v7575_v43 = vld [vmem:[#allocation100_spill] sm:$0xff]  ;;  %v7578_v47 = vld [vmem:[#allocation131_spill] sm:$0xff] }
 0x38b   : > { %v2896_v60 = vmul.f32 %v7575_v43, %v7574_v1  ;;  %v2897_v27 = vmul.f32 %v6168_v28, %v7574_v1  ;;  %v6387_v13 = vpop.permute.xlu0 %3078  ;;  %v7580_v43 = vld [vmem:[#allocation110_spill] sm:$0xff] }
 0x38c   : > { %v2946_v16 = vadd.f32 %v2945_v4, %v2890_v26  ;;  %v2983_v11 = vadd.f32 %v2982_v29, %v2891_v10  ;;  %v7577_v4 = vld [vmem:[#allocation127_spill] sm:$0xff] }
 0x38d   : > { %v2794_v46 = vpop.permute.xlu1 %2793  ;;  %v6375_v53 = vpop.eup %3804 }
 0x38e   : > { %7572 = vst [vmem:[#allocation73_spill] sm:$0xff] %v6375_v53  ;;  %v2947_v23 = vadd.f32 %v2946_v16, %v2892_v44  ;;  %v2984_v32 = vadd.f32 %v2983_v11, %v2893_v57  ;;  %v2898_v29 = vmul.f32 %v7577_v4, %v2794_v46  ;;  %v2899_v18 = vmul.f32 %v7578_v47, %v2794_v46  ;;  %v7579_v57 = vld [vmem:[#allocation75_spill] sm:$0xff]  ;;  %v7581_v46 = vld [vmem:[#allocation57_spill] sm:$0xff] }
 0x38f   : > { %v6377_v38 = vpop.eup %3806  ;;  %v2700_v44 = vadd.f32 %v6365_v5, %v2699_v41  ;;  %v2900_v17 = vmul.f32 %v7580_v43, %v7579_v57  ;;  %v2901_v1 = vmul.f32 %v6188_v50, %v7579_v57  ;;  %v7584_v57 = vld [vmem:[#allocation94_spill] sm:$0xff]  ;;  %v7585_v5 = vld [vmem:[#allocation105_spill] sm:$0xff] }
 0x390   : > { %7573 = vst [vmem:[#allocation34_spill] sm:$0xff] %v6377_v38  ;;  %v6383_v6 = vpop.eup %3808  ;;  %v2948_v26 = vadd.f32 %v2947_v23, %v2894_v56  ;;  %v2985_v10 = vadd.f32 %v2984_v32, %v2895_v7  ;;  %v2737_v56 = vadd.f32 %v6375_v53, %v2736_v48  ;;  %v2904_v50 = vmul.f32 %v7585_v5, %v7584_v57  ;;  %v7586_v48 = vld [vmem:[#allocation115_spill] sm:$0xff] }
 0x391   : > { %v2802_v2 = vpop.permute.xlu1 %2801  ;;  %7576 = vst [vmem:[#allocation39_spill] sm:$0xff] %v6383_v6 }
 0x392   : > { %v2949_v16 = vadd.f32 %v2948_v26, %v2896_v60  ;;  %v2986_v11 = vadd.f32 %v2985_v10, %v2897_v27  ;;  %v2902_v32 = vmul.f32 %v5969_v49, %v2802_v2  ;;  %v2903_v47 = vmul.f32 %v7581_v46, %v2802_v2  ;;  %v6403_v10 = vpop.permute.xlu0 %3086  ;;  %v7587_v2 = vld [vmem:[#allocation60_spill] sm:$0xff] }
 0x393   : > { %v6398_v60 = vadd.f32 %v6377_v38, %v2700_v44  ;;  %v6401_v27 = vadd.f32 %v6383_v6, %v2737_v56  ;;  %v7588_v44 = vld [vmem:[#allocation96_spill] sm:$0xff]  ;;  %v7589_v6 = vld [vmem:[#allocation102_spill] sm:$0xff] }
 0x394   : > { %v2950_v7 = vadd.f32 %v2949_v16, %v2898_v29  ;;  %v2987_v23 = vadd.f32 %v2986_v11, %v2899_v18  ;;  %v2905_v18 = vmul.f32 %v7586_v48, %v7584_v57 }
 0x395   : > { %v2810_v28 = vpop.permute.xlu1 %2809  ;;  %7582 = vst [vmem:[#allocation118_spill] sm:$0xff] %v6398_v60  ;;  %7583 = vst [vmem:[#allocation40_spill] sm:$0xff] %v6401_v27 }
 0x396   : > { %v2951_v41 = vadd.f32 %v2950_v7, %v2900_v17  ;;  %v2988_v26 = vadd.f32 %v2987_v23, %v2901_v1  ;;  %v2906_v53 = vmul.f32 %v7587_v2, %v2810_v28  ;;  %v2907_v38 = vmul.f32 %v7588_v44, %v2810_v28  ;;  %v7590_v28 = vld [vmem:[#allocation144_spill] sm:$0xff] }
 0x397   : > { %v2908_v17 = vmul.f32 %v6239_v35, %v7589_v6  ;;  %v2909_v1 = vmul.f32 %v6246_v20, %v7589_v6 }
 0x398   : > { %v2952_v16 = vadd.f32 %v2951_v41, %v2902_v32  ;;  %v2989_v11 = vadd.f32 %v2988_v26, %v2903_v47  ;;  %v6417_v47 = vpop.permute.xlu0 %3094 }
 0x399   : > { %v2818_v29 = vpop.permute.xlu1 %2817 }
 0x39a   : > { %v2953_v60 = vadd.f32 %v2952_v16, %v2904_v50  ;;  %v2990_v56 = vadd.f32 %v2989_v11, %v2905_v18  ;;  %v2910_v57 = vmul.f32 %v6026_v55, %v2818_v29  ;;  %v2911_v32 = vmul.f32 %v6030_v21, %v2818_v29  ;;  %v7591_v21 = vld [vmem:[#allocation101_spill] sm:$0xff] }
 0x39b   : > { %v2912_v50 = vmul.f32 %v6255_v22, %v7590_v28  ;;  %v2913_v18 = vmul.f32 %v6261_v45, %v7590_v28 }
 0x39c   : > { %v2954_v23 = vadd.f32 %v2953_v60, %v2906_v53  ;;  %v2991_v27 = vadd.f32 %v2990_v56, %v2907_v38  ;;  %v6425_v29 = vpop.permute.xlu0 %3102 }
 0x39d   : > { %v2826_v7 = vpop.permute.xlu1 %2825 }
 0x39e   : > { %v2955_v41 = vadd.f32 %v2954_v23, %v2908_v17  ;;  %v2992_v26 = vadd.f32 %v2991_v27, %v2909_v1  ;;  %v2914_v53 = vmul.f32 %v6035_v59, %v2826_v7  ;;  %v2915_v38 = vmul.f32 %v6040_v33, %v2826_v7  ;;  %v7592_v7 = vld [vmem:[#allocation106_spill] sm:$0xff] }
 0x39f   : > { %v2916_v27 = vmul.f32 %v6281_v30, %v7591_v21  ;;  %v2917_v17 = vmul.f32 %v6287_v14, %v7591_v21  ;;  %v7593_v30 = vld [vmem:[#allocation23_spill] sm:$0xff] }
 0x3a0   : > { %v2956_v11 = vadd.f32 %v2955_v41, %v2910_v57  ;;  %v2993_v6 = vadd.f32 %v2992_v26, %v2911_v32 }
 0x3a1   : > { %v2834_v16 = vpop.permute.xlu1 %2833 }
 0x3a2   : > { %v2957_v60 = vadd.f32 %v2956_v11, %v2912_v50  ;;  %v2994_v56 = vadd.f32 %v2993_v6, %v2913_v18  ;;  %v2918_v57 = vmul.f32 %v7557_v12, %v2834_v16  ;;  %v2919_v32 = vmul.f32 %v6049_v42, %v2834_v16 }
 0x3a3   : > { %v2920_v50 = vmul.f32 %v6297_v62, %v7592_v7  ;;  %v2921_v18 = vmul.f32 %v6302_v0, %v7592_v7  ;;  %v7597_v7 = vld [vmem:[#allocation108_spill] sm:$0xff] }
 0x3a4   : > { %v2958_v23 = vadd.f32 %v2957_v60, %v2914_v53  ;;  %v2995_v28 = vadd.f32 %v2994_v56, %v2915_v38  ;;  %v6439_v38 = vpop.permute.xlu0 %3110  ;;  %v7594_v60 = vld [vmem:[#allocation63_spill] sm:$0xff] }
 0x3a5   : > { %v2842_v1 = vpop.permute.xlu1 %2841 }
 0x3a6   : > { %v2959_v41 = vadd.f32 %v2958_v23, %v2916_v27  ;;  %v2996_v26 = vadd.f32 %v2995_v28, %v2917_v17  ;;  %v2922_v33 = vmul.f32 %v7593_v30, %v2842_v1  ;;  %v2923_v21 = vmul.f32 %v6194_v54, %v2842_v1  ;;  %v7595_v23 = vld [vmem:[#allocation111_spill] sm:$0xff]  ;;  %v7596_v28 = vld [vmem:[#allocation98_spill] sm:$0xff] }
 0x3a7   : > { %v3167_v62 = vmul.f32 %v7596_v28, %v7595_v23  ;;  %v2924_v1 = vmul.f32 %v6309_v37, %v7597_v7  ;;  %v2925_v54 = vmul.f32 %v6313_v31, %v7597_v7  ;;  %v7601_v28 = vld [vmem:[#allocation13_spill] sm:$0xff] }
 0x3a8   : > { %v2960_v11 = vadd.f32 %v2959_v41, %v2918_v57  ;;  %v2997_v6 = vadd.f32 %v2996_v26, %v2919_v32  ;;  %v3168_v57 = vmul.f32 %v6080_v25, %v7595_v23  ;;  %v6457_v25 = vpop.permute.xlu0 %3118 }
 0x3aa   : > { %v3039_v53 = vpop.permute.xlu1 %3038  ;;  %v2961_v27 = vadd.f32 %v2960_v11, %v2920_v50  ;;  %v2998_v17 = vadd.f32 %v2997_v6, %v2921_v18 }
 0x3ab   : > { %v3165_v56 = vmul.f32 %v7594_v60, %v3039_v53  ;;  %v3166_v16 = vmul.f32 %v5886_v63, %v3039_v53 }
 0x3ac   : > { %v2962_v32 = vadd.f32 %v2961_v27, %v2922_v33  ;;  %v2999_v41 = vadd.f32 %v2998_v17, %v2923_v21  ;;  %v7598_v17 = vld [vmem:[#allocation135_spill] sm:$0xff] }
 0x3ad   : > { %v3229_v60 = vadd.f32 %v3167_v62, %v3165_v56  ;;  %v3266_v30 = vadd.f32 %v3168_v57, %v3166_v16  ;;  %v7599_v62 = vld [vmem:[#allocation49_spill] sm:$0xff]  ;;  %v7600_v16 = vld [vmem:[#allocation18_spill] sm:$0xff] }
 0x3ae   : > { %v3047_v26 = vpop.permute.xlu1 %3046  ;;  %v6453_v18 = vadd.f32 %v2962_v32, %v2924_v1  ;;  %v6455_v11 = vadd.f32 %v2999_v41, %v2925_v54  ;;  %v2197_v56 = vmul.f32 %v7599_v62, %v7598_v17  ;;  %v7602_v57 = vld [vmem:[#allocation29_spill] sm:$0xff] }
 0x3af   : > { %v3169_v63 = vmul.f32 %v6093_v19, %v3047_v26  ;;  %v3170_v50 = vmul.f32 %v6098_v61, %v3047_v26  ;;  %v3173_v19 = vmul.f32 %v6108_v52, %v7600_v16  ;;  %v3174_v61 = vmul.f32 %v6115_v39, %v7600_v16  ;;  %v6471_v26 = vpop.permute.xlu0 %3126  ;;  %v7605_v16 = vld [vmem:[#allocation89_spill] sm:$0xff] }
 0x3b0   : > { %v2412_v32 = vmul.f32 %v7602_v57, %v7601_v28 }
 0x3b1   : > { %v3230_v33 = vadd.f32 %v3229_v60, %v3169_v63  ;;  %v3267_v6 = vadd.f32 %v3266_v30, %v3170_v50  ;;  %v7603_v30 = vld [vmem:[#allocation25_spill] sm:$0xff]  ;;  %v7604_v60 = vld [vmem:[#allocation55_spill] sm:$0xff]  ;;  %v3177_v50 = vmul.f32 %v6124_v9, %v6350_v51 }
 0x3b2   : > { %v3051_v21 = vpop.permute.xlu1 %3050  ;;  %v2198_v41 = vmul.f32 %v7603_v30, %v7598_v17  ;;  %v2413_v39 = vmul.f32 %v7604_v60, %v7601_v28  ;;  %v2476_v63 = vadd.f32 %v2412_v32, %v2197_v56  ;;  %v7606_v56 = vld [vmem:[#allocation37_spill] sm:$0xff]  ;;  %v7607_v9 = vld [vmem:[#allocation99_spill] sm:$0xff] }
 0x3b3   : > { %v3171_v53 = vmul.f32 %v5901_v24, %v3051_v21  ;;  %v3172_v27 = vmul.f32 %v5907_v15, %v3051_v21 }
 0x3b5   : > { %v3231_v54 = vadd.f32 %v3230_v33, %v3171_v53  ;;  %v3268_v23 = vadd.f32 %v3267_v6, %v3172_v27  ;;  %v3178_v33 = vmul.f32 %v6130_v34, %v6350_v51  ;;  %v2477_v53 = vadd.f32 %v2413_v39, %v2198_v41 }
 0x3b6   : > { %v3059_v24 = vpop.permute.xlu1 %3058 }
 0x3b7   : > { %v3175_v15 = vmul.f32 %v5912_v36, %v3059_v24  ;;  %v3176_v7 = vmul.f32 %v5918_v8, %v3059_v24  ;;  %v3232_v1 = vadd.f32 %v3231_v54, %v3173_v19  ;;  %v3269_v52 = vadd.f32 %v3268_v23, %v3174_v61  ;;  %v6488_v23 = vpop.permute.xlu0 %3134 }
 0x3b8   : > { %v2542_v19 = vsub.f32 %v2476_v63, %v7605_v16  ;;  %v3181_v61 = vmul.f32 %v7606_v56, %v6367_v3  ;;  %v3182_v54 = vmul.f32 %v7607_v9, %v6367_v3  ;;  %v2543_v28 = vsub.f32 %v2477_v53, %v7605_v16 }
 0x3b9   : > { %v3233_v6 = vadd.f32 %v3232_v1, %v3175_v15  ;;  %v3270_v21 = vadd.f32 %v3269_v52, %v3176_v7  ;;  %v7610_v7 = vld [vmem:[#allocation100_spill] sm:$0xff] }
 0x3ba   : > { %v3067_v27 = vpop.permute.xlu1 %3066  ;;  %v2668_v15 = vmul.f32 1.442695, %v2542_v19  ;;  %v3185_v1 = vmul.f32 %v7610_v7, %v6387_v13  ;;  %v7611_v52 = vld [vmem:[#allocation28_spill] sm:$0xff]  ;;  %v2670_v63 = vmul.f32 1.442695, %v2543_v28 }
 0x3bb   : > { %v3179_v36 = vmul.f32 %v7498_v58, %v3067_v27  ;;  %v3180_v8 = vmul.f32 %v7500_v40, %v3067_v27  ;;  %v3234_v17 = vadd.f32 %v3233_v6, %v3177_v50  ;;  %v3271_v62 = vadd.f32 %v3270_v21, %v3178_v33  ;;  %v7608_v58 = vld [vmem:[#allocation120_spill] sm:$0xff]  ;;  %v7609_v40 = vld [vmem:[#allocation69_spill] sm:$0xff]  ;;  %v6497_v33 = vpop.permute.xlu0 %3138  ;;  %v7612_v21 = vld [vmem:[#allocation131_spill] sm:$0xff] }
 0x3bc   : > { %v3186_v3 = vmul.f32 %v7611_v52, %v6387_v13  ;;  %3810 = vpow2.f32 %v2668_v15  ;;  %v7614_v15 = vld [vmem:[#allocation72_spill] sm:$0xff] }
 0x3bd   : > { %v3235_v34 = vadd.f32 %v3234_v17, %v3179_v36  ;;  %v3272_v51 = vadd.f32 %v3271_v62, %v3180_v8  ;;  %v3189_v8 = vmul.f32 %v7580_v43, %v6403_v10  ;;  %v7613_v17 = vld [vmem:[#allocation104_spill] sm:$0xff]  ;;  %3812 = vpow2.f32 %v2670_v63 }
 0x3be   : > { %v3075_v57 = vpop.permute.xlu1 %3074  ;;  %v3190_v62 = vmul.f32 %v7613_v17, %v6403_v10  ;;  %v7616_v63 = vld [vmem:[#allocation40_spill] sm:$0xff] }
 0x3bf   : > { %v3183_v32 = vmul.f32 %v7608_v58, %v3075_v57  ;;  %v3184_v30 = vmul.f32 %v7609_v40, %v3075_v57  ;;  %v3236_v41 = vadd.f32 %v3235_v34, %v3181_v61  ;;  %v3273_v24 = vadd.f32 %v3272_v51, %v3182_v54  ;;  %v6511_v43 = vpop.permute.xlu0 %3142 }
 0x3c0   : > { %v3193_v54 = vmul.f32 %v7585_v5, %v6417_v47  ;;  %v3194_v34 = vmul.f32 %v7586_v48, %v6417_v47  ;;  %v3198_v5 = vmul.f32 %v6246_v20, %v6425_v29  ;;  %v3202_v20 = vmul.f32 %v6261_v45, %v6439_v38 }
 0x3c1   : > { %v3237_v60 = vadd.f32 %v3236_v41, %v3183_v32  ;;  %v3274_v39 = vadd.f32 %v3273_v24, %v3184_v30  ;;  %v3206_v45 = vmul.f32 %v6287_v14, %v6457_v25 }
 0x3c2   : > { %v3083_v50 = vpop.permute.xlu1 %3082 }
 0x3c3   : > { %v3187_v6 = vmul.f32 %v7577_v4, %v3083_v50  ;;  %v3188_v53 = vmul.f32 %v7612_v21, %v3083_v50  ;;  %v3238_v27 = vadd.f32 %v3237_v60, %v3185_v1  ;;  %v3275_v36 = vadd.f32 %v3274_v39, %v3186_v3  ;;  %v3147_v41 = vpop.permute.xlu0 %3146  ;;  %v7615_v60 = vld [vmem:[#allocation118_spill] sm:$0xff] }
 0x3c5   : > { %v3239_v13 = vadd.f32 %v3238_v27, %v3187_v6  ;;  %v3276_v16 = vadd.f32 %v3275_v36, %v3188_v53  ;;  %v7617_v6 = vld [vmem:[#allocation97_spill] sm:$0xff] }
 0x3c6   : > { %v3091_v19 = vpop.permute.xlu1 %3090  ;;  %v6519_v48 = vpop.eup %3810 }
 0x3c7   : > { %v3191_v56 = vmul.f32 %v5969_v49, %v3091_v19  ;;  %v3192_v61 = vmul.f32 %v7581_v46, %v3091_v19  ;;  %v3240_v4 = vadd.f32 %v3239_v13, %v3189_v8  ;;  %v3277_v9 = vadd.f32 %v3276_v16, %v3190_v62  ;;  %v6523_v1 = vpop.eup %3812 }
 0x3c8   : > { %v3197_v46 = vmul.f32 %v6239_v35, %v6425_v29  ;;  %v3201_v35 = vmul.f32 %v6255_v22, %v6439_v38  ;;  %v2702_v39 = vadd.f32 %v6519_v48, %v7615_v60  ;;  %v7618_v22 = vld [vmem:[#allocation109_spill] sm:$0xff]  ;;  %v3151_v38 = vpop.permute.xlu0 %3150 }
 0x3c9   : > { %v3241_v51 = vadd.f32 %v3240_v4, %v3191_v56  ;;  %v3278_v10 = vadd.f32 %v3277_v9, %v3192_v61  ;;  %v3205_v36 = vmul.f32 %v7618_v22, %v6457_v25  ;;  %v7619_v4 = vld [vmem:[#allocation64_spill] sm:$0xff] }
 0x3ca   : > { %v3099_v28 = vpop.permute.xlu1 %3098  ;;  %v2703_v13 = vrot.slane %v2702_v39, 4  ;;  %v3209_v9 = vmul.f32 %v7619_v4, %v6471_v26 }
 0x3cb   : > { %v3195_v57 = vmul.f32 %v7587_v2, %v3099_v28  ;;  %v3196_v58 = vmul.f32 %v7588_v44, %v3099_v28  ;;  %v3242_v49 = vadd.f32 %v3241_v51, %v3193_v54  ;;  %v3279_v32 = vadd.f32 %v3278_v10, %v3194_v34 }
 0x3cc   : > { %v3210_v54 = vmul.f32 %v6302_v0, %v6471_v26  ;;  %v2704_v51 = vadd.f32 %v2703_v13, %v2702_v39  ;;  %v3155_v28 = vpop.permute.xlu0 %3154  ;;  %v7622_v26 = vld [vmem:[#allocation116_spill] sm:$0xff]  ;;  %v7629_v13 = vld [vmem:[#allocation27_spill] sm:$0xff] }
 0x3cd   : > { %v3243_v40 = vadd.f32 %v3242_v49, %v3195_v57  ;;  %v3280_v30 = vadd.f32 %v3279_v32, %v3196_v58  ;;  %v7620_v57 = vld [vmem:[#allocation23_spill] sm:$0xff]  ;;  %v7621_v49 = vld [vmem:[#allocation70_spill] sm:$0xff] }
 0x3ce   : > { %v3107_v47 = vpop.permute.xlu1 %3106 }
 0x3cf   : > { %v3199_v24 = vmul.f32 %v6026_v55, %v3107_v47  ;;  %v3200_v2 = vmul.f32 %v7614_v15, %v3107_v47  ;;  %v3244_v7 = vadd.f32 %v3243_v40, %v3197_v46  ;;  %v3281_v44 = vadd.f32 %v3280_v30, %v3198_v5  ;;  %v7623_v47 = vld [vmem:[#allocation24_spill] sm:$0xff] }
 0x3d0   : > { %v2739_v55 = vadd.f32 %v6523_v1, %v7616_v63  ;;  %v3213_v46 = vmul.f32 %v6309_v37, %v6488_v23  ;;  %v3214_v5 = vmul.f32 %v6313_v31, %v6488_v23  ;;  %v3215_v30 = vmul.f32 %v7622_v26, %v6497_v33  ;;  %v7625_v23 = vld [vmem:[#allocation122_spill] sm:$0xff] }
 0x3d1   : > { %v3245_v29 = vadd.f32 %v3244_v7, %v3199_v24  ;;  %v3282_v52 = vadd.f32 %v3281_v44, %v3200_v2  ;;  %v3216_v24 = vmul.f32 %v7623_v47, %v6497_v33  ;;  %v2705_v44 = vrot.slane %v2704_v51, 2  ;;  %v7626_v63 = vld [vmem:[#allocation62_spill] sm:$0xff] }
 0x3d2   : > { %v3115_v3 = vpop.permute.xlu1 %3114  ;;  %v2740_v16 = vrot.slane %v2739_v55, 4  ;;  %v3219_v33 = vmul.f32 %v7626_v63, %v3147_v41 }
 0x3d3   : > { %v3203_v50 = vmul.f32 %v6035_v59, %v3115_v3  ;;  %v3204_v21 = vmul.f32 %v7617_v6, %v3115_v3  ;;  %v3246_v53 = vadd.f32 %v3245_v29, %v3201_v35  ;;  %v3283_v27 = vadd.f32 %v3282_v52, %v3202_v20  ;;  %v7624_v29 = vld [vmem:[#allocation66_spill] sm:$0xff]  ;;  %v3159_v3 = vpop.permute.xlu0 %3158 }
 0x3d4   : > { %v2741_v10 = vadd.f32 %v2740_v16, %v2739_v55  ;;  %v3217_v31 = vmul.f32 %v7624_v29, %v6511_v43  ;;  %v3218_v52 = vmul.f32 %v7625_v23, %v6511_v43  ;;  %v7627_v55 = vld [vmem:[#allocation74_spill] sm:$0xff]  ;;  %v3222_v16 = vmul.f32 %v7629_v13, %v3151_v38 }
 0x3d5   : > { %v3247_v8 = vadd.f32 %v3246_v53, %v3203_v50  ;;  %v3284_v17 = vadd.f32 %v3283_v27, %v3204_v21  ;;  %v3220_v50 = vmul.f32 %v7627_v55, %v3147_v41  ;;  %v2706_v27 = vadd.f32 %v2705_v44, %v2704_v51  ;;  %v7630_v41 = vld [vmem:[#allocation125_spill] sm:$0xff] }
 0x3d6   : > { %v3123_v62 = vpop.permute.xlu1 %3122  ;;  %v2742_v35 = vrot.slane %v2741_v10, 2 }
 0x3d7   : > { %v3207_v19 = vmul.f32 %v7557_v12, %v3123_v62  ;;  %v3208_v59 = vmul.f32 %v6049_v42, %v3123_v62  ;;  %v3248_v56 = vadd.f32 %v3247_v8, %v3205_v36  ;;  %v3285_v61 = vadd.f32 %v3284_v17, %v3206_v45  ;;  %v7628_v17 = vld [vmem:[#allocation114_spill] sm:$0xff] }
 0x3d8   : > { %v2743_v22 = vadd.f32 %v2742_v35, %v2741_v10  ;;  %v3221_v62 = vmul.f32 %v7628_v17, %v3151_v38 }
 0x3d9   : > { %v3249_v34 = vadd.f32 %v3248_v56, %v3207_v19  ;;  %v3286_v14 = vadd.f32 %v3285_v61, %v3208_v59  ;;  %v3223_v56 = vmul.f32 %v7630_v41, %v3155_v28  ;;  %v7631_v61 = vld [vmem:[#allocation73_spill] sm:$0xff] }
 0x3da   : > { %v3131_v25 = vpop.permute.xlu1 %3130  ;;  %v3224_v4 = vmul.f32 %v7631_v61, %v3155_v28  ;;  %v2744_v51 = vrot.slane %v2743_v22, 1 }
 0x3db   : > { %v3211_v58 = vmul.f32 %v7620_v57, %v3131_v25  ;;  %v3212_v12 = vmul.f32 %v7621_v49, %v3131_v25  ;;  %v3250_v32 = vadd.f32 %v3249_v34, %v3209_v9  ;;  %v3287_v42 = vadd.f32 %v3286_v14, %v3210_v54  ;;  %v3163_v34 = vpop.permute.xlu0 %3162  ;;  %v7633_v49 = vld [vmem:[#allocation39_spill] sm:$0xff] }
 0x3dc   : > { %v2707_v25 = vrot.slane %v2706_v27, 1  ;;  %v3227_v28 = vmul.f32 %v6519_v48, %v3163_v34 }
 0x3dd   : > { %v3251_v40 = vadd.f32 %v3250_v32, %v3211_v58  ;;  %v3288_v0 = vadd.f32 %v3287_v42, %v3212_v12  ;;  %v7632_v58 = vld [vmem:[#allocation34_spill] sm:$0xff]  ;;  %v3226_v12 = vmul.f32 %v7633_v49, %v3159_v3 }
 0x3de   : > { %v3225_v38 = vmul.f32 %v7632_v58, %v3159_v3 }
 0x3df   : > { %v3252_v15 = vadd.f32 %v3251_v40, %v3213_v46  ;;  %v3289_v2 = vadd.f32 %v3288_v0, %v3214_v5  ;;  %v2850_v7 = vpop.permute.xlu1 %2849  ;;  %v3228_v46 = vmul.f32 %v6523_v1, %v3163_v34 }
 0x3e0   : > { %v2926_v20 = vmul.f32 %v7622_v26, %v2850_v7  ;;  %v2927_v37 = vmul.f32 %v7623_v47, %v2850_v7  ;;  %v2708_v26 = vadd.f32 %v2707_v25, %v2706_v27 }
 0x3e1   : > { %v3253_v60 = vadd.f32 %v3252_v15, %v3215_v30  ;;  %v3290_v39 = vadd.f32 %v3289_v2, %v3216_v24  ;;  %v2745_v30 = vadd.f32 %v2744_v51, %v2743_v22 }
 0x3e2   : > { %v2964_v36 = vadd.f32 %v6453_v18, %v2926_v20  ;;  %v3001_v45 = vadd.f32 %v6455_v11, %v2927_v37  ;;  %3814 = vrcp.f32 %v2708_v26 }
 0x3e3   : > { %v3254_v6 = vadd.f32 %v3253_v60, %v3217_v31  ;;  %v3291_v21 = vadd.f32 %v3290_v39, %v3218_v52  ;;  %v2854_v53 = vpop.permute.xlu1 %2853  ;;  %3816 = vrcp.f32 %v2745_v30  ;;  %v3014_v30 = vld [vmem:[#allocation2] ss:$2 sm:$0x3] }
 0x3e4   : > { %v2928_v8 = vmul.f32 %v7624_v29, %v2854_v53  ;;  %v2929_v43 = vmul.f32 %v7625_v23, %v2854_v53 }
 0x3e5   : > { %v3255_v19 = vadd.f32 %v3254_v6, %v3219_v33  ;;  %v3292_v59 = vadd.f32 %v3291_v21, %v3220_v50 }
 0x3e6   : > { %v2965_v9 = vadd.f32 %v2964_v36, %v2928_v8  ;;  %v3002_v54 = vadd.f32 %v3001_v45, %v2929_v43 }
 0x3e7   : > { %v3256_v18 = vadd.f32 %v3255_v19, %v3221_v62  ;;  %v3293_v14 = vadd.f32 %v3292_v59, %v3222_v16  ;;  %v2858_v11 = vpop.permute.xlu1 %2857 }
 0x3e8   : > { %v2930_v10 = vmul.f32 %v7626_v63, %v2858_v11  ;;  %v2931_v57 = vmul.f32 %v7627_v55, %v2858_v11  ;;  %v7634_v11 = vld [vmem:[#allocation52_spill] sm:$0xff] }
 0x3e9   : > { %v3257_v32 = vadd.f32 %v3256_v18, %v3223_v56  ;;  %v3294_v42 = vadd.f32 %v3293_v14, %v3224_v4 }
 0x3ea   : > { %v2966_v47 = vadd.f32 %v2965_v9, %v2930_v10  ;;  %v3003_v24 = vadd.f32 %v3002_v54, %v2931_v57 }
 0x3eb   : > { %v3258_v5 = vadd.f32 %v3257_v32, %v3225_v38  ;;  %v3295_v40 = vadd.f32 %v3294_v42, %v3226_v12  ;;  %v2862_v0 = vpop.permute.xlu1 %2861 }
 0x3ec   : > { %v2932_v15 = vmul.f32 %v7628_v17, %v2862_v0  ;;  %v2933_v2 = vmul.f32 %v7629_v13, %v2862_v0  ;;  %v3815_v13 = vpop.eup %3814 }
 0x3ed   : > { %v3259_v7 = vadd.f32 %v3258_v5, %v3227_v28  ;;  %v3296_v44 = vadd.f32 %v3295_v40, %v3228_v46  ;;  %v3817_v59 = vpop.eup %3816 }
 0x3ee   : > { %v2967_v35 = vadd.f32 %v2966_v47, %v2932_v15  ;;  %v3004_v20 = vadd.f32 %v3003_v24, %v2933_v2 }
 0x3ef   : > { %v3260_v37 = vrot.slane %v3259_v7, 4  ;;  %v3297_v29 = vrot.slane %v3296_v44, 4  ;;  %v2866_v31 = vpop.permute.xlu1 %2865 }
 0x3f0   : > { %v2934_v23 = vmul.f32 %v7630_v41, %v2866_v31  ;;  %v2935_v52 = vmul.f32 %v7631_v61, %v2866_v31 }
 0x3f1   : > { %v3261_v3 = vadd.f32 %v3260_v37, %v3259_v7  ;;  %v3298_v60 = vadd.f32 %v3297_v29, %v3296_v44 }
 0x3f2   : > { %v2968_v55 = vadd.f32 %v2967_v35, %v2934_v23  ;;  %v3005_v50 = vadd.f32 %v3004_v20, %v2935_v52 }
 0x3f3   : > { %v3262_v39 = vrot.slane %v3261_v3, 2  ;;  %v3299_v63 = vrot.slane %v3298_v60, 2  ;;  %v2870_v33 = vpop.permute.xlu1 %2869 }
 0x3f4   : > { %v2936_v6 = vmul.f32 %v7632_v58, %v2870_v33  ;;  %v2937_v21 = vmul.f32 %v7633_v49, %v2870_v33  ;;  %v3303_v58 = vld [vmem:[#allocation2 + $0x1] ss:$2 sm:$0x3] }
 0x3f5   : > { %v3263_v53 = vadd.f32 %v3262_v39, %v3261_v3  ;;  %v3300_v27 = vadd.f32 %v3299_v63, %v3298_v60 }
 0x3f6   : > { %v2969_v22 = vadd.f32 %v2968_v55, %v2936_v6  ;;  %v3006_v36 = vadd.f32 %v3005_v50, %v2937_v21 }
 0x3f7   : > { %v3264_v45 = vrot.slane %v3263_v53, 1  ;;  %v3301_v8 = vrot.slane %v3300_v27, 1  ;;  %v2874_v43 = vpop.permute.xlu1 %2873 }
 0x3f8   : > { %v2938_v17 = vmul.f32 %v6519_v48, %v2874_v43  ;;  %v2939_v62 = vmul.f32 %v6523_v1, %v2874_v43 }
 0x3f9   : > { %v3265_v16 = vadd.f32 %v3264_v45, %v3263_v53  ;;  %v3302_v19 = vadd.f32 %v3301_v8, %v3300_v27 }
 0x3fa   : > { %v2970_v41 = vadd.f32 %v2969_v22, %v2938_v17  ;;  %v3007_v56 = vadd.f32 %v3006_v36, %v2939_v62 }
 0x3fb   : > { %v3304_v61 = vmul.f32 %v3815_v13, %v3265_v16  ;;  %v3305_v4 = vmul.f32 %v3817_v59, %v3302_v19 }
 0x3fc   : > { %v2971_v9 = vrot.slane %v2970_v41, 4  ;;  %v3008_v54 = vrot.slane %v3007_v56, 4 }
 0x3fd   : > { %v3308_v34 = vcombine.low %v3304_v61, %v3305_v4 }
 0x3fe   : > { %v2972_v18 = vadd.f32 %v2971_v9, %v2970_v41  ;;  %v3009_v14 = vadd.f32 %v3008_v54, %v3007_v56 }
 0x3ff   : > { %v3315_v25 = vrot.slane %v3308_v34, %v7634_v11 }
 0x400   : > { %v2973_v51 = vrot.slane %v2972_v18, 2  ;;  %v3010_v10 = vrot.slane %v3009_v14, 2 }
 0x401   : > { %v3322_v48 = vrot.slane %v3315_v25, %v7634_v11 }
 0x402   : > { %v2974_v1 = vadd.f32 %v2973_v51, %v2972_v18  ;;  %v3011_v57 = vadd.f32 %v3010_v10, %v3009_v14 }
 0x403   : > { %v3324_v38 = vadd.f32 %v3322_v48, %v3303_v58 }
 0x404   : > { %v2975_v49 = vrot.slane %v2974_v1, 1  ;;  %v3012_v12 = vrot.slane %v3011_v57, 1 }
 0x405   : > { %3325 = vst.msk [vmem:[#allocation2 + $0x1] ss:$2 sm:$0x3] %vm5468_vm4, %v3324_v38 }
 0x406   : > { %v2976_v42 = vadd.f32 %v2975_v49, %v2974_v1  ;;  %v3013_v28 = vadd.f32 %v3012_v12, %v3011_v57 }
 0x408   : > { %v3015_v46 = vmul.f32 %v3815_v13, %v2976_v42  ;;  %v3016_v5 = vmul.f32 %v3817_v59, %v3013_v28 }
 0x40a   : > { %v3019_v40 = vcombine.low %v3015_v46, %v3016_v5 }
 0x40c   : > { %v3026_v0 = vrot.slane %v3019_v40, %v7634_v11 }
 0x40e   : > { %v3033_v26 = vrot.slane %v3026_v0, %v7634_v11 }
 0x410   : > { %v3035_v47 = vadd.f32 %v3033_v26, %v3014_v30 }
 0x412   : > { %3036 = vst.msk [vmem:[#allocation2] ss:$2 sm:$0x3] %vm5468_vm4, %v3035_v47 }
 0x419   : > { %v3326_v24 = vld [vmem:[#allocation2] sm:$0xf] }
 0x41a   : > { %3327 = vst [vmem:[%s159_s22] sm:$0xf] %v3326_v24 }
 0x41b PF: > { %s18_s17 = sadd.s32 1, %s3871_s17   ;;  %s7636_s14 = smov %s3863_s16 }
 0x41c   : > { %p15_p12 = scmp.ge.s32.totalorder %s18_s17, 6   ;;  %s7637_s15 = smov %s3867_s0 }
 0x41d   : > { %s7638_s16 = smov %s7641_s18  ;;  %s7639_s0 = smov %s7645_s19 }
 0x41e   :  { %17 = sbr.rel (!%p15_p12) target bundleno = 18 (0x12), region = 55 }

</bundles_post_ra>
